<compile_context>
chip_gen: v7x
topology: tpu7x:2x2x1
jax: 0.10.0
libtpu: 0.0.40
codegen_flags: <defaults>
</compile_context>

<pallas_src>
import numpy as np
import jax
import jax.numpy as jnp
from jax import lax
from jax.experimental import pallas as pl
from jax.experimental.pallas import tpu as pltpu

# ---------------- config (mirrors the PyTorch `args`) ----------------
B, T = 2, 8
N_EMBD = 32
HEAD_SIZE = 16              # RWKV_HEAD_SIZE_A
DIM_ATT = 32                # == n_embd
DIM_FFN = 64
N_HEAD = DIM_ATT // HEAD_SIZE
G = B * N_HEAD              # (batch, head) pairs carried together through the recurrence
M = B * T
N_LAYER = 4
LAYER_ID = 0
HEAD_SIZE_DIVISOR = 8.0
LN_EPS = 1e-5

VMEM = pl.BlockSpec(memory_space=pltpu.MemorySpace.VMEM)


# ---------------- the fused Block kernel ----------------
def _block_kernel(x_ref, lnp_ref, lnxw_ref, lnxb_ref,
                  wax_ref, waxx_ref, wo_ref, wdec_ref, ufa_ref,
                  fmix_ref, wkf_ref, wrf_ref, wvf_ref, o_ref):
    C, H, N = N_EMBD, N_HEAD, HEAD_SIZE
    f32, bf16 = jnp.float32, jnp.bfloat16

    def ln(z, w, b):                              # LayerNorm over the channel (lane) dim
        mu = jnp.mean(z, axis=-1, keepdims=True)
        var = jnp.mean(jnp.square(z - mu), axis=-1, keepdims=True)
        return (z - mu) * lax.rsqrt(var + LN_EPS) * w + b

    def time_shift(z):                            # nn.ZeroPad2d((0,0,1,-1)); rows are (b,t), t fastest
        shifted = jnp.concatenate([jnp.zeros((1, C), f32), z[:M - 1, :]], axis=0)
        t_idx = lax.broadcasted_iota(jnp.int32, (M, C), 0) % T
        return jnp.where(t_idx == 0, 0.0, shifted)

    def q_bf16(z):                                # emulate the CUDA WKV op's bf16 I/O
        return z.astype(bf16).astype(f32)

    def split_rows(z):                            # (M, N*H) slab -> (G, T, N) rows per (b, h)
        return jnp.stack([z[b * T:(b + 1) * T, h * N:(h + 1) * N]
                          for b in range(B) for h in range(H)], axis=0)

    def split_cols(zT, off):                      # transposed slab (C', M) -> (G, N, T) columns
        return jnp.stack([zT[off + h * N: off + (h + 1) * N, b * T:(b + 1) * T]
                          for b in range(B) for h in range(H)], axis=0)

    def merge_rows(z):                            # (G, T, N) -> (M, C)
        return jnp.concatenate(
            [jnp.concatenate([z[b * H + h] for h in range(H)], axis=-1)
             for b in range(B)], axis=0)

    lnp = lnp_ref[...]                            # (6, C): ln0_w, ln0_b, ln1_w, ln1_b, ln2_w, ln2_b
    x0 = ln(x_ref[...], lnp[0:1], lnp[1:2])       # ln0 (layer 0 only)

    # ---------------- attention branch: RWKV_TimeMix_RWKV5 ----------------
    xa = ln(x0, lnp[2:3], lnp[3:4])               # ln1
    xs = time_shift(xa)
    # time-mix folded into the weights: [r|k|v|g] = x @ (mix*W) + x_shift @ ((1-mix)*W)
    # -> two lane-dense (16,32)x(32,128) bf16 MXU matmuls instead of four narrow ones.
    rkvg = (jnp.dot(xa.astype(bf16), wax_ref[...], preferred_element_type=f32) +
            jnp.dot(xs.astype(bf16), waxx_ref[...], preferred_element_type=f32))
    gpre = rkvg[:, 3 * C:4 * C]
    gate = gpre * jax.nn.sigmoid(gpre)            # SiLU, kept in f32 (v5e-friendly)
    rkq = q_bf16(rkvg[:, 0:2 * C])                # r|k through the op's bf16 interface
    v = q_bf16(rkvg[:, 2 * C:3 * C])

    # One identity matmul transposes the [r|k] slab exactly (values are bf16-representable),
    # hoisting the only lane<->sublane relayout out of the serial recurrence below.
    rc = lax.broadcasted_iota(jnp.int32, (2 * C, 2 * C), 0)
    cc = lax.broadcasted_iota(jnp.int32, (2 * C, 2 * C), 1)
    ident = (rc == cc).astype(bf16)
    rkT = lax.dot_general(ident, rkq.astype(bf16), (((1,), (1,)), ((), ())),
                          preferred_element_type=f32)            # (2C, M) == [r|k]^T, exact

    r_cols = split_cols(rkT, 0)                   # (G, N, T)
    k_cols = split_cols(rkT, C)                   # (G, N, T)
    v_rows = split_rows(v)                        # (G, T, N)
    w_col = wdec_ref[...]                         # (G, N, 1) = exp(-exp(time_decay)) per group
    u_col = ufa_ref[...]                          # (G, N, 1) = time_faaaa per group
    ruk = jnp.sum(r_cols * u_col * k_cols, axis=1, keepdims=True)   # (G, 1, T), precomputed

    # WKV5 recurrence: all (batch, head) pairs at once, T fully unrolled, f32 state,
    # per-step work is VPU broadcasts + one sublane reduce (no MXU on the critical chain).
    state = jnp.zeros((G, N, N), f32)
    ys = []
    for t in range(T):
        r_col = r_cols[:, :, t:t + 1]             # (G, N, 1)
        k_col = k_cols[:, :, t:t + 1]             # (G, N, 1)
        v_row = v_rows[:, t:t + 1, :]             # (G, 1, N)
        y_t = (jnp.sum(r_col * state, axis=1, keepdims=True)    # r . state  (pre-update state)
               + ruk[:, :, t:t + 1] * v_row)                    # + (r.u.k) * v
        state = w_col * state + k_col * v_row                   # decay + outer(k, v)
        ys.append(y_t)
    y = q_bf16(jnp.concatenate(ys, axis=1))       # (G, T, N); the CUDA op returns bf16

    # GroupNorm(n_head, dim_att)(y / head_size_divisor), per (token, head) over N lanes
    yg = y * (1.0 / HEAD_SIZE_DIVISOR)
    mu = jnp.mean(yg, axis=-1, keepdims=True)
    var = jnp.mean(jnp.square(yg - mu), axis=-1, keepdims=True)
    yn = (yg - mu) * lax.rsqrt(var + LN_EPS) * lnxw_ref[...] + lnxb_ref[...]

    gated = merge_rows(yn) * gate                 # (M, C)
    att = jnp.dot(gated.astype(bf16), wo_ref[...], preferred_element_type=f32)
    x1 = x0 + att                                 # first residual

    # ---------------- ffn branch: RWKV_ChannelMix ----------------
    xc = ln(x1, lnp[4:5], lnp[5:6])               # ln2
    xcs = time_shift(xc)
    fmix = fmix_ref[...]                          # (2, C): ffn time_mix_k, time_mix_r
    fmk, fmr = fmix[0:1], fmix[1:2]
    xk2 = xc * fmk + xcs * (1.0 - fmk)
    xr2 = xc * fmr + xcs * (1.0 - fmr)
    kk = jnp.dot(xk2.astype(bf16), wkf_ref[...], preferred_element_type=f32)
    kk = jnp.square(jnp.maximum(kk, 0.0))         # relu(k)^2 in f32
    kv = jnp.dot(kk.astype(bf16), wvf_ref[...], preferred_element_type=f32)
    rr = jnp.dot(xr2.astype(bf16), wrf_ref[...], preferred_element_type=f32)
    o_ref[...] = x1 + jax.nn.sigmoid(rr) * kv     # second residual


# ---------------- Block.forward wrapper (packs params, one pallas_call) ----------------
def block_forward(x, p):
    C, H, N = N_EMBD, N_HEAD, HEAD_SIZE
    bf16 = jnp.bfloat16

    lnp = jnp.stack([p['ln0_w'], p['ln0_b'], p['ln1_w'], p['ln1_b'],
                     p['ln2_w'], p['ln2_b']], axis=0)                     # (6, C)
    lnxw = jnp.tile(p['lnx_w'].reshape(H, N), (B, 1)).reshape(G, 1, N)
    lnxb = jnp.tile(p['lnx_b'].reshape(H, N), (B, 1)).reshape(G, 1, N)

    def mixw(m, w):
        return m[:, None] * w
    wax = jnp.concatenate([mixw(p['att_mix_r'], p['att_wr']),
                           mixw(p['att_mix_k'], p['att_wk']),
                           mixw(p['att_mix_v'], p['att_wv']),
                           mixw(p['att_mix_g'], p['att_wg'])], axis=1).astype(bf16)
    waxx = jnp.concatenate([mixw(1.0 - p['att_mix_r'], p['att_wr']),
                            mixw(1.0 - p['att_mix_k'], p['att_wk']),
                            mixw(1.0 - p['att_mix_v'], p['att_wv']),
                            mixw(1.0 - p['att_mix_g'], p['att_wg'])], axis=1).astype(bf16)
    wo = p['att_wo'].astype(bf16)

    # WKV decay / bonus in the CUDA op's bf16 interface precision, as per-group columns.
    def q(z):
        return z.astype(bf16).astype(jnp.float32)
    eew = jnp.exp(-jnp.exp(q(p['time_decay'])))                           # (H, N)
    wdec = jnp.tile(eew, (B, 1)).reshape(G, N, 1)
    ufa = jnp.tile(q(p['time_faaaa']), (B, 1)).reshape(G, N, 1)

    fmix = jnp.stack([p['ffn_mix_k'], p['ffn_mix_r']], axis=0)            # (2, C)
    wkf = p['ffn_wk'].astype(bf16)
    wrf = p['ffn_wr'].astype(bf16)
    wvf = p['ffn_wv'].astype(bf16)

    out = pl.pallas_call(
        _block_kernel,
        out_shape=jax.ShapeDtypeStruct((M, C), jnp.float32),
        in_specs=[VMEM] * 13,
        out_specs=VMEM,
    )(x.reshape(M, C), lnp, lnxw, lnxb, wax, waxx, wo, wdec, ufa,
      fmix, wkf, wrf, wvf)
    return out.reshape(B, T, C)


# ---------------- parameters (deterministic, shapes per __init__) ----------------
def init_params(key):
    C, H, N = N_EMBD, N_HEAD, HEAD_SIZE
    ks = jax.random.split(key, 16)

    def lin(k, fi, fo):
        # stored as (in, out) == PyTorch Linear.weight.T
        return 0.02 * jax.random.normal(k, (fi, fo), jnp.float32)

    p = {}
    p['ln0_w'] = 1.0 + 0.1 * jax.random.normal(ks[0], (C,), jnp.float32)
    p['ln0_b'] = 0.1 * jax.random.normal(ks[1], (C,), jnp.float32)
    p['ln1_w'] = 1.0 + 0.1 * jax.random.normal(ks[2], (C,), jnp.float32)
    p['ln1_b'] = 0.1 * jax.random.normal(ks[3], (C,), jnp.float32)
    p['ln2_w'] = 1.0 + 0.1 * jax.random.normal(ks[4], (C,), jnp.float32)
    p['ln2_b'] = 0.1 * jax.random.normal(ks[5], (C,), jnp.float32)
    p['lnx_w'] = 1.0 + 0.1 * jax.random.normal(ks[6], (DIM_ATT,), jnp.float32)
    p['lnx_b'] = 0.1 * jax.random.normal(ks[7], (DIM_ATT,), jnp.float32)
    p['att_wr'] = lin(ks[8], C, DIM_ATT)
    p['att_wk'] = lin(ks[9], C, DIM_ATT)
    p['att_wv'] = lin(ks[10], C, DIM_ATT)
    p['att_wg'] = lin(ks[11], C, DIM_ATT)
    p['att_wo'] = lin(ks[12], DIM_ATT, C)
    p['ffn_wk'] = lin(ks[13], C, DIM_FFN)
    p['ffn_wr'] = lin(ks[14], C, C)
    p['ffn_wv'] = lin(ks[15], DIM_FFN, C)

    # deterministic RWKV schedule params, exactly as in __init__ (layer 0 of N_LAYER)
    ratio_0_to_1 = LAYER_ID / (N_LAYER - 1)
    ratio_1_to_almost0 = 1.0 - LAYER_ID / N_LAYER
    ddd = jnp.arange(C, dtype=jnp.float32) / C
    p['att_mix_k'] = ddd ** ratio_1_to_almost0
    p['att_mix_v'] = ddd ** ratio_1_to_almost0 + 0.3 * ratio_0_to_1
    p['att_mix_r'] = ddd ** (0.5 * ratio_1_to_almost0)
    p['att_mix_g'] = ddd ** (0.5 * ratio_1_to_almost0)
    n = jnp.arange(DIM_ATT, dtype=jnp.float32)
    decay_speed = -6.0 + 5.0 * (n / (DIM_ATT - 1)) ** (0.7 + 1.3 * ratio_0_to_1)
    p['time_decay'] = decay_speed.reshape(H, N)
    zigzag = (jnp.mod(n + 1.0, 3.0) - 1.0) * 0.1
    p['time_faaaa'] = (ratio_0_to_1 * (1.0 - n / (DIM_ATT - 1)) + zigzag).reshape(H, N)
    p['ffn_mix_k'] = ddd ** ratio_1_to_almost0
    p['ffn_mix_r'] = ddd ** ratio_1_to_almost0
    return p


# ---------------- pure-JAX reference (mirrors the PyTorch forward) ----------------
def block_reference(x, p):
    H, N, C = N_HEAD, HEAD_SIZE, N_EMBD

    def ln(z, w, b):
        m = jnp.mean(z, -1, keepdims=True)
        v = jnp.mean((z - m) ** 2, -1, keepdims=True)
        return (z - m) / jnp.sqrt(v + LN_EPS) * w + b

    def ts(z):
        return jnp.pad(z, ((0, 0), (1, 0), (0, 0)))[:, :-1, :]

    def q(z):
        return z.astype(jnp.bfloat16).astype(jnp.float32)

    x = ln(x, p['ln0_w'], p['ln0_b'])
    xln = ln(x, p['ln1_w'], p['ln1_b']); xx = ts(xln)
    mk, mv, mr, mg = p['att_mix_k'], p['att_mix_v'], p['att_mix_r'], p['att_mix_g']
    xk = xln * mk + xx * (1 - mk); xv = xln * mv + xx * (1 - mv)
    xr = xln * mr + xx * (1 - mr); xg_ = xln * mg + xx * (1 - mg)
    r = xr @ p['att_wr']; k = xk @ p['att_wk']; v = xv @ p['att_wv']
    gg = xg_ @ p['att_wg']; g = gg * jax.nn.sigmoid(gg)
    r4, k4, v4 = (q(z).reshape(B, T, H, N) for z in (r, k, v))
    eew = jnp.exp(-jnp.exp(p['time_decay'].astype(jnp.bfloat16).astype(jnp.float32)))
    u = p['time_faaaa'].astype(jnp.bfloat16).astype(jnp.float32)

    def wkv_one(rb, kb, vb):
        def step(state, rkvt):
            rt, kt, vt = rkvt
            kvt = kt[:, :, None] * vt[:, None, :]
            yt = jnp.einsum('hj,hji->hi', rt, state + u[:, :, None] * kvt)
            return eew[:, :, None] * state + kvt, yt
        _, y = lax.scan(step, jnp.zeros((H, N, N), jnp.float32), (rb, kb, vb))
        return y

    y = jax.vmap(wkv_one)(r4, k4, v4)                         # (B, T, H, N)
    y = q(y)
    yg = (y / HEAD_SIZE_DIVISOR)
    m = jnp.mean(yg, -1, keepdims=True); var = jnp.mean((yg - m) ** 2, -1, keepdims=True)
    yn = (yg - m) / jnp.sqrt(var + LN_EPS) * p['lnx_w'].reshape(1, 1, H, N) \
         + p['lnx_b'].reshape(1, 1, H, N)
    att_out = (yn.reshape(B, T, C) * g) @ p['att_wo']
    x = x + att_out

    xln2 = ln(x, p['ln2_w'], p['ln2_b']); xx2 = ts(xln2)
    fmk, fmr = p['ffn_mix_k'], p['ffn_mix_r']
    xk2 = xln2 * fmk + xx2 * (1 - fmk); xr2 = xln2 * fmr + xx2 * (1 - fmr)
    kk = jnp.maximum(xk2 @ p['ffn_wk'], 0.0) ** 2
    kv = kk @ p['ffn_wv']
    return x + jax.nn.sigmoid(xr2 @ p['ffn_wr']) * kv


if __name__ == "__main__":
    key = jax.random.PRNGKey(0)
    kx, kp = jax.random.split(key)
    params = init_params(kp)
    x = jax.random.normal(kx, (B, T, N_EMBD), jnp.float32)

    out = jax.jit(block_forward)(x, params)
    out = jax.block_until_ready(out)

    assert out.shape == (B, T, N_EMBD) and out.dtype == jnp.float32
    assert bool(jnp.all(jnp.isfinite(out)))

    ref = block_reference(x, params)
    np.testing.assert_allclose(np.asarray(out), np.asarray(ref), rtol=2e-2, atol=2e-2)

    print("KERNEL_OK")
</pallas_src>

<mosaic_0001>
module attributes {stable_mosaic.version = 11 : i64} {
  func.func @_block_kernel(%arg0: memref<16x32xf32, #tpu.memory_space<vmem>>, %arg1: memref<6x32xf32, #tpu.memory_space<vmem>>, %arg2: memref<4x1x16xf32, #tpu.memory_space<vmem>>, %arg3: memref<4x1x16xf32, #tpu.memory_space<vmem>>, %arg4: memref<32x128xbf16, #tpu.memory_space<vmem>>, %arg5: memref<32x128xbf16, #tpu.memory_space<vmem>>, %arg6: memref<32x32xbf16, #tpu.memory_space<vmem>>, %arg7: memref<4x16x1xf32, #tpu.memory_space<vmem>>, %arg8: memref<4x16x1xf32, #tpu.memory_space<vmem>>, %arg9: memref<2x32xf32, #tpu.memory_space<vmem>>, %arg10: memref<32x64xbf16, #tpu.memory_space<vmem>>, %arg11: memref<32x32xbf16, #tpu.memory_space<vmem>>, %arg12: memref<64x32xbf16, #tpu.memory_space<vmem>>, %arg13: memref<16x32xf32, #tpu.memory_space<vmem>>) attributes {dimension_semantics = [], scalar_prefetch = 0 : i64, scratch_operands = 0 : i64, tpu.core_type = #tpu.core_type<tc>} {
    %c0 = arith.constant 0 : index
    %c0_0 = arith.constant 0 : index
    %0 = vector.load %arg1[%c0, %c0_0] : memref<6x32xf32, #tpu.memory_space<vmem>>, vector<6x32xf32>
    %c0_1 = arith.constant 0 : index
    %c0_2 = arith.constant 0 : index
    %1 = vector.load %arg0[%c0_1, %c0_2] : memref<16x32xf32, #tpu.memory_space<vmem>>, vector<16x32xf32>
    %2 = vector.extract_strided_slice %0 {offsets = [0, 0], sizes = [1, 32], strides = [1, 1]} : vector<6x32xf32> to vector<1x32xf32>
    %3 = vector.extract_strided_slice %0 {offsets = [1, 0], sizes = [1, 32], strides = [1, 1]} : vector<6x32xf32> to vector<1x32xf32>
    %cst = arith.constant dense<0.000000e+00> : vector<16xf32>
    %4 = vector.multi_reduction <add>, %1, %cst [1] : vector<16x32xf32> to vector<16xf32>
    %5 = vector.shape_cast %4 : vector<16xf32> to vector<16x1xf32>
    %cst_3 = arith.constant 3.200000e+01 : f32
    %6 = vector.broadcast %cst_3 : f32 to vector<16x1xf32>
    %7 = arith.divf %5, %6 : vector<16x1xf32>
    %8 = vector.broadcast %7 : vector<16x1xf32> to vector<16x32xf32>
    %9 = arith.subf %1, %8 : vector<16x32xf32>
    %10 = arith.mulf %9, %9 : vector<16x32xf32>
    %cst_4 = arith.constant dense<0.000000e+00> : vector<16xf32>
    %11 = vector.multi_reduction <add>, %10, %cst_4 [1] : vector<16x32xf32> to vector<16xf32>
    %12 = vector.shape_cast %11 : vector<16xf32> to vector<16x1xf32>
    %cst_5 = arith.constant 3.200000e+01 : f32
    %13 = vector.broadcast %cst_5 : f32 to vector<16x1xf32>
    %14 = arith.divf %12, %13 : vector<16x1xf32>
    %15 = vector.broadcast %7 : vector<16x1xf32> to vector<16x32xf32>
    %16 = arith.subf %1, %15 : vector<16x32xf32>
    %cst_6 = arith.constant 9.99999974E-6 : f32
    %17 = vector.broadcast %cst_6 : f32 to vector<16x1xf32>
    %18 = arith.addf %14, %17 : vector<16x1xf32>
    %19 = math.rsqrt %18 : vector<16x1xf32>
    %20 = vector.broadcast %19 : vector<16x1xf32> to vector<16x32xf32>
    %21 = arith.mulf %16, %20 : vector<16x32xf32>
    %22 = vector.broadcast %2 : vector<1x32xf32> to vector<16x32xf32>
    %23 = arith.mulf %21, %22 : vector<16x32xf32>
    %24 = vector.broadcast %3 : vector<1x32xf32> to vector<16x32xf32>
    %25 = arith.addf %23, %24 : vector<16x32xf32>
    %26 = vector.extract_strided_slice %0 {offsets = [2, 0], sizes = [1, 32], strides = [1, 1]} : vector<6x32xf32> to vector<1x32xf32>
    %27 = vector.extract_strided_slice %0 {offsets = [3, 0], sizes = [1, 32], strides = [1, 1]} : vector<6x32xf32> to vector<1x32xf32>
    %cst_7 = arith.constant dense<0.000000e+00> : vector<16xf32>
    %28 = vector.multi_reduction <add>, %25, %cst_7 [1] : vector<16x32xf32> to vector<16xf32>
    %29 = vector.shape_cast %28 : vector<16xf32> to vector<16x1xf32>
    %cst_8 = arith.constant 3.200000e+01 : f32
    %30 = vector.broadcast %cst_8 : f32 to vector<16x1xf32>
    %31 = arith.divf %29, %30 : vector<16x1xf32>
    %32 = vector.broadcast %31 : vector<16x1xf32> to vector<16x32xf32>
    %33 = arith.subf %25, %32 : vector<16x32xf32>
    %34 = arith.mulf %33, %33 : vector<16x32xf32>
    %cst_9 = arith.constant dense<0.000000e+00> : vector<16xf32>
    %35 = vector.multi_reduction <add>, %34, %cst_9 [1] : vector<16x32xf32> to vector<16xf32>
    %36 = vector.shape_cast %35 : vector<16xf32> to vector<16x1xf32>
    %cst_10 = arith.constant 3.200000e+01 : f32
    %37 = vector.broadcast %cst_10 : f32 to vector<16x1xf32>
    %38 = arith.divf %36, %37 : vector<16x1xf32>
    %39 = vector.broadcast %31 : vector<16x1xf32> to vector<16x32xf32>
    %40 = arith.subf %25, %39 : vector<16x32xf32>
    %cst_11 = arith.constant 9.99999974E-6 : f32
    %41 = vector.broadcast %cst_11 : f32 to vector<16x1xf32>
    %42 = arith.addf %38, %41 : vector<16x1xf32>
    %43 = math.rsqrt %42 : vector<16x1xf32>
    %44 = vector.broadcast %43 : vector<16x1xf32> to vector<16x32xf32>
    %45 = arith.mulf %40, %44 : vector<16x32xf32>
    %46 = vector.broadcast %26 : vector<1x32xf32> to vector<16x32xf32>
    %47 = arith.mulf %45, %46 : vector<16x32xf32>
    %48 = vector.broadcast %27 : vector<1x32xf32> to vector<16x32xf32>
    %49 = arith.addf %47, %48 : vector<16x32xf32>
    %cst_12 = arith.constant 0.000000e+00 : f32
    %50 = vector.broadcast %cst_12 : f32 to vector<1x32xf32>
    %51 = vector.extract_strided_slice %49 {offsets = [0, 0], sizes = [15, 32], strides = [1, 1]} : vector<16x32xf32> to vector<15x32xf32>
    %52 = tpu.concatenate %50, %51 in 0 : vector<1x32xf32>, vector<15x32xf32> -> vector<16x32xf32>
    %53 = tpu.iota {dimensions = array<i32: 0>} : vector<16x32xi32>
    %c8_i32 = arith.constant 8 : i32
    %c0_i32 = arith.constant 0 : i32
    %54 = arith.cmpi eq, %c8_i32, %c0_i32 : i32
    %c1_i32 = arith.constant 1 : i32
    %55 = arith.select %54, %c1_i32, %c8_i32 : i32
    %56 = vector.broadcast %55 : i32 to vector<16x32xi32>
    %57 = arith.remsi %53, %56 : vector<16x32xi32>
    %c0_i32_13 = arith.constant 0 : i32
    %58 = vector.broadcast %c0_i32_13 : i32 to vector<16x32xi32>
    %59 = arith.cmpi ne, %57, %58 : vector<16x32xi32>
    %c0_i32_14 = arith.constant 0 : i32
    %60 = vector.broadcast %c0_i32_14 : i32 to vector<16x32xi32>
    %61 = arith.cmpi slt, %57, %60 : vector<16x32xi32>
    %c0_i32_15 = arith.constant 0 : i32
    %62 = arith.cmpi slt, %55, %c0_i32_15 : i32
    %63 = vector.broadcast %62 : i1 to vector<16x32xi1>
    %64 = vector.broadcast %63 : vector<16x32xi1> to vector<16x32xi1>
    %65 = arith.xori %61, %64 : vector<16x32xi1>
    %66 = arith.andi %65, %59 : vector<16x32xi1>
    %67 = vector.broadcast %55 : i32 to vector<16x32xi32>
    %68 = arith.addi %57, %67 : vector<16x32xi32>
    %69 = arith.select %66, %68, %57 : vector<16x32xi1>, vector<16x32xi32>
    %c0_i32_16 = arith.constant 0 : i32
    %70 = vector.broadcast %c0_i32_16 : i32 to vector<16x32xi32>
    %71 = arith.cmpi eq, %69, %70 : vector<16x32xi32>
    %cst_17 = arith.constant 0.000000e+00 : f32
    %72 = vector.broadcast %cst_17 : f32 to vector<16x32xf32>
    %73 = arith.select %71, %72, %52 : vector<16x32xi1>, vector<16x32xf32>
    %74 = arith.truncf %49 : vector<16x32xf32> to vector<16x32xbf16>
    %c0_18 = arith.constant 0 : index
    %c0_19 = arith.constant 0 : index
    %75 = vector.load %arg4[%c0_18, %c0_19] : memref<32x128xbf16, #tpu.memory_space<vmem>>, vector<32x128xbf16>
    %cst_20 = arith.constant dense<0.000000e+00> : vector<16x128xf32>
    %76 = tpu.matmul %74, %75, %cst_20 {dimension_numbers = #tpu.dot_dimension_numbers<[1], [0], [0], [1], [0, 0, 1, 1], [], []>} : vector<16x32xbf16>, vector<32x128xbf16>, vector<16x128xf32> -> vector<16x128xf32>
    %77 = arith.truncf %73 : vector<16x32xf32> to vector<16x32xbf16>
    %c0_21 = arith.constant 0 : index
    %c0_22 = arith.constant 0 : index
    %78 = vector.load %arg5[%c0_21, %c0_22] : memref<32x128xbf16, #tpu.memory_space<vmem>>, vector<32x128xbf16>
    %cst_23 = arith.constant dense<0.000000e+00> : vector<16x128xf32>
    %79 = tpu.matmul %77, %78, %cst_23 {dimension_numbers = #tpu.dot_dimension_numbers<[1], [0], [0], [1], [0, 0, 1, 1], [], []>} : vector<16x32xbf16>, vector<32x128xbf16>, vector<16x128xf32> -> vector<16x128xf32>
    %80 = arith.addf %76, %79 : vector<16x128xf32>
    %81 = vector.extract_strided_slice %80 {offsets = [0, 96], sizes = [16, 32], strides = [1, 1]} : vector<16x128xf32> to vector<16x32xf32>
    %82 = arith.negf %81 : vector<16x32xf32>
    %83 = math.exp %82 : vector<16x32xf32>
    %cst_24 = arith.constant 1.000000e+00 : f32
    %84 = vector.broadcast %cst_24 : f32 to vector<16x32xf32>
    %85 = arith.addf %84, %83 : vector<16x32xf32>
    %86 = arith.divf %84, %85 : vector<16x32xf32>
    %87 = arith.mulf %81, %86 : vector<16x32xf32>
    %88 = vector.extract_strided_slice %80 {offsets = [0, 0], sizes = [16, 64], strides = [1, 1]} : vector<16x128xf32> to vector<16x64xf32>
    %89 = arith.truncf %88 : vector<16x64xf32> to vector<16x64xbf16>
    %90 = arith.extf %89 : vector<16x64xbf16> to vector<16x64xf32>
    %91 = vector.extract_strided_slice %80 {offsets = [0, 64], sizes = [16, 32], strides = [1, 1]} : vector<16x128xf32> to vector<16x32xf32>
    %92 = arith.truncf %91 : vector<16x32xf32> to vector<16x32xbf16>
    %93 = arith.extf %92 : vector<16x32xbf16> to vector<16x32xf32>
    %94 = tpu.iota {dimensions = array<i32: 0>} : vector<64x64xi32>
    %95 = tpu.iota {dimensions = array<i32: 1>} : vector<64x64xi32>
    %96 = arith.cmpi eq, %94, %95 : vector<64x64xi32>
    %97 = arith.extui %96 : vector<64x64xi1> to vector<64x64xi32>
    %98 = arith.sitofp %97 : vector<64x64xi32> to vector<64x64xf32>
    %99 = arith.truncf %98 : vector<64x64xf32> to vector<64x64xbf16>
    %100 = arith.truncf %90 : vector<16x64xf32> to vector<16x64xbf16>
    %cst_25 = arith.constant dense<0.000000e+00> : vector<64x16xf32>
    %101 = tpu.matmul %99, %100, %cst_25 {dimension_numbers = #tpu.dot_dimension_numbers<[1], [1], [0], [0], [0, 0, 1, 0], [], []>} : vector<64x64xbf16>, vector<16x64xbf16>, vector<64x16xf32> -> vector<64x16xf32>
    %102 = vector.extract_strided_slice %101 {offsets = [0, 0], sizes = [16, 8], strides = [1, 1]} : vector<64x16xf32> to vector<16x8xf32>
    %103 = vector.extract_strided_slice %101 {offsets = [16, 0], sizes = [16, 8], strides = [1, 1]} : vector<64x16xf32> to vector<16x8xf32>
    %104 = vector.extract_strided_slice %101 {offsets = [0, 8], sizes = [16, 8], strides = [1, 1]} : vector<64x16xf32> to vector<16x8xf32>
    %105 = vector.extract_strided_slice %101 {offsets = [16, 8], sizes = [16, 8], strides = [1, 1]} : vector<64x16xf32> to vector<16x8xf32>
    %106 = vector.shape_cast %102 : vector<16x8xf32> to vector<1x16x8xf32>
    %107 = vector.shape_cast %103 : vector<16x8xf32> to vector<1x16x8xf32>
    %108 = vector.shape_cast %104 : vector<16x8xf32> to vector<1x16x8xf32>
    %109 = vector.shape_cast %105 : vector<16x8xf32> to vector<1x16x8xf32>
    %110 = tpu.concatenate %106, %107, %108, %109 in 0 : vector<1x16x8xf32>, vector<1x16x8xf32>, vector<1x16x8xf32>, vector<1x16x8xf32> -> vector<4x16x8xf32>
    %111 = vector.extract_strided_slice %101 {offsets = [32, 0], sizes = [16, 8], strides = [1, 1]} : vector<64x16xf32> to vector<16x8xf32>
    %112 = vector.extract_strided_slice %101 {offsets = [48, 0], sizes = [16, 8], strides = [1, 1]} : vector<64x16xf32> to vector<16x8xf32>
    %113 = vector.extract_strided_slice %101 {offsets = [32, 8], sizes = [16, 8], strides = [1, 1]} : vector<64x16xf32> to vector<16x8xf32>
    %114 = vector.extract_strided_slice %101 {offsets = [48, 8], sizes = [16, 8], strides = [1, 1]} : vector<64x16xf32> to vector<16x8xf32>
    %115 = vector.shape_cast %111 : vector<16x8xf32> to vector<1x16x8xf32>
    %116 = vector.shape_cast %112 : vector<16x8xf32> to vector<1x16x8xf32>
    %117 = vector.shape_cast %113 : vector<16x8xf32> to vector<1x16x8xf32>
    %118 = vector.shape_cast %114 : vector<16x8xf32> to vector<1x16x8xf32>
    %119 = tpu.concatenate %115, %116, %117, %118 in 0 : vector<1x16x8xf32>, vector<1x16x8xf32>, vector<1x16x8xf32>, vector<1x16x8xf32> -> vector<4x16x8xf32>
    %120 = vector.extract_strided_slice %93 {offsets = [0, 0], sizes = [8, 16], strides = [1, 1]} : vector<16x32xf32> to vector<8x16xf32>
    %121 = vector.extract_strided_slice %93 {offsets = [0, 16], sizes = [8, 16], strides = [1, 1]} : vector<16x32xf32> to vector<8x16xf32>
    %122 = vector.extract_strided_slice %93 {offsets = [8, 0], sizes = [8, 16], strides = [1, 1]} : vector<16x32xf32> to vector<8x16xf32>
    %123 = vector.extract_strided_slice %93 {offsets = [8, 16], sizes = [8, 16], strides = [1, 1]} : vector<16x32xf32> to vector<8x16xf32>
    %124 = vector.shape_cast %120 : vector<8x16xf32> to vector<1x8x16xf32>
    %125 = vector.shape_cast %121 : vector<8x16xf32> to vector<1x8x16xf32>
    %126 = vector.shape_cast %122 : vector<8x16xf32> to vector<1x8x16xf32>
    %127 = vector.shape_cast %123 : vector<8x16xf32> to vector<1x8x16xf32>
    %128 = tpu.concatenate %124, %125, %126, %127 in 0 : vector<1x8x16xf32>, vector<1x8x16xf32>, vector<1x8x16xf32>, vector<1x8x16xf32> -> vector<4x8x16xf32>
    %c0_26 = arith.constant 0 : index
    %c0_27 = arith.constant 0 : index
    %c0_28 = arith.constant 0 : index
    %129 = vector.load %arg7[%c0_26, %c0_27, %c0_28] : memref<4x16x1xf32, #tpu.memory_space<vmem>>, vector<4x16x1xf32>
    %c0_29 = arith.constant 0 : index
    %c0_30 = arith.constant 0 : index
    %c0_31 = arith.constant 0 : index
    %130 = vector.load %arg8[%c0_29, %c0_30, %c0_31] : memref<4x16x1xf32, #tpu.memory_space<vmem>>, vector<4x16x1xf32>
    %131 = vector.broadcast %130 : vector<4x16x1xf32> to vector<4x16x8xf32>
    %132 = arith.mulf %110, %131 : vector<4x16x8xf32>
    %133 = arith.mulf %132, %119 : vector<4x16x8xf32>
    %cst_32 = arith.constant dense<0.000000e+00> : vector<4x8xf32>
    %134 = vector.multi_reduction <add>, %133, %cst_32 [1] : vector<4x16x8xf32> to vector<4x8xf32>
    %135 = vector.shape_cast %134 : vector<4x8xf32> to vector<4x1x8xf32>
    %cst_33 = arith.constant 0.000000e+00 : f32
    %136 = vector.broadcast %cst_33 : f32 to vector<4x16x16xf32>
    %137 = vector.extract_strided_slice %110 {offsets = [0, 0, 0], sizes = [4, 16, 1], strides = [1, 1, 1]} : vector<4x16x8xf32> to vector<4x16x1xf32>
    %138 = vector.extract_strided_slice %119 {offsets = [0, 0, 0], sizes = [4, 16, 1], strides = [1, 1, 1]} : vector<4x16x8xf32> to vector<4x16x1xf32>
    %139 = vector.extract_strided_slice %128 {offsets = [0, 0, 0], sizes = [4, 1, 16], strides = [1, 1, 1]} : vector<4x8x16xf32> to vector<4x1x16xf32>
    %140 = vector.broadcast %137 : vector<4x16x1xf32> to vector<4x16x16xf32>
    %141 = arith.mulf %140, %136 : vector<4x16x16xf32>
    %cst_34 = arith.constant dense<0.000000e+00> : vector<4x16xf32>
    %142 = vector.multi_reduction <add>, %141, %cst_34 [1] : vector<4x16x16xf32> to vector<4x16xf32>
    %143 = vector.shape_cast %142 : vector<4x16xf32> to vector<4x1x16xf32>
    %144 = vector.extract_strided_slice %135 {offsets = [0, 0, 0], sizes = [4, 1, 1], strides = [1, 1, 1]} : vector<4x1x8xf32> to vector<4x1x1xf32>
    %145 = vector.broadcast %144 : vector<4x1x1xf32> to vector<4x1x16xf32>
    %146 = arith.mulf %145, %139 : vector<4x1x16xf32>
    %147 = arith.addf %143, %146 : vector<4x1x16xf32>
    %148 = vector.broadcast %129 : vector<4x16x1xf32> to vector<4x16x16xf32>
    %149 = arith.mulf %148, %136 : vector<4x16x16xf32>
    %150 = vector.broadcast %138 : vector<4x16x1xf32> to vector<4x16x16xf32>
    %151 = vector.broadcast %139 : vector<4x1x16xf32> to vector<4x16x16xf32>
    %152 = arith.mulf %150, %151 : vector<4x16x16xf32>
    %153 = arith.addf %149, %152 : vector<4x16x16xf32>
    %154 = vector.extract_strided_slice %110 {offsets = [0, 0, 1], sizes = [4, 16, 1], strides = [1, 1, 1]} : vector<4x16x8xf32> to vector<4x16x1xf32>
    %155 = vector.extract_strided_slice %119 {offsets = [0, 0, 1], sizes = [4, 16, 1], strides = [1, 1, 1]} : vector<4x16x8xf32> to vector<4x16x1xf32>
    %156 = vector.extract_strided_slice %128 {offsets = [0, 1, 0], sizes = [4, 1, 16], strides = [1, 1, 1]} : vector<4x8x16xf32> to vector<4x1x16xf32>
    %157 = vector.broadcast %154 : vector<4x16x1xf32> to vector<4x16x16xf32>
    %158 = arith.mulf %157, %153 : vector<4x16x16xf32>
    %cst_35 = arith.constant dense<0.000000e+00> : vector<4x16xf32>
    %159 = vector.multi_reduction <add>, %158, %cst_35 [1] : vector<4x16x16xf32> to vector<4x16xf32>
    %160 = vector.shape_cast %159 : vector<4x16xf32> to vector<4x1x16xf32>
    %161 = vector.extract_strided_slice %135 {offsets = [0, 0, 1], sizes = [4, 1, 1], strides = [1, 1, 1]} : vector<4x1x8xf32> to vector<4x1x1xf32>
    %162 = vector.broadcast %161 : vector<4x1x1xf32> to vector<4x1x16xf32>
    %163 = arith.mulf %162, %156 : vector<4x1x16xf32>
    %164 = arith.addf %160, %163 : vector<4x1x16xf32>
    %165 = vector.broadcast %129 : vector<4x16x1xf32> to vector<4x16x16xf32>
    %166 = arith.mulf %165, %153 : vector<4x16x16xf32>
    %167 = vector.broadcast %155 : vector<4x16x1xf32> to vector<4x16x16xf32>
    %168 = vector.broadcast %156 : vector<4x1x16xf32> to vector<4x16x16xf32>
    %169 = arith.mulf %167, %168 : vector<4x16x16xf32>
    %170 = arith.addf %166, %169 : vector<4x16x16xf32>
    %171 = vector.extract_strided_slice %110 {offsets = [0, 0, 2], sizes = [4, 16, 1], strides = [1, 1, 1]} : vector<4x16x8xf32> to vector<4x16x1xf32>
    %172 = vector.extract_strided_slice %119 {offsets = [0, 0, 2], sizes = [4, 16, 1], strides = [1, 1, 1]} : vector<4x16x8xf32> to vector<4x16x1xf32>
    %173 = vector.extract_strided_slice %128 {offsets = [0, 2, 0], sizes = [4, 1, 16], strides = [1, 1, 1]} : vector<4x8x16xf32> to vector<4x1x16xf32>
    %174 = vector.broadcast %171 : vector<4x16x1xf32> to vector<4x16x16xf32>
    %175 = arith.mulf %174, %170 : vector<4x16x16xf32>
    %cst_36 = arith.constant dense<0.000000e+00> : vector<4x16xf32>
    %176 = vector.multi_reduction <add>, %175, %cst_36 [1] : vector<4x16x16xf32> to vector<4x16xf32>
    %177 = vector.shape_cast %176 : vector<4x16xf32> to vector<4x1x16xf32>
    %178 = vector.extract_strided_slice %135 {offsets = [0, 0, 2], sizes = [4, 1, 1], strides = [1, 1, 1]} : vector<4x1x8xf32> to vector<4x1x1xf32>
    %179 = vector.broadcast %178 : vector<4x1x1xf32> to vector<4x1x16xf32>
    %180 = arith.mulf %179, %173 : vector<4x1x16xf32>
    %181 = arith.addf %177, %180 : vector<4x1x16xf32>
    %182 = vector.broadcast %129 : vector<4x16x1xf32> to vector<4x16x16xf32>
    %183 = arith.mulf %182, %170 : vector<4x16x16xf32>
    %184 = vector.broadcast %172 : vector<4x16x1xf32> to vector<4x16x16xf32>
    %185 = vector.broadcast %173 : vector<4x1x16xf32> to vector<4x16x16xf32>
    %186 = arith.mulf %184, %185 : vector<4x16x16xf32>
    %187 = arith.addf %183, %186 : vector<4x16x16xf32>
    %188 = vector.extract_strided_slice %110 {offsets = [0, 0, 3], sizes = [4, 16, 1], strides = [1, 1, 1]} : vector<4x16x8xf32> to vector<4x16x1xf32>
    %189 = vector.extract_strided_slice %119 {offsets = [0, 0, 3], sizes = [4, 16, 1], strides = [1, 1, 1]} : vector<4x16x8xf32> to vector<4x16x1xf32>
    %190 = vector.extract_strided_slice %128 {offsets = [0, 3, 0], sizes = [4, 1, 16], strides = [1, 1, 1]} : vector<4x8x16xf32> to vector<4x1x16xf32>
    %191 = vector.broadcast %188 : vector<4x16x1xf32> to vector<4x16x16xf32>
    %192 = arith.mulf %191, %187 : vector<4x16x16xf32>
    %cst_37 = arith.constant dense<0.000000e+00> : vector<4x16xf32>
    %193 = vector.multi_reduction <add>, %192, %cst_37 [1] : vector<4x16x16xf32> to vector<4x16xf32>
    %194 = vector.shape_cast %193 : vector<4x16xf32> to vector<4x1x16xf32>
    %195 = vector.extract_strided_slice %135 {offsets = [0, 0, 3], sizes = [4, 1, 1], strides = [1, 1, 1]} : vector<4x1x8xf32> to vector<4x1x1xf32>
    %196 = vector.broadcast %195 : vector<4x1x1xf32> to vector<4x1x16xf32>
    %197 = arith.mulf %196, %190 : vector<4x1x16xf32>
    %198 = arith.addf %194, %197 : vector<4x1x16xf32>
    %199 = vector.broadcast %129 : vector<4x16x1xf32> to vector<4x16x16xf32>
    %200 = arith.mulf %199, %187 : vector<4x16x16xf32>
    %201 = vector.broadcast %189 : vector<4x16x1xf32> to vector<4x16x16xf32>
    %202 = vector.broadcast %190 : vector<4x1x16xf32> to vector<4x16x16xf32>
    %203 = arith.mulf %201, %202 : vector<4x16x16xf32>
    %204 = arith.addf %200, %203 : vector<4x16x16xf32>
    %205 = vector.extract_strided_slice %110 {offsets = [0, 0, 4], sizes = [4, 16, 1], strides = [1, 1, 1]} : vector<4x16x8xf32> to vector<4x16x1xf32>
    %206 = vector.extract_strided_slice %119 {offsets = [0, 0, 4], sizes = [4, 16, 1], strides = [1, 1, 1]} : vector<4x16x8xf32> to vector<4x16x1xf32>
    %207 = vector.extract_strided_slice %128 {offsets = [0, 4, 0], sizes = [4, 1, 16], strides = [1, 1, 1]} : vector<4x8x16xf32> to vector<4x1x16xf32>
    %208 = vector.broadcast %205 : vector<4x16x1xf32> to vector<4x16x16xf32>
    %209 = arith.mulf %208, %204 : vector<4x16x16xf32>
    %cst_38 = arith.constant dense<0.000000e+00> : vector<4x16xf32>
    %210 = vector.multi_reduction <add>, %209, %cst_38 [1] : vector<4x16x16xf32> to vector<4x16xf32>
    %211 = vector.shape_cast %210 : vector<4x16xf32> to vector<4x1x16xf32>
    %212 = vector.extract_strided_slice %135 {offsets = [0, 0, 4], sizes = [4, 1, 1], strides = [1, 1, 1]} : vector<4x1x8xf32> to vector<4x1x1xf32>
    %213 = vector.broadcast %212 : vector<4x1x1xf32> to vector<4x1x16xf32>
    %214 = arith.mulf %213, %207 : vector<4x1x16xf32>
    %215 = arith.addf %211, %214 : vector<4x1x16xf32>
    %216 = vector.broadcast %129 : vector<4x16x1xf32> to vector<4x16x16xf32>
    %217 = arith.mulf %216, %204 : vector<4x16x16xf32>
    %218 = vector.broadcast %206 : vector<4x16x1xf32> to vector<4x16x16xf32>
    %219 = vector.broadcast %207 : vector<4x1x16xf32> to vector<4x16x16xf32>
    %220 = arith.mulf %218, %219 : vector<4x16x16xf32>
    %221 = arith.addf %217, %220 : vector<4x16x16xf32>
    %222 = vector.extract_strided_slice %110 {offsets = [0, 0, 5], sizes = [4, 16, 1], strides = [1, 1, 1]} : vector<4x16x8xf32> to vector<4x16x1xf32>
    %223 = vector.extract_strided_slice %119 {offsets = [0, 0, 5], sizes = [4, 16, 1], strides = [1, 1, 1]} : vector<4x16x8xf32> to vector<4x16x1xf32>
    %224 = vector.extract_strided_slice %128 {offsets = [0, 5, 0], sizes = [4, 1, 16], strides = [1, 1, 1]} : vector<4x8x16xf32> to vector<4x1x16xf32>
    %225 = vector.broadcast %222 : vector<4x16x1xf32> to vector<4x16x16xf32>
    %226 = arith.mulf %225, %221 : vector<4x16x16xf32>
    %cst_39 = arith.constant dense<0.000000e+00> : vector<4x16xf32>
    %227 = vector.multi_reduction <add>, %226, %cst_39 [1] : vector<4x16x16xf32> to vector<4x16xf32>
    %228 = vector.shape_cast %227 : vector<4x16xf32> to vector<4x1x16xf32>
    %229 = vector.extract_strided_slice %135 {offsets = [0, 0, 5], sizes = [4, 1, 1], strides = [1, 1, 1]} : vector<4x1x8xf32> to vector<4x1x1xf32>
    %230 = vector.broadcast %229 : vector<4x1x1xf32> to vector<4x1x16xf32>
    %231 = arith.mulf %230, %224 : vector<4x1x16xf32>
    %232 = arith.addf %228, %231 : vector<4x1x16xf32>
    %233 = vector.broadcast %129 : vector<4x16x1xf32> to vector<4x16x16xf32>
    %234 = arith.mulf %233, %221 : vector<4x16x16xf32>
    %235 = vector.broadcast %223 : vector<4x16x1xf32> to vector<4x16x16xf32>
    %236 = vector.broadcast %224 : vector<4x1x16xf32> to vector<4x16x16xf32>
    %237 = arith.mulf %235, %236 : vector<4x16x16xf32>
    %238 = arith.addf %234, %237 : vector<4x16x16xf32>
    %239 = vector.extract_strided_slice %110 {offsets = [0, 0, 6], sizes = [4, 16, 1], strides = [1, 1, 1]} : vector<4x16x8xf32> to vector<4x16x1xf32>
    %240 = vector.extract_strided_slice %119 {offsets = [0, 0, 6], sizes = [4, 16, 1], strides = [1, 1, 1]} : vector<4x16x8xf32> to vector<4x16x1xf32>
    %241 = vector.extract_strided_slice %128 {offsets = [0, 6, 0], sizes = [4, 1, 16], strides = [1, 1, 1]} : vector<4x8x16xf32> to vector<4x1x16xf32>
    %242 = vector.broadcast %239 : vector<4x16x1xf32> to vector<4x16x16xf32>
    %243 = arith.mulf %242, %238 : vector<4x16x16xf32>
    %cst_40 = arith.constant dense<0.000000e+00> : vector<4x16xf32>
    %244 = vector.multi_reduction <add>, %243, %cst_40 [1] : vector<4x16x16xf32> to vector<4x16xf32>
    %245 = vector.shape_cast %244 : vector<4x16xf32> to vector<4x1x16xf32>
    %246 = vector.extract_strided_slice %135 {offsets = [0, 0, 6], sizes = [4, 1, 1], strides = [1, 1, 1]} : vector<4x1x8xf32> to vector<4x1x1xf32>
    %247 = vector.broadcast %246 : vector<4x1x1xf32> to vector<4x1x16xf32>
    %248 = arith.mulf %247, %241 : vector<4x1x16xf32>
    %249 = arith.addf %245, %248 : vector<4x1x16xf32>
    %250 = vector.broadcast %129 : vector<4x16x1xf32> to vector<4x16x16xf32>
    %251 = arith.mulf %250, %238 : vector<4x16x16xf32>
    %252 = vector.broadcast %240 : vector<4x16x1xf32> to vector<4x16x16xf32>
    %253 = vector.broadcast %241 : vector<4x1x16xf32> to vector<4x16x16xf32>
    %254 = arith.mulf %252, %253 : vector<4x16x16xf32>
    %255 = arith.addf %251, %254 : vector<4x16x16xf32>
    %256 = vector.extract_strided_slice %110 {offsets = [0, 0, 7], sizes = [4, 16, 1], strides = [1, 1, 1]} : vector<4x16x8xf32> to vector<4x16x1xf32>
    %257 = vector.extract_strided_slice %128 {offsets = [0, 7, 0], sizes = [4, 1, 16], strides = [1, 1, 1]} : vector<4x8x16xf32> to vector<4x1x16xf32>
    %258 = vector.broadcast %256 : vector<4x16x1xf32> to vector<4x16x16xf32>
    %259 = arith.mulf %258, %255 : vector<4x16x16xf32>
    %cst_41 = arith.constant dense<0.000000e+00> : vector<4x16xf32>
    %260 = vector.multi_reduction <add>, %259, %cst_41 [1] : vector<4x16x16xf32> to vector<4x16xf32>
    %261 = vector.shape_cast %260 : vector<4x16xf32> to vector<4x1x16xf32>
    %262 = vector.extract_strided_slice %135 {offsets = [0, 0, 7], sizes = [4, 1, 1], strides = [1, 1, 1]} : vector<4x1x8xf32> to vector<4x1x1xf32>
    %263 = vector.broadcast %262 : vector<4x1x1xf32> to vector<4x1x16xf32>
    %264 = arith.mulf %263, %257 : vector<4x1x16xf32>
    %265 = arith.addf %261, %264 : vector<4x1x16xf32>
    %266 = tpu.concatenate %147, %164, %181, %198, %215, %232, %249, %265 in 1 : vector<4x1x16xf32>, vector<4x1x16xf32>, vector<4x1x16xf32>, vector<4x1x16xf32>, vector<4x1x16xf32>, vector<4x1x16xf32>, vector<4x1x16xf32>, vector<4x1x16xf32> -> vector<4x8x16xf32>
    %267 = arith.truncf %266 : vector<4x8x16xf32> to vector<4x8x16xbf16>
    %268 = arith.extf %267 : vector<4x8x16xbf16> to vector<4x8x16xf32>
    %cst_42 = arith.constant 1.250000e-01 : f32
    %269 = vector.broadcast %cst_42 : f32 to vector<4x8x16xf32>
    %270 = arith.mulf %268, %269 : vector<4x8x16xf32>
    %cst_43 = arith.constant dense<0.000000e+00> : vector<4x8xf32>
    %271 = vector.multi_reduction <add>, %270, %cst_43 [2] : vector<4x8x16xf32> to vector<4x8xf32>
    %272 = vector.shape_cast %271 : vector<4x8xf32> to vector<4x8x1xf32>
    %cst_44 = arith.constant 1.600000e+01 : f32
    %273 = vector.broadcast %cst_44 : f32 to vector<4x8x1xf32>
    %274 = arith.divf %272, %273 : vector<4x8x1xf32>
    %275 = vector.broadcast %274 : vector<4x8x1xf32> to vector<4x8x16xf32>
    %276 = arith.subf %270, %275 : vector<4x8x16xf32>
    %277 = arith.mulf %276, %276 : vector<4x8x16xf32>
    %cst_45 = arith.constant dense<0.000000e+00> : vector<4x8xf32>
    %278 = vector.multi_reduction <add>, %277, %cst_45 [2] : vector<4x8x16xf32> to vector<4x8xf32>
    %279 = vector.shape_cast %278 : vector<4x8xf32> to vector<4x8x1xf32>
    %cst_46 = arith.constant 1.600000e+01 : f32
    %280 = vector.broadcast %cst_46 : f32 to vector<4x8x1xf32>
    %281 = arith.divf %279, %280 : vector<4x8x1xf32>
    %282 = vector.broadcast %274 : vector<4x8x1xf32> to vector<4x8x16xf32>
    %283 = arith.subf %270, %282 : vector<4x8x16xf32>
    %cst_47 = arith.constant 9.99999974E-6 : f32
    %284 = vector.broadcast %cst_47 : f32 to vector<4x8x1xf32>
    %285 = arith.addf %281, %284 : vector<4x8x1xf32>
    %286 = math.rsqrt %285 : vector<4x8x1xf32>
    %287 = vector.broadcast %286 : vector<4x8x1xf32> to vector<4x8x16xf32>
    %288 = arith.mulf %283, %287 : vector<4x8x16xf32>
    %c0_48 = arith.constant 0 : index
    %c0_49 = arith.constant 0 : index
    %c0_50 = arith.constant 0 : index
    %289 = vector.load %arg2[%c0_48, %c0_49, %c0_50] : memref<4x1x16xf32, #tpu.memory_space<vmem>>, vector<4x1x16xf32>
    %290 = vector.broadcast %289 : vector<4x1x16xf32> to vector<4x8x16xf32>
    %291 = arith.mulf %288, %290 : vector<4x8x16xf32>
    %c0_51 = arith.constant 0 : index
    %c0_52 = arith.constant 0 : index
    %c0_53 = arith.constant 0 : index
    %292 = vector.load %arg3[%c0_51, %c0_52, %c0_53] : memref<4x1x16xf32, #tpu.memory_space<vmem>>, vector<4x1x16xf32>
    %293 = vector.broadcast %292 : vector<4x1x16xf32> to vector<4x8x16xf32>
    %294 = arith.addf %291, %293 : vector<4x8x16xf32>
    %295 = vector.extract_strided_slice %294 {offsets = [0, 0, 0], sizes = [1, 8, 16], strides = [1, 1, 1]} : vector<4x8x16xf32> to vector<1x8x16xf32>
    %296 = vector.shape_cast %295 : vector<1x8x16xf32> to vector<8x16xf32>
    %297 = vector.extract_strided_slice %294 {offsets = [1, 0, 0], sizes = [1, 8, 16], strides = [1, 1, 1]} : vector<4x8x16xf32> to vector<1x8x16xf32>
    %298 = vector.shape_cast %297 : vector<1x8x16xf32> to vector<8x16xf32>
    %299 = tpu.concatenate %296, %298 in 1 : vector<8x16xf32>, vector<8x16xf32> -> vector<8x32xf32>
    %300 = vector.extract_strided_slice %294 {offsets = [2, 0, 0], sizes = [1, 8, 16], strides = [1, 1, 1]} : vector<4x8x16xf32> to vector<1x8x16xf32>
    %301 = vector.shape_cast %300 : vector<1x8x16xf32> to vector<8x16xf32>
    %302 = vector.extract_strided_slice %294 {offsets = [3, 0, 0], sizes = [1, 8, 16], strides = [1, 1, 1]} : vector<4x8x16xf32> to vector<1x8x16xf32>
    %303 = vector.shape_cast %302 : vector<1x8x16xf32> to vector<8x16xf32>
    %304 = tpu.concatenate %301, %303 in 1 : vector<8x16xf32>, vector<8x16xf32> -> vector<8x32xf32>
    %305 = tpu.concatenate %299, %304 in 0 : vector<8x32xf32>, vector<8x32xf32> -> vector<16x32xf32>
    %306 = arith.mulf %305, %87 : vector<16x32xf32>
    %307 = arith.truncf %306 : vector<16x32xf32> to vector<16x32xbf16>
    %c0_54 = arith.constant 0 : index
    %c0_55 = arith.constant 0 : index
    %308 = vector.load %arg6[%c0_54, %c0_55] : memref<32x32xbf16, #tpu.memory_space<vmem>>, vector<32x32xbf16>
    %cst_56 = arith.constant dense<0.000000e+00> : vector<16x32xf32>
    %309 = tpu.matmul %307, %308, %cst_56 {dimension_numbers = #tpu.dot_dimension_numbers<[1], [0], [0], [1], [0, 0, 1, 1], [], []>} : vector<16x32xbf16>, vector<32x32xbf16>, vector<16x32xf32> -> vector<16x32xf32>
    %310 = arith.addf %25, %309 : vector<16x32xf32>
    %311 = vector.extract_strided_slice %0 {offsets = [4, 0], sizes = [1, 32], strides = [1, 1]} : vector<6x32xf32> to vector<1x32xf32>
    %312 = vector.extract_strided_slice %0 {offsets = [5, 0], sizes = [1, 32], strides = [1, 1]} : vector<6x32xf32> to vector<1x32xf32>
    %cst_57 = arith.constant dense<0.000000e+00> : vector<16xf32>
    %313 = vector.multi_reduction <add>, %310, %cst_57 [1] : vector<16x32xf32> to vector<16xf32>
    %314 = vector.shape_cast %313 : vector<16xf32> to vector<16x1xf32>
    %cst_58 = arith.constant 3.200000e+01 : f32
    %315 = vector.broadcast %cst_58 : f32 to vector<16x1xf32>
    %316 = arith.divf %314, %315 : vector<16x1xf32>
    %317 = vector.broadcast %316 : vector<16x1xf32> to vector<16x32xf32>
    %318 = arith.subf %310, %317 : vector<16x32xf32>
    %319 = arith.mulf %318, %318 : vector<16x32xf32>
    %cst_59 = arith.constant dense<0.000000e+00> : vector<16xf32>
    %320 = vector.multi_reduction <add>, %319, %cst_59 [1] : vector<16x32xf32> to vector<16xf32>
    %321 = vector.shape_cast %320 : vector<16xf32> to vector<16x1xf32>
    %cst_60 = arith.constant 3.200000e+01 : f32
    %322 = vector.broadcast %cst_60 : f32 to vector<16x1xf32>
    %323 = arith.divf %321, %322 : vector<16x1xf32>
    %324 = vector.broadcast %316 : vector<16x1xf32> to vector<16x32xf32>
    %325 = arith.subf %310, %324 : vector<16x32xf32>
    %cst_61 = arith.constant 9.99999974E-6 : f32
    %326 = vector.broadcast %cst_61 : f32 to vector<16x1xf32>
    %327 = arith.addf %323, %326 : vector<16x1xf32>
    %328 = math.rsqrt %327 : vector<16x1xf32>
    %329 = vector.broadcast %328 : vector<16x1xf32> to vector<16x32xf32>
    %330 = arith.mulf %325, %329 : vector<16x32xf32>
    %331 = vector.broadcast %311 : vector<1x32xf32> to vector<16x32xf32>
    %332 = arith.mulf %330, %331 : vector<16x32xf32>
    %333 = vector.broadcast %312 : vector<1x32xf32> to vector<16x32xf32>
    %334 = arith.addf %332, %333 : vector<16x32xf32>
    %cst_62 = arith.constant 0.000000e+00 : f32
    %335 = vector.broadcast %cst_62 : f32 to vector<1x32xf32>
    %336 = vector.extract_strided_slice %334 {offsets = [0, 0], sizes = [15, 32], strides = [1, 1]} : vector<16x32xf32> to vector<15x32xf32>
    %337 = tpu.concatenate %335, %336 in 0 : vector<1x32xf32>, vector<15x32xf32> -> vector<16x32xf32>
    %338 = tpu.iota {dimensions = array<i32: 0>} : vector<16x32xi32>
    %c8_i32_63 = arith.constant 8 : i32
    %c0_i32_64 = arith.constant 0 : i32
    %339 = arith.cmpi eq, %c8_i32_63, %c0_i32_64 : i32
    %c1_i32_65 = arith.constant 1 : i32
    %340 = arith.select %339, %c1_i32_65, %c8_i32_63 : i32
    %341 = vector.broadcast %340 : i32 to vector<16x32xi32>
    %342 = arith.remsi %338, %341 : vector<16x32xi32>
    %c0_i32_66 = arith.constant 0 : i32
    %343 = vector.broadcast %c0_i32_66 : i32 to vector<16x32xi32>
    %344 = arith.cmpi ne, %342, %343 : vector<16x32xi32>
    %c0_i32_67 = arith.constant 0 : i32
    %345 = vector.broadcast %c0_i32_67 : i32 to vector<16x32xi32>
    %346 = arith.cmpi slt, %342, %345 : vector<16x32xi32>
    %c0_i32_68 = arith.constant 0 : i32
    %347 = arith.cmpi slt, %340, %c0_i32_68 : i32
    %348 = vector.broadcast %347 : i1 to vector<16x32xi1>
    %349 = vector.broadcast %348 : vector<16x32xi1> to vector<16x32xi1>
    %350 = arith.xori %346, %349 : vector<16x32xi1>
    %351 = arith.andi %350, %344 : vector<16x32xi1>
    %352 = vector.broadcast %340 : i32 to vector<16x32xi32>
    %353 = arith.addi %342, %352 : vector<16x32xi32>
    %354 = arith.select %351, %353, %342 : vector<16x32xi1>, vector<16x32xi32>
    %c0_i32_69 = arith.constant 0 : i32
    %355 = vector.broadcast %c0_i32_69 : i32 to vector<16x32xi32>
    %356 = arith.cmpi eq, %354, %355 : vector<16x32xi32>
    %cst_70 = arith.constant 0.000000e+00 : f32
    %357 = vector.broadcast %cst_70 : f32 to vector<16x32xf32>
    %358 = arith.select %356, %357, %337 : vector<16x32xi1>, vector<16x32xf32>
    %c0_71 = arith.constant 0 : index
    %c0_72 = arith.constant 0 : index
    %359 = vector.load %arg9[%c0_71, %c0_72] : memref<2x32xf32, #tpu.memory_space<vmem>>, vector<2x32xf32>
    %360 = vector.extract_strided_slice %359 {offsets = [0, 0], sizes = [1, 32], strides = [1, 1]} : vector<2x32xf32> to vector<1x32xf32>
    %361 = vector.extract_strided_slice %359 {offsets = [1, 0], sizes = [1, 32], strides = [1, 1]} : vector<2x32xf32> to vector<1x32xf32>
    %362 = vector.broadcast %360 : vector<1x32xf32> to vector<16x32xf32>
    %363 = arith.mulf %334, %362 : vector<16x32xf32>
    %cst_73 = arith.constant 1.000000e+00 : f32
    %364 = vector.broadcast %cst_73 : f32 to vector<1x32xf32>
    %365 = arith.subf %364, %360 : vector<1x32xf32>
    %366 = vector.broadcast %365 : vector<1x32xf32> to vector<16x32xf32>
    %367 = arith.mulf %358, %366 : vector<16x32xf32>
    %368 = arith.addf %363, %367 : vector<16x32xf32>
    %369 = vector.broadcast %361 : vector<1x32xf32> to vector<16x32xf32>
    %370 = arith.mulf %334, %369 : vector<16x32xf32>
    %cst_74 = arith.constant 1.000000e+00 : f32
    %371 = vector.broadcast %cst_74 : f32 to vector<1x32xf32>
    %372 = arith.subf %371, %361 : vector<1x32xf32>
    %373 = vector.broadcast %372 : vector<1x32xf32> to vector<16x32xf32>
    %374 = arith.mulf %358, %373 : vector<16x32xf32>
    %375 = arith.addf %370, %374 : vector<16x32xf32>
    %376 = arith.truncf %368 : vector<16x32xf32> to vector<16x32xbf16>
    %c0_75 = arith.constant 0 : index
    %c0_76 = arith.constant 0 : index
    %377 = vector.load %arg10[%c0_75, %c0_76] : memref<32x64xbf16, #tpu.memory_space<vmem>>, vector<32x64xbf16>
    %cst_77 = arith.constant dense<0.000000e+00> : vector<16x64xf32>
    %378 = tpu.matmul %376, %377, %cst_77 {dimension_numbers = #tpu.dot_dimension_numbers<[1], [0], [0], [1], [0, 0, 1, 1], [], []>} : vector<16x32xbf16>, vector<32x64xbf16>, vector<16x64xf32> -> vector<16x64xf32>
    %cst_78 = arith.constant 0.000000e+00 : f32
    %379 = vector.broadcast %cst_78 : f32 to vector<16x64xf32>
    %380 = arith.maximumf %378, %379 : vector<16x64xf32>
    %381 = arith.mulf %380, %380 : vector<16x64xf32>
    %382 = arith.truncf %381 : vector<16x64xf32> to vector<16x64xbf16>
    %c0_79 = arith.constant 0 : index
    %c0_80 = arith.constant 0 : index
    %383 = vector.load %arg12[%c0_79, %c0_80] : memref<64x32xbf16, #tpu.memory_space<vmem>>, vector<64x32xbf16>
    %cst_81 = arith.constant dense<0.000000e+00> : vector<16x32xf32>
    %384 = tpu.matmul %382, %383, %cst_81 {dimension_numbers = #tpu.dot_dimension_numbers<[1], [0], [0], [1], [0, 0, 1, 1], [], []>} : vector<16x64xbf16>, vector<64x32xbf16>, vector<16x32xf32> -> vector<16x32xf32>
    %385 = arith.truncf %375 : vector<16x32xf32> to vector<16x32xbf16>
    %c0_82 = arith.constant 0 : index
    %c0_83 = arith.constant 0 : index
    %386 = vector.load %arg11[%c0_82, %c0_83] : memref<32x32xbf16, #tpu.memory_space<vmem>>, vector<32x32xbf16>
    %cst_84 = arith.constant dense<0.000000e+00> : vector<16x32xf32>
    %387 = tpu.matmul %385, %386, %cst_84 {dimension_numbers = #tpu.dot_dimension_numbers<[1], [0], [0], [1], [0, 0, 1, 1], [], []>} : vector<16x32xbf16>, vector<32x32xbf16>, vector<16x32xf32> -> vector<16x32xf32>
    %388 = arith.negf %387 : vector<16x32xf32>
    %389 = math.exp %388 : vector<16x32xf32>
    %cst_85 = arith.constant 1.000000e+00 : f32
    %390 = vector.broadcast %cst_85 : f32 to vector<16x32xf32>
    %391 = arith.addf %390, %389 : vector<16x32xf32>
    %392 = arith.divf %390, %391 : vector<16x32xf32>
    %393 = arith.mulf %392, %384 : vector<16x32xf32>
    %394 = arith.addf %310, %393 : vector<16x32xf32>
    %c0_86 = arith.constant 0 : index
    %c0_87 = arith.constant 0 : index
    %395 = vector.load %arg13[%c0_86, %c0_87] : memref<16x32xf32, #tpu.memory_space<vmem>>, vector<16x32xf32>
    tpu.vector_store %arg13[%c0_86, %c0_87], %394 {strides = array<i32>} : memref<16x32xf32, #tpu.memory_space<vmem>>, vector<16x32xf32>,
    return
  }
}

</mosaic_0001>

<bundles_post_ra>
// kernel: block_forward.1
= control target key start
LH: loop header
LB: loop body
LE: loop exit
PB: predicated region body
PF: predicated region fallthrough
CT: control target
= control target key end

     0   :  { %vm49_vm0 = vcmask 261120   ;;  %s4534_s0 = inlined_call_operand.vmem [shape: f32[16,32], index: 0, kind: input, shape index: {}]   ;;  %s4535_s1 = inlined_call_operand.vmem [shape: f32[6,32], index: 1, kind: input, shape index: {}]   ;;  %s4536_s2 = inlined_call_operand.vmem [shape: f32[4,1,16], index: 2, kind: input, shape index: {}]   ;;  %s4537_s3 = inlined_call_operand.vmem [shape: f32[4,1,16], index: 3, kind: input, shape index: {}]   ;;  %s4538_s4 = inlined_call_operand.vmem [shape: bf16[32,128], index: 4, kind: input, shape index: {}]   ;;  %s4539_s5 = inlined_call_operand.vmem [shape: bf16[32,128], index: 5, kind: input, shape index: {}]   ;;  %s4540_s6 = inlined_call_operand.vmem [shape: bf16[32,32], index: 6, kind: input, shape index: {}]   ;;  %s4541_s7 = inlined_call_operand.vmem [shape: f32[4,16,1], index: 7, kind: input, shape index: {}]   ;;  %s4542_s8 = inlined_call_operand.vmem [shape: f32[4,16,1], index: 8, kind: input, shape index: {}]   ;;  %s4543_s9 = inlined_call_operand.vmem [shape: f32[2,32], index: 9, kind: input, shape index: {}]   ;;  %s4544_s10 = inlined_call_operand.vmem [shape: bf16[32,64], index: 10, kind: input, shape index: {}]   ;;  %s4545_s11 = inlined_call_operand.vmem [shape: bf16[32,32], index: 11, kind: input, shape index: {}]   ;;  %s4546_s12 = inlined_call_operand.vmem [shape: bf16[64,32], index: 12, kind: input, shape index: {}]   ;;  %s4547_s13 = inlined_call_operand.hbm [shape: f32[16,32], index: 13, kind: output, shape index: {}]  }
   0x1   :  { %v47_v0 = vld [vmem:[%s4534_s0] sm:$0xff]  ;;  %v48_v1 = vld [vmem:[%s4534_s0 + $0x8] sm:$0xff] }
   0x2   :  { %v50_v2 = vsel %vm49_vm0, %v47_v0, 0.0  ;;  %v53_v3 = vsel %vm49_vm0, %v48_v1, 0.0 }
   0x3   :  { %51 = vadd.xlane.f32.xlu0 %v50_v2 }
   0x7   :  { %54 = vadd.xlane.f32.xlu0 %v53_v3 }
   0x8   :  { %18 = vsyncpa [#allocation3], 0  ;;  %v77_v16 = vlaneseq  ;;  %v3024_v23 = vld [vmem:[%s4535_s1] sm:$0x3f]  ;;  %v4548_v48 = vmov 0.0   ;;  %vm2918_vm1 = vmmov 0  }
   0x9   :  { %v2842_v47 = vld [vmem:[%s4539_s5] sm:$0xff]   ;;  %2600 = vmatprep.subr.bf16.mxu0 %v4548_v48  ;;  %2604 = vmatprep.mubr.msk.bf16.mxu0 %vm2918_vm1, %v4548_v48  ;;  %v2843_v49 = vld [vmem:[%s4539_s5 + $0x8] sm:$0xff]   ;;  %v4564_v51 = vmov 0   ;;  %v474_v52 = vld [vmem:[%s4542_s8 + $0x18] sm:$0xff]  ;;  %vm129_vm2 = vcmask 1040384   ;;  %vm342_vm7 = vcmask 523264  }
   0xa   :  { %v3016_v20 = vshrl.u32 %v77_v16, 7  ;;  %2601 = vmatpush3.bf16.msra.mxu0 %v2842_v47  ;;  %v471_v50 = vld [vmem:[%s4542_s8] sm:$0xff]  ;;  %2685 = vset.pattern.permute.xlu0 %v4564_v51  ;;  %v476_v53 = vld [vmem:[%s4542_s8 + $0x28] sm:$0xff]  ;;  %v478_v54 = vld [vmem:[%s4542_s8 + $0x38] sm:$0xff]  ;;  %s2920_s27 = smov 112   ;;  %s2922_s14 = smov 120  }
   0xb   :  { %2602 = vmatprep.subr.bf16.mxu0 %v4548_v48  ;;  %2686 = vset.pattern.permute.xlu1 %v4564_v51  ;;  %v464_v55 = vld [vmem:[%s4541_s7 + $0x8] sm:$0xff]  ;;  %v466_v56 = vld [vmem:[%s4541_s7 + $0x18] sm:$0xff]  ;;  %vm535_vm14 = vcmask 64512   ;;  %vm820_vm15 = vcmask 654848   ;;  %s2931_s30 = smov 32  }
   0xc   :  { %v3019_v22 = vsub.s32 0, %v3016_v20  ;;  %v3027_v24 = vsub.s32 1, %v3016_v20  ;;  %v468_v57 = vld [vmem:[%s4541_s7 + $0x28] sm:$0xff]  ;;  %v470_v58 = vld [vmem:[%s4541_s7 + $0x38] sm:$0xff]  ;;  %v3086_v2 = vsub.s32 3, %v3016_v20 }
   0xe   :  { %4604 = vst [vmem:[#allocation5_spill] sm:$0xff] %v3019_v22  ;;  %4605 = vst [vmem:[#allocation6_spill] sm:$0xff] %v3027_v24  ;;  %v80_v25 = vrot.slane %v3024_v23, %v3019_v22  ;;  %v86_v28 = vrot.slane %v3024_v23, %v3027_v24  ;;  %2603 = vmatpush3.bf16.msra.mxu0 %v2843_v49  ;;  %v463_v49 = vld [vmem:[%s4541_s7] sm:$0xff] }
   0xf   :  { %2608 = vmatprep.subr.bf16.mxu0 %v4548_v48  ;;  %4609 = vst [vmem:[#allocation10_spill] sm:$0xff] %v3086_v2 }
  0x90   :  { %v52_v4 = vpop.xlane.xlu0 %51 }
  0x91   :  { %v57_v5 = vmul.f32 0.03125, %v52_v4 }
  0x93   :  { %v59_v6 = vsub.f32 %v47_v0, %v57_v5 }
  0x94   :  { %v55_v7 = vpop.xlane.xlu0 %54 }
  0x95   :  { %v58_v8 = vmul.f32 0.03125, %v55_v7  ;;  %v61_v9 = vmul.f32 %v59_v6, %v59_v6 }
  0x97   :  { %v60_v10 = vsub.f32 %v48_v1, %v58_v8  ;;  %v63_v11 = vsel %vm49_vm0, %v61_v9, 0.0  ;;  %v3083_v1 = vsub.s32 2, %v3016_v20  ;;  %v138_v8 = vadd.s32 8, %v3016_v20 }
  0x98   :  { %64 = vadd.xlane.f32.xlu1 %v63_v11 }
  0x99   :  { %v62_v12 = vmul.f32 %v60_v10, %v60_v10  ;;  %4608 = vst [vmem:[#allocation9_spill] sm:$0xff] %v3083_v1  ;;  %v118_v3 = vrot.slane %v3024_v23, %v3083_v1 }
  0x9b   :  { %v66_v13 = vsel %vm49_vm0, %v62_v12, 0.0 }
  0x9c   :  { %67 = vadd.xlane.f32.xlu1 %v66_v13 }
 0x125   :  { %v65_v14 = vpop.xlane.xlu1 %64 }
 0x126   :  { %v69_v15 = vmul.f32 0.03125, %v65_v14  ;;  %v143_v14 = vand.u32 7, %v3016_v20 }
 0x128   :  { %v71_v17 = vadd.f32 1e-05, %v69_v15  ;;  %v150_v15 = vand.u32 7, %v138_v8  ;;  %vm3095_vm3 = vcmp.eq.s32.totalorder %v143_v14, 0 }
 0x129   :  { %v68_v18 = vpop.xlane.xlu1 %67 }
 0x12a   :  { %2856 = vrsqrt.f32 %v71_v17  ;;  %v70_v19 = vmul.f32 0.03125, %v68_v18  ;;  %vm3099_vm4 = vcmp.eq.s32.totalorder %v150_v15, 0 }
 0x12c   :  { %v72_v21 = vadd.f32 1e-05, %v70_v19 }
 0x12e   :  { %2858 = vrsqrt.f32 %v72_v21  ;;  %v4610_v21 = vmov 0 }
 0x12f   :  { %v4611_v21 = vsel %vm3095_vm3, 4294967295, %v4610_v21 }
 0x130   :  { %4612 = vst [vmem:[#allocation11_spill] sm:$0xff] %v4611_v21 }
 0x134   :  { %v2857_v26 = vpop.eup %2856 }
 0x135   :  { %v75_v27 = vmul.f32 %v2857_v26, %v59_v6  ;;  %v124_v6 = vrot.slane %v3024_v23, %v3086_v2  ;;  %v4613_v23 = vmov 0 }
 0x136   :  { %v4614_v23 = vsel %vm3099_vm4, 4294967295, %v4613_v23 }
 0x137   :  { %v81_v29 = vmul.f32 %v80_v25, %v75_v27  ;;  %4615 = vst [vmem:[#allocation12_spill] sm:$0xff] %v4614_v23 }
 0x138   :  { %v2859_v30 = vpop.eup %2858 }
 0x139   :  { %v3033_v31 = vadd.f32 %v86_v28, %v81_v29  ;;  %v76_v32 = vmul.f32 %v2859_v30, %v60_v10  ;;  %v2845_v30 = vld [vmem:[%s4538_s4 + $0x8] sm:$0xff]  }
 0x13b   :  { %4606 = vst [vmem:[#allocation7_spill] sm:$0xff] %v3033_v31  ;;  %v89_v33 = vsel %vm49_vm0, %v3033_v31, 0.0  ;;  %v82_v34 = vmul.f32 %v80_v25, %v76_v32 }
 0x13c   :  { %90 = vadd.xlane.f32.xlu0 %v89_v33  ;;  %v313_v33 = vand.u32 127, %v77_v16  ;;  %v473_v16 = vld [vmem:[%s4542_s8 + $0x10] sm:$0xff] }
 0x13d   :  { %v3037_v35 = vadd.f32 %v86_v28, %v82_v34  ;;  %v2844_v28 = vld [vmem:[%s4538_s4] sm:$0xff]  }
 0x13e   :  { %vm314_vm5 = vcmp.eq.s32.totalorder %v3016_v20, %v313_v33  ;;  %vm315_vm6 = vcmp.eq.s32.totalorder %v138_v8, %v313_v33 }
 0x13f   :  { %4607 = vst [vmem:[#allocation8_spill] sm:$0xff] %v3037_v35  ;;  %v92_v36 = vsel %vm49_vm0, %v3037_v35, 0.0  ;;  %v2539_v34 = vsel %vm314_vm5, 1.0, %v4548_v48  ;;  %vm1917_vm5 = vcmask 1041408  }
 0x140   :  { %93 = vadd.xlane.f32.xlu1 %v92_v36  ;;  %v2540_v36 = vsel %vm315_vm6, 1.0, %v4548_v48  ;;  %vm1922_vm6 = vcmask 1042432  }
 0x1c9   :  { %v91_v37 = vpop.xlane.xlu0 %90 }
 0x1ca   :  { %v95_v38 = vmul.f32 0.03125, %v91_v37  ;;  %v338_v37 = vpack.c.bf16 %v2540_v36, %v2539_v34 }
 0x1cc   :  { %v97_v39 = vsub.f32 %v3033_v31, %v95_v38  ;;  %2618 = vmatprep.mubr.msk.bf16.mxu1 %vm342_vm7, %v338_v37  ;;  %v472_v38 = vld [vmem:[%s4542_s8 + $0x8] sm:$0xff] }
 0x1cd   :  { %v94_v40 = vpop.xlane.xlu1 %93 }
 0x1ce   :  { %v96_v41 = vmul.f32 0.03125, %v94_v40  ;;  %v99_v42 = vmul.f32 %v97_v39, %v97_v39  ;;  %v477_v40 = vld [vmem:[%s4542_s8 + $0x30] sm:$0xff] }
 0x1d0   :  { %v98_v43 = vsub.f32 %v3037_v35, %v96_v41  ;;  %v101_v44 = vsel %vm49_vm0, %v99_v42, 0.0  ;;  %v306_v41 = vadd.s32 16, %v3016_v20  ;;  %v307_v42 = vadd.s32 24, %v3016_v20 }
 0x1d1   :  { %102 = vadd.xlane.f32.xlu0 %v101_v44  ;;  %v308_v44 = vadd.s32 32, %v3016_v20  ;;  %v4646_v35 = vmov 0  }
 0x1d2   :  { %v100_v45 = vmul.f32 %v98_v43, %v98_v43  ;;  %vm316_vm8 = vcmp.eq.s32.totalorder %v306_v41, %v313_v33  ;;  %vm317_vm9 = vcmp.eq.s32.totalorder %v307_v42, %v313_v33 }
 0x1d3   :  { %vm318_vm10 = vcmp.eq.s32.totalorder %v308_v44, %v313_v33 }
 0x1d4   :  { %v104_v46 = vsel %vm49_vm0, %v100_v45, 0.0  ;;  %v309_v45 = vadd.s32 40, %v3016_v20 }
 0x1d5   :  { %105 = vadd.xlane.f32.xlu1 %v104_v46 }
 0x1d6   :  { %vm319_vm11 = vcmp.eq.s32.totalorder %v309_v45, %v313_v33  ;;  %v4552_v45 = vmov 2  }
 0x1e6   :  { %486 = vperm.xlu1 %2686, %v472_v38   ;;  %v4554_v38 = vmov 4  }
 0x1e7   :  { %481 = vperm.xlu0 %2685, %v471_v50  }
 0x1ea   :  { %491 = vperm.xlu1 %2686, %v473_v16  }
 0x1eb   :  { %496 = vperm.xlu0 %2685, %v474_v52  }
 0x1ef   :  { %506 = vperm.xlu0 %2685, %v476_v53  }
 0x1f3   :  { %516 = vperm.xlu0 %2685, %v478_v54  }
 0x1f7   :  { %675 = vperm.xlu0 %2685, %v464_v55  }
 0x1fb   :  { %685 = vperm.xlu0 %2685, %v466_v56   ;;  %v2541_v56 = vsel %vm316_vm8, 1.0, %v4548_v48  ;;  %vm1927_vm8 = vcmask 1043456  }
 0x1ff   :  { %695 = vperm.xlu0 %2685, %v468_v57   ;;  %v2542_v57 = vsel %vm317_vm9, 1.0, %v4548_v48  ;;  %vm1932_vm9 = vcmask 1044480  }
 0x203   :  { %705 = vperm.xlu0 %2685, %v470_v58   ;;  %v310_v58 = vadd.s32 48, %v3016_v20 }
 0x205   :  { %vm320_vm12 = vcmp.eq.s32.totalorder %v310_v58, %v313_v33 }
 0x25e   :  { %v103_v59 = vpop.xlane.xlu0 %102 }
 0x25f   :  { %v107_v60 = vmul.f32 0.03125, %v103_v59  ;;  %v465_v59 = vld [vmem:[%s4541_s7 + $0x10] sm:$0xff] }
 0x261   :  { %v109_v61 = vadd.f32 1e-05, %v107_v60 }
 0x262   :  { %v106_v62 = vpop.xlane.xlu1 %105 }
 0x263   :  { %2860 = vrsqrt.f32 %v109_v61  ;;  %v108_v63 = vmul.f32 0.03125, %v106_v62  ;;  %v2543_v61 = vsel %vm318_vm10, 1.0, %v4548_v48  ;;  %v2544_v62 = vsel %vm319_vm11, 1.0, %v4548_v48 }
 0x264   :  { %vm1942_vm10 = vcmask 1046528   ;;  %vm1937_vm11 = vcmask 1045504  }
 0x265   :  { %v110_v0 = vadd.f32 1e-05, %v108_v63  ;;  %v311_v63 = vadd.s32 56, %v3016_v20 }
 0x267   :  { %2862 = vrsqrt.f32 %v110_v0  ;;  %v339_v0 = vpack.c.bf16 %v2542_v57, %v2541_v56  ;;  %vm321_vm13 = vcmp.eq.s32.totalorder %v311_v63, %v313_v33 }
 0x26d   :  { %v2861_v4 = vpop.eup %2860 }
 0x26e   :  { %v113_v5 = vmul.f32 %v2861_v4, %v97_v39  ;;  %v475_v39 = vld [vmem:[%s4542_s8 + $0x20] sm:$0xff] }
 0x26f   :  { %501 = vperm.xlu1 %2686, %v475_v39   ;;  %v467_v4 = vld [vmem:[%s4541_s7 + $0x20] sm:$0xff] }
 0x270   :  { %v119_v7 = vmul.f32 %v118_v3, %v113_v5  ;;  %v2545_v5 = vsel %vm320_vm12, 1.0, %v4548_v48  ;;  %vm1975_vm12 = vcmask 130048  }
 0x271   :  { %v2863_v9 = vpop.eup %2862 }
 0x272   :  { %v114_v10 = vmul.f32 %v2863_v9, %v98_v43  ;;  %v125_v11 = vadd.f32 %v124_v6, %v119_v7  ;;  %v469_v7 = vld [vmem:[%s4541_s7 + $0x30] sm:$0xff]  ;;  %v4550_v9 = vmov 1   ;;  %s2929_s7 = smov 64  }
 0x273   :  { %511 = vperm.xlu1 %2686, %v477_v40  }
 0x274   :  { %v120_v12 = vmul.f32 %v118_v3, %v114_v10  ;;  %v130_v13 = vrot.slane %v125_v11, 7  ;;  %v340_v3 = vpack.c.bf16 %v2544_v62, %v2543_v61  ;;  %v487_v10 = vpop.permute.xlu1 %486 }
 0x276   :  { %v126_v17 = vadd.f32 %v124_v6, %v120_v12  ;;  %v135_v19 = vsel %vm129_vm2, 0.0, %v130_v13  ;;  %v2546_v6 = vsel %vm321_vm13, 1.0, %v4548_v48 }
 0x277   :  { %v165_v26 = vsel %vm3095_vm3, 0.0, %v135_v19  ;;  %670 = vperm.xlu1 %2686, %v463_v49   ;;  %v341_v8 = vpack.c.bf16 %v2546_v6, %v2545_v5  ;;  %v4560_v49 = vmov 6  }
 0x278   :  { %v131_v18 = vrot.slane %v126_v17, 7  ;;  %v167_v32 = vpack.c.bf16 %v126_v17, %v125_v11  ;;  %v492_v17 = vpop.permute.xlu1 %491 }
 0x27a   :  { %v132_v25 = vsel %vm129_vm2, %v130_v13, %v131_v18  ;;  %v482_v13 = vpop.permute.xlu0 %481  ;;  %v4568_v18 = vmov 3  }
 0x27b   :  { %v166_v27 = vsel %vm3099_vm4, 0.0, %v132_v25  ;;  %680 = vperm.xlu1 %2686, %v465_v59  }
 0x27c   :  { %v172_v29 = vpack.c.bf16 %v166_v27, %v165_v26 }
 0x27e   :  { %2605 = vmatmul.mubr.msk.bf16.vlgmr.msra.gmra.mrb[0].mxu0 %vm49_vm0, %v172_v29  ;;  %v497_v25 = vpop.permute.xlu0 %496 }
 0x27f   :  { %2609 = vmatpush3.bf16.msra.mxu0 %v2844_v28  ;;  %2612 = vmatprep.mubr.msk.bf16.mxu0 %vm2918_vm1, %v4548_v48 }
 0x280   :  { %2610 = vmatprep.subr.bf16.mxu0 %v4548_v48  ;;  %690 = vperm.xlu1 %2686, %v467_v4  }
 0x283   :  { %2611 = vmatpush3.bf16.msra.mxu0 %v2845_v30 }
 0x284   :  { %2626 = vmatprep.subr.bf16.mxu0 %v4548_v48  ;;  %700 = vperm.xlu1 %2686, %v469_v7  }
 0x288   :  { %2692 = vset.pattern.permute.xlu1 %v4550_v9 }
 0x28a   :  { %2613 = vmatmul.mubr.msk.bf16.vlgmr.msra.gmra.mrb[0].mxu0 %vm49_vm0, %v167_v32 }
 0x28b   :  { %2630 = vmatprep.mubr.msk.bf16.mxu0 %vm2918_vm1, %v4548_v48 }
 0x2ee   :  { %v3284_v56 = vpop.permute.xlu1 %501 }
 0x2ef   :  { %4620 = vst [vmem:[#allocation17_spill] sm:$0xff] %v3284_v56 }
 0x2f2   :  { %v3293_v59 = vpop.permute.xlu1 %511 }
 0x2f6   :  { %v3303_v62 = vpop.permute.xlu1 %670 }
 0x2fa   :  { %v3314_v4 = vpop.permute.xlu1 %680 }
 0x2fb   :  { %4622 = vst [vmem:[#allocation19_spill] sm:$0xff] %v3314_v4 }
 0x35d   :  { %v3141_v43 = vpop.f32.mrb[0].mxu0 }
 0x35e   :  { %4616 = vst [vmem:[#allocation13_spill] sm:$0xff] %v3141_v43  ;;  %v2614_v46 = vpop.f32.mrb[1].mxu0 }
 0x35f   :  { %v3145_v47 = vpop.f32.mrb[2].mxu0 }
 0x360   :  { %4617 = vst [vmem:[#allocation14_spill] sm:$0xff] %v3145_v47  ;;  %v303_v50 = vpack.c.bf16 %v3145_v47, %v3141_v43  ;;  %v2615_v52 = vpop.f32.mrb[3].mxu0  ;;  %v4649_v43 = vmov 6   ;;  %v4650_v47 = vmov 2  }
 0x361   :  { %v4558_v52 = vmov 7  }
 0x362   :  { %v3152_v53 = vunpack.c.l.bf16 %v303_v50  ;;  %v3154_v54 = vunpack.c.h.bf16 %v303_v50  ;;  %2666 = vmatprep.subr.msk.bf16.mxu1 %vm342_vm7, %v303_v50  ;;  %v356_v55 = vsel %vm342_vm7, %v303_v50, 0  ;;  %v4556_v50 = vmov 5  }
 0x363   :  { %2617 = vmatpush3.bf16.xpose.msra.mxu1 %v356_v55  ;;  %v3278_v55 = vpop.permute.xlu0 %506 }
 0x364   :  { %4618 = vst [vmem:[#allocation15_spill] sm:$0xff] %v3154_v54  ;;  %v2687_v60 = vpack.i.bf16 %v3154_v54, %v3152_v53  ;;  %2634 = vmatprep.subr.bf16.mxu1 %v4548_v48  ;;  %4619 = vst [vmem:[#allocation16_spill] sm:$0xff] %v3278_v55 }
 0x366   :  { %2688 = vrot.lane.b32.xlu0 %v2687_v60, %s2920_s27  ;;  %s2930_s27 = smov 80  }
 0x367   :  { %v3286_v57 = vpop.permute.xlu0 %516 }
 0x36a   :  { %2619 = vmatmul.mubr.msk.bf16.vlgmr.msra.gmra.mrb[0].mxu1 %vm342_vm7, %v339_v0 }
 0x36b   :  { %2622 = vmatprep.mubr.msk.bf16.mxu1 %vm342_vm7, %v340_v3  ;;  %v3296_v60 = vpop.permute.xlu0 %675 }
 0x36f   :  { %v3306_v63 = vpop.permute.xlu0 %685 }
 0x370   :  { %4621 = vst [vmem:[#allocation18_spill] sm:$0xff] %v3306_v63  ;;  %v708_v63 = vmul.f32 0.0, %v3303_v62 }
 0x372   :  { %2623 = vmatmul.mubr.msk.bf16.gmra.mrb[4].mxu1 %vm342_vm7, %v341_v8 }
 0x373   :  { %2638 = vmatprep.mubr.msk.bf16.mxu1 %vm2918_vm1, %v4548_v48  ;;  %v3316_v5 = vpop.permute.xlu0 %695 }
 0x374   :  { %4623 = vst [vmem:[#allocation20_spill] sm:$0xff] %v3316_v5 }
 0x43d   :  { %v2620_v11 = vpop.f32.mrb[0].mxu1 }
 0x43e   :  { %433 = vrot.lane.b32.xlu1 %v2620_v11, %s2922_s14  ;;  %v3185_v12 = vpop.f32.mrb[1].mxu1  ;;  %v521_v19 = vmul.f32 %v2620_v11, %v492_v17 }
 0x43f   :  { %v3187_v14 = vpop.f32.mrb[2].mxu1  ;;  %573 = vperm.xlu0 %2685, %v3185_v12   ;;  %v519_v27 = vmul.f32 %v482_v13, %v3185_v12 }
 0x440   :  { %v3190_v15 = vpop.f32.mrb[3].mxu1  ;;  %v522_v30 = vmul.f32 %v3187_v14, %v497_v25 }
 0x441   :  { %v520_v34 = vmul.f32 %v487_v10, %v3190_v15  ;;  %v3324_v10 = vpop.permute.xlu1 %690 }
 0x442   :  { %789 = vperm.xlu1 %2692, %v2620_v11   ;;  %4624 = vst [vmem:[#allocation21_spill] sm:$0xff] %v3324_v10 }
 0x443   :  { %2702 = vset.pattern.permute.xlu0 %v4568_v18 }
 0x444   :  { %1126 = vperm.xlu0 %2702, %v3185_v12  }
 0x445   :  { %v3194_v26 = vpop.f32.mrb[4].mxu1 }
 0x446   :  { %v529_v28 = vmul.f32 %v3194_v26, %v521_v19  ;;  %2693 = vset.pattern.permute.xlu1 %v4564_v51  ;;  %v3199_v29 = vpop.f32.mrb[5].mxu1 }
 0x447   :  { %v527_v32 = vmul.f32 %v519_v27, %v3199_v29  ;;  %581 = vperm.xlu1 %2693, %v2620_v11   ;;  %v3203_v33 = vpop.f32.mrb[6].mxu1 }
 0x448   :  { %v530_v36 = vmul.f32 %v3203_v33, %v522_v30  ;;  %v3207_v37 = vpop.f32.mrb[7].mxu1  ;;  %2703 = vset.pattern.permute.xlu0 %v4554_v38  ;;  %v545_v39 = vsel %vm535_vm14, %v529_v28, 0.0 }
 0x449   :  { %v528_v16 = vmul.f32 %v520_v34, %v3207_v37  ;;  %1298 = vperm.xlu0 %2703, %v3185_v12   ;;  %v536_v41 = vsel %vm535_vm14, %v527_v32, 0.0 }
 0x44a   :  { %v546_v40 = vsel %vm535_vm14, %v530_v36, 0.0 }
 0x44b   :  { %v3215_v42 = vadd.f32 %v546_v40, %v545_v39  ;;  %v537_v44 = vsel %vm535_vm14, %v528_v16, 0.0  ;;  %2694 = vset.pattern.permute.xlu1 %v4552_v45 }
 0x44c   :  { %v3219_v46 = vadd.f32 %v537_v44, %v536_v41  ;;  %962 = vperm.xlu1 %2694, %v2620_v11  }
 0x44d   :  { %2705 = vset.pattern.permute.xlu0 %v4560_v49  ;;  %v548_v58 = vrot.slane %v3215_v42, 4 }
 0x44e   :  { %1642 = vperm.xlu0 %2705, %v3185_v12   ;;  %v539_v6 = vrot.slane %v3219_v46, 4 }
 0x44f   :  { %v549_v61 = vadd.f32 %v548_v58, %v3215_v42 }
 0x450   :  { %2695 = vset.pattern.permute.xlu1 %v4568_v18  ;;  %v540_v8 = vadd.f32 %v539_v6, %v3219_v46 }
 0x451   :  { %1134 = vperm.xlu1 %2695, %v2620_v11   ;;  %v550_v0 = vrot.slane %v549_v61, 2 }
 0x452   :  { %435 = vrot.lane.b32.xlu0 %v3187_v14, %s2922_s14  ;;  %v541_v13 = vrot.slane %v540_v8, 2 }
 0x453   :  { %2708 = vset.pattern.permute.xlu0 %v4564_v51  ;;  %v551_v3 = vadd.f32 %v550_v0, %v549_v61 }
 0x454   :  { %v542_v17 = vadd.f32 %v541_v13, %v540_v8 }
 0x455   :  { %2696 = vset.pattern.permute.xlu1 %v4554_v38  ;;  %v552_v7 = vrot.slane %v551_v3, 1 }
 0x456   :  { %1306 = vperm.xlu1 %2696, %v2620_v11   ;;  %585 = vperm.xlu0 %2708, %v3187_v14   ;;  %v543_v27 = vrot.slane %v542_v17, 1 }
 0x458   :  { %v3354_v32 = vadd.f32 %v543_v27, %v542_v17 }
 0x45a   :  { %2697 = vset.pattern.permute.xlu1 %v4556_v50  ;;  %2710 = vset.pattern.permute.xlu0 %v4568_v18 }
 0x45b   :  { %1478 = vperm.xlu1 %2697, %v2620_v11   ;;  %1138 = vperm.xlu0 %2710, %v3187_v14  }
 0x45f   :  { %2698 = vset.pattern.permute.xlu1 %v4560_v49  ;;  %2711 = vset.pattern.permute.xlu0 %v4554_v38 }
 0x460   :  { %1650 = vperm.xlu1 %2698, %v2620_v11   ;;  %1310 = vperm.xlu0 %2711, %v3187_v14  }
 0x464   :  { %2699 = vset.pattern.permute.xlu1 %v4558_v52  ;;  %2713 = vset.pattern.permute.xlu0 %v4560_v49 }
 0x465   :  { %1822 = vperm.xlu1 %2699, %v2620_v11   ;;  %1654 = vperm.xlu0 %2713, %v3187_v14   ;;  %v3326_v11 = vpop.permute.xlu0 %705 }
 0x466   :  { %4625 = vst [vmem:[#allocation22_spill] sm:$0xff] %v3326_v11 }
 0x469   :  { %425 = vrot.lane.b32.xlu1 %v3185_v12, %s2922_s14  ;;  %427 = vrot.lane.b32.xlu0 %v3190_v15, %s2922_s14 }
 0x46a   :  { %2700 = vset.pattern.permute.xlu1 %v4550_v9  ;;  %2715 = vset.pattern.permute.xlu0 %v4550_v9 }
 0x46d   :  { %781 = vperm.xlu1 %2700, %v3185_v12   ;;  %785 = vperm.xlu0 %2715, %v3190_v15  }
 0x471   :  { %2701 = vset.pattern.permute.xlu1 %v4552_v45  ;;  %2717 = vset.pattern.permute.xlu0 %v4552_v45 }
 0x472   :  { %954 = vperm.xlu1 %2701, %v3185_v12   ;;  %958 = vperm.xlu0 %2717, %v3190_v15  }
 0x476   :  { %2704 = vset.pattern.permute.xlu1 %v4556_v50  ;;  %2720 = vset.pattern.permute.xlu0 %v4556_v50 }
 0x477   :  { %1470 = vperm.xlu1 %2704, %v3185_v12   ;;  %1474 = vperm.xlu0 %2720, %v3190_v15  }
 0x47b   :  { %2706 = vset.pattern.permute.xlu1 %v4558_v52  ;;  %2722 = vset.pattern.permute.xlu0 %v4558_v52 }
 0x47c   :  { %1814 = vperm.xlu1 %2706, %v3185_v12   ;;  %1818 = vperm.xlu0 %2722, %v3190_v15   ;;  %v3328_v12 = vadd.f32 %v552_v7, %v551_v3 }
 0x480   :  { %2707 = vset.pattern.permute.xlu1 %v4550_v9  ;;  %441 = vrot.lane.b32.xlu0 %v3199_v29, %s2922_s14 }
 0x481   :  { %793 = vperm.xlu1 %2707, %v3187_v14   ;;  %2733 = vset.pattern.permute.xlu0 %v4568_v18 }
 0x484   :  { %1234 = vperm.xlu0 %2733, %v3199_v29  }
 0x485   :  { %2709 = vset.pattern.permute.xlu1 %v4552_v45 }
 0x486   :  { %966 = vperm.xlu1 %2709, %v3187_v14  }
 0x488   :  { %2735 = vset.pattern.permute.xlu0 %v4556_v50 }
 0x489   :  { %1578 = vperm.xlu0 %2735, %v3199_v29  }
 0x48a   :  { %2712 = vset.pattern.permute.xlu1 %v4556_v50 }
 0x48b   :  { %1482 = vperm.xlu1 %2712, %v3187_v14  }
 0x48d   :  { %2737 = vset.pattern.permute.xlu0 %v4564_v51 }
 0x48e   :  { %729 = vperm.xlu0 %2737, %v3203_v33  }
 0x48f   :  { %2714 = vset.pattern.permute.xlu1 %v4558_v52 }
 0x490   :  { %1826 = vperm.xlu1 %2714, %v3187_v14   ;;  %v3334_v14 = vpop.permute.xlu1 %700 }
 0x491   :  { %4626 = vst [vmem:[#allocation23_spill] sm:$0xff] %v3334_v14 }
 0x492   :  { %2740 = vset.pattern.permute.xlu0 %v4568_v18 }
 0x493   :  { %1246 = vperm.xlu0 %2740, %v3203_v33  }
 0x494   :  { %2716 = vset.pattern.permute.xlu1 %v4564_v51 }
 0x495   :  { %577 = vperm.xlu1 %2716, %v3190_v15  }
 0x497   :  { %2742 = vset.pattern.permute.xlu0 %v4556_v50 }
 0x498   :  { %1590 = vperm.xlu0 %2742, %v3203_v33  }
 0x499   :  { %2718 = vset.pattern.permute.xlu1 %v4568_v18 }
 0x49a   :  { %1130 = vperm.xlu1 %2718, %v3190_v15  }
 0x49c   :  { %2744 = vset.pattern.permute.xlu0 %v4564_v51 }
 0x49d   :  { %721 = vperm.xlu0 %2744, %v3207_v37  }
 0x49e   :  { %2719 = vset.pattern.permute.xlu1 %v4554_v38 }
 0x49f   :  { %1302 = vperm.xlu1 %2719, %v3190_v15  }
 0x4a1   :  { %2745 = vset.pattern.permute.xlu0 %v4550_v9 }
 0x4a2   :  { %894 = vperm.xlu0 %2745, %v3207_v37  }
 0x4a3   :  { %2721 = vset.pattern.permute.xlu1 %v4560_v49 }
 0x4a4   :  { %1646 = vperm.xlu1 %2721, %v3190_v15   ;;  %v3336_v15 = vpop.permute.xlu0 %2688 }
 0x4a5   :  { %4627 = vst [vmem:[#allocation24_spill] sm:$0xff] %v3336_v15  ;;  %v924_v15 = vrot.slane %v3152_v53, %v3027_v24 }
 0x4a6   :  { %2746 = vset.pattern.permute.xlu0 %v4552_v45 }
 0x4a7   :  { %1066 = vperm.xlu0 %2746, %v3207_v37  }
 0x4a8   :  { %449 = vrot.lane.b32.xlu1 %v3194_v26, %s2922_s14 }
 0x4a9   :  { %2723 = vset.pattern.permute.xlu1 %v4564_v51 }
 0x4ab   :  { %2748 = vset.pattern.permute.xlu0 %v4554_v38 }
 0x4ac   :  { %725 = vperm.xlu1 %2723, %v3194_v26   ;;  %1410 = vperm.xlu0 %2748, %v3207_v37  }
 0x4b0   :  { %2724 = vset.pattern.permute.xlu1 %v4550_v9  ;;  %2750 = vset.pattern.permute.xlu0 %v4560_v49  ;;  %v3342_v19 = vpop.permute.xlu1 %433 }
 0x4b1   :  { %898 = vperm.xlu1 %2724, %v3194_v26   ;;  %1754 = vperm.xlu0 %2750, %v3207_v37  }
 0x4b5   :  { %2725 = vset.pattern.permute.xlu1 %v4552_v45  ;;  %2752 = vset.pattern.permute.xlu0 %v4550_v9 }
 0x4b6   :  { %1070 = vperm.xlu1 %2725, %v3194_v26   ;;  %862 = vperm.xlu0 %2752, %v3328_v12  }
 0x4ba   :  { %2726 = vset.pattern.permute.xlu1 %v4568_v18  ;;  %2754 = vset.pattern.permute.xlu0 %v4568_v18 }
 0x4bb   :  { %1242 = vperm.xlu1 %2726, %v3194_v26   ;;  %1206 = vperm.xlu0 %2754, %v3328_v12  }
 0x4be   :  { %v3344_v25 = vpop.permute.xlu0 %573 }
 0x4bf   :  { %2727 = vset.pattern.permute.xlu1 %v4554_v38  ;;  %2756 = vset.pattern.permute.xlu0 %v4556_v50 }
 0x4c0   :  { %1414 = vperm.xlu1 %2727, %v3194_v26   ;;  %1550 = vperm.xlu0 %2756, %v3328_v12  }
 0x4c1   :  { %v3350_v28 = vpop.permute.xlu1 %789 }
 0x4c2   :  { %4628 = vst [vmem:[#allocation25_spill] sm:$0xff] %v3350_v28 }
 0x4c3   :  { %v3352_v30 = vpop.permute.xlu0 %1126 }
 0x4c4   :  { %2728 = vset.pattern.permute.xlu1 %v4556_v50  ;;  %2758 = vset.pattern.permute.xlu0 %v4564_v51 }
 0x4c5   :  { %1586 = vperm.xlu1 %2728, %v3194_v26   ;;  %642 = vperm.xlu0 %2758, %v3354_v32  }
 0x4c6   :  { %v3360_v34 = vpop.permute.xlu1 %581 }
 0x4c7   :  { %4629 = vst [vmem:[#allocation26_spill] sm:$0xff] %v3360_v34 }
 0x4c8   :  { %v3362_v36 = vpop.permute.xlu0 %1298 }
 0x4c9   :  { %2729 = vset.pattern.permute.xlu1 %v4560_v49  ;;  %2760 = vset.pattern.permute.xlu0 %v4552_v45 }
 0x4ca   :  { %1758 = vperm.xlu1 %2729, %v3194_v26   ;;  %1030 = vperm.xlu0 %2760, %v3354_v32  }
 0x4cb   :  { %v3368_v16 = vpop.permute.xlu1 %962 }
 0x4cc   :  { %4630 = vst [vmem:[#allocation27_spill] sm:$0xff] %v3368_v16 }
 0x4cd   :  { %v3370_v39 = vpop.permute.xlu0 %1642 }
 0x4ce   :  { %2730 = vset.pattern.permute.xlu1 %v4564_v51  ;;  %2762 = vset.pattern.permute.xlu0 %v4554_v38 }
 0x4cf   :  { %717 = vperm.xlu1 %2730, %v3199_v29   ;;  %1374 = vperm.xlu0 %2762, %v3354_v32  }
 0x4d0   :  { %v3376_v40 = vpop.permute.xlu1 %1134 }
 0x4d1   :  { %4631 = vst [vmem:[#allocation28_spill] sm:$0xff] %v3376_v40  ;;  %v3378_v41 = vpop.permute.xlu0 %435  ;;  %v4656_v40 = vmov 7  }
 0x4d3   :  { %2731 = vset.pattern.permute.xlu1 %v4550_v9  ;;  %2764 = vset.pattern.permute.xlu0 %v4560_v49 }
 0x4d4   :  { %890 = vperm.xlu1 %2731, %v3199_v29   ;;  %1718 = vperm.xlu0 %2764, %v3354_v32  }
 0x4d5   :  { %v3384_v26 = vpop.permute.xlu1 %1306  ;;  %v3386_v42 = vpop.permute.xlu0 %585 }
 0x4d6   :  { %4632 = vst [vmem:[#allocation29_spill] sm:$0xff] %v3384_v26  ;;  %4633 = vst [vmem:[#allocation30_spill] sm:$0xff] %v3386_v42 }
 0x4d8   :  { %2732 = vset.pattern.permute.xlu1 %v4552_v45  ;;  %2766 = vset.pattern.permute.xlu0 %v4550_v9 }
 0x4d9   :  { %1062 = vperm.xlu1 %2732, %v3199_v29   ;;  %805 = vperm.xlu0 %2766, %v3342_v19  }
 0x4da   :  { %v3392_v44 = vpop.permute.xlu1 %1478  ;;  %v3394_v46 = vpop.permute.xlu0 %1138 }
 0x4db   :  { %4634 = vst [vmem:[#allocation31_spill] sm:$0xff] %v3392_v44  ;;  %4635 = vst [vmem:[#allocation32_spill] sm:$0xff] %v3394_v46 }
 0x4dd   :  { %2734 = vset.pattern.permute.xlu1 %v4554_v38  ;;  %2768 = vset.pattern.permute.xlu0 %v4552_v45 }
 0x4de   :  { %1406 = vperm.xlu1 %2734, %v3199_v29   ;;  %978 = vperm.xlu0 %2768, %v3342_v19  }
 0x4df   :  { %v3400_v58 = vpop.permute.xlu1 %1650  ;;  %v3402_v61 = vpop.permute.xlu0 %1310 }
 0x4e0   :  { %4636 = vst [vmem:[#allocation33_spill] sm:$0xff] %v3400_v58  ;;  %4637 = vst [vmem:[#allocation34_spill] sm:$0xff] %v3402_v61 }
 0x4e2   :  { %2736 = vset.pattern.permute.xlu1 %v4560_v49  ;;  %2771 = vset.pattern.permute.xlu0 %v4556_v50 }
 0x4e3   :  { %1750 = vperm.xlu1 %2736, %v3199_v29   ;;  %1494 = vperm.xlu0 %2771, %v3342_v19  }
 0x4e4   :  { %v3408_v0 = vpop.permute.xlu1 %1822  ;;  %v3410_v3 = vpop.permute.xlu0 %1654 }
 0x4e5   :  { %4638 = vst [vmem:[#allocation35_spill] sm:$0xff] %v3408_v0  ;;  %4639 = vst [vmem:[#allocation36_spill] sm:$0xff] %v3410_v3  ;;  %v4653_v0 = vmov 3   ;;  %v4654_v3 = vmov 1  }
 0x4e7   :  { %451 = vrot.lane.b32.xlu1 %v3203_v33, %s2922_s14  ;;  %2773 = vset.pattern.permute.xlu0 %v4558_v52 }
 0x4e8   :  { %v3415_v6 = vpop.permute.xlu1 %425  ;;  %1838 = vperm.xlu0 %2773, %v3342_v19   ;;  %v3418_v7 = vpop.permute.xlu0 %427  ;;  %2738 = vset.pattern.permute.xlu1 %v4550_v9 }
 0x4e9   :  { %4640 = vst [vmem:[#allocation37_spill] sm:$0xff] %v3415_v6 }
 0x4eb   :  { %902 = vperm.xlu1 %2738, %v3203_v33  }
 0x4ec   :  { %v3422_v29 = vpop.permute.xlu1 %781  ;;  %2774 = vset.pattern.permute.xlu0 %v4550_v9  ;;  %v3425_v8 = vpop.permute.xlu0 %785 }
 0x4ed   :  { %797 = vperm.xlu0 %2774, %v3415_v6  }
 0x4ef   :  { %2739 = vset.pattern.permute.xlu1 %v4552_v45 }
 0x4f0   :  { %1074 = vperm.xlu1 %2739, %v3203_v33  }
 0x4f1   :  { %v3430_v13 = vpop.permute.xlu1 %954  ;;  %2776 = vset.pattern.permute.xlu0 %v4552_v45  ;;  %v3433_v17 = vpop.permute.xlu0 %958 }
 0x4f2   :  { %970 = vperm.xlu0 %2776, %v3415_v6  }
 0x4f4   :  { %2741 = vset.pattern.permute.xlu1 %v4554_v38 }
 0x4f5   :  { %1418 = vperm.xlu1 %2741, %v3203_v33  }
 0x4f6   :  { %v3438_v27 = vpop.permute.xlu1 %1470  ;;  %2779 = vset.pattern.permute.xlu0 %v4556_v50  ;;  %v3441_v48 = vpop.permute.xlu0 %1474 }
 0x4f7   :  { %1486 = vperm.xlu0 %2779, %v3415_v6  }
 0x4f9   :  { %2743 = vset.pattern.permute.xlu1 %v4560_v49  ;;  %v4643_v49 = vmov 5  }
 0x4fa   :  { %1762 = vperm.xlu1 %2743, %v3203_v33  }
 0x4fb   :  { %v3446_v9 = vpop.permute.xlu1 %1814  ;;  %2781 = vset.pattern.permute.xlu0 %v4558_v52  ;;  %v3449_v45 = vpop.permute.xlu0 %1818 }
 0x4fc   :  { %1830 = vperm.xlu0 %2781, %v3415_v6  }
 0x4fe   :  { %443 = vrot.lane.b32.xlu1 %v3207_v37, %s2922_s14 }
 0x4ff   :  { %v3454_v38 = vpop.permute.xlu0 %441  ;;  %2747 = vset.pattern.permute.xlu1 %v4568_v18 }
 0x500   :  { %v3457_v50 = vpop.permute.xlu1 %793  ;;  %2783 = vset.pattern.permute.xlu0 %v4564_v51  ;;  %v4645_v51 = vmov 4  }
 0x501   :  { %4641 = vst [vmem:[#allocation38_spill] sm:$0xff] %v3457_v50  ;;  %601 = vperm.xlu0 %2783, %v3378_v41  }
 0x502   :  { %1238 = vperm.xlu1 %2747, %v3207_v37  }
 0x503   :  { %v3462_v33 = vpop.permute.xlu0 %1234 }
 0x505   :  { %v3464_v52 = vpop.permute.xlu1 %966  ;;  %2785 = vset.pattern.permute.xlu0 %v4568_v18 }
 0x506   :  { %4642 = vst [vmem:[#allocation39_spill] sm:$0xff] %v3464_v52  ;;  %2749 = vset.pattern.permute.xlu1 %v4643_v49  ;;  %1154 = vperm.xlu0 %2785, %v3378_v41  }
 0x507   :  { %1582 = vperm.xlu1 %2749, %v3207_v37  }
 0x508   :  { %v3470_v23 = vpop.permute.xlu0 %1578 }
 0x50a   :  { %v3472_v21 = vpop.permute.xlu1 %1482  ;;  %2786 = vset.pattern.permute.xlu0 %v4645_v51 }
 0x50b   :  { %4644 = vst [vmem:[#allocation40_spill] sm:$0xff] %v3472_v21  ;;  %2751 = vset.pattern.permute.xlu1 %v4646_v35  ;;  %1326 = vperm.xlu0 %2786, %v3378_v41  }
 0x50c   :  { %647 = vperm.xlu1 %2751, %v3328_v12  }
 0x50d   :  { %v3478_v31 = vpop.permute.xlu0 %729 }
 0x50e   :  { %4647 = vst [vmem:[#allocation41_spill] sm:$0xff] %v3478_v31 }
 0x50f   :  { %v3480_v18 = vpop.permute.xlu1 %1826  ;;  %2788 = vset.pattern.permute.xlu0 %v4649_v43 }
 0x510   :  { %4648 = vst [vmem:[#allocation42_spill] sm:$0xff] %v3480_v18  ;;  %2753 = vset.pattern.permute.xlu1 %v4650_v47  ;;  %1670 = vperm.xlu0 %2788, %v3378_v41  }
 0x511   :  { %1034 = vperm.xlu1 %2753, %v3328_v12  }
 0x512   :  { %v3486_v37 = vpop.permute.xlu0 %1246 }
 0x513   :  { %4651 = vst [vmem:[#allocation43_spill] sm:$0xff] %v3486_v37  ;;  %v751_v37 = vrot.slane %v3152_v53, %v3019_v22 }
 0x514   :  { %v3488_v11 = vpop.permute.xlu1 %577  ;;  %2791 = vset.pattern.permute.xlu0 %v4646_v35 }
 0x515   :  { %2755 = vset.pattern.permute.xlu1 %v4645_v51  ;;  %593 = vperm.xlu0 %2791, %v3418_v7  }
 0x516   :  { %1378 = vperm.xlu1 %2755, %v3328_v12  }
 0x517   :  { %v3494_v10 = vpop.permute.xlu0 %1590 }
 0x518   :  { %4652 = vst [vmem:[#allocation44_spill] sm:$0xff] %v3494_v10 }
 0x519   :  { %v3496_v14 = vpop.permute.xlu1 %1130  ;;  %2793 = vset.pattern.permute.xlu0 %v4653_v0 }
 0x51a   :  { %2757 = vset.pattern.permute.xlu1 %v4649_v43  ;;  %1146 = vperm.xlu0 %2793, %v3418_v7  }
 0x51b   :  { %1722 = vperm.xlu1 %2757, %v3328_v12  }
 0x51c   :  { %v3502_v18 = vpop.permute.xlu0 %721 }
 0x51d   :  { %v765_v24 = vmul.f32 %v751_v37, %v3502_v18  ;;  %v525_v18 = vmul.f32 %v3293_v59, %v3342_v19  ;;  %v1268_v59 = vrot.slane %v3152_v53, %v3086_v2 }
 0x51e   :  { %v3504_v58 = vpop.permute.xlu1 %1302  ;;  %2794 = vset.pattern.permute.xlu0 %v4645_v51 }
 0x51f   :  { %2759 = vset.pattern.permute.xlu1 %v4654_v3  ;;  %1318 = vperm.xlu0 %2794, %v3418_v7  }
 0x520   :  { %858 = vperm.xlu1 %2759, %v3354_v32  }
 0x521   :  { %v3510_v44 = vpop.permute.xlu0 %894 }
 0x523   :  { %v3512_v5 = vpop.permute.xlu1 %1646  ;;  %2796 = vset.pattern.permute.xlu0 %v4649_v43 }
 0x524   :  { %2761 = vset.pattern.permute.xlu1 %v4653_v0  ;;  %1662 = vperm.xlu0 %2796, %v3418_v7  }
 0x525   :  { %1202 = vperm.xlu1 %2761, %v3354_v32  }
 0x526   :  { %v3518_v21 = vpop.permute.xlu0 %1066 }
 0x527   :  { %v3520_v26 = vpop.permute.xlu1 %449 }
 0x528   :  { %2799 = vset.pattern.permute.xlu0 %v4654_v3 }
 0x529   :  { %2763 = vset.pattern.permute.xlu1 %v4643_v49  ;;  %914 = vperm.xlu0 %2799, %v3520_v26  }
 0x52a   :  { %1546 = vperm.xlu1 %2763, %v3354_v32  }
 0x52b   :  { %v3526_v61 = vpop.permute.xlu1 %725  ;;  %v3528_v54 = vpop.permute.xlu0 %1410 }
 0x52c   :  { %4655 = vst [vmem:[#allocation45_spill] sm:$0xff] %v3526_v61 }
 0x52d   :  { %2800 = vset.pattern.permute.xlu0 %v4650_v47 }
 0x52e   :  { %2765 = vset.pattern.permute.xlu1 %v4656_v40  ;;  %1086 = vperm.xlu0 %2800, %v3520_v26  }
 0x52f   :  { %1890 = vperm.xlu1 %2765, %v3354_v32  }
 0x530   :  { %v3534_v34 = vpop.permute.xlu1 %898  ;;  %v3536_v16 = vpop.permute.xlu0 %1754 }
 0x531   :  { %4657 = vst [vmem:[#allocation46_spill] sm:$0xff] %v3534_v34 }
 0x532   :  { %2802 = vset.pattern.permute.xlu0 %v4645_v51 }
 0x533   :  { %2767 = vset.pattern.permute.xlu1 %v4646_v35  ;;  %1430 = vperm.xlu0 %2802, %v3520_v26  }
 0x534   :  { %597 = vperm.xlu1 %2767, %v3342_v19  }
 0x535   :  { %v3542_v46 = vpop.permute.xlu1 %1070  ;;  %v3544_v50 = vpop.permute.xlu0 %862 }
 0x536   :  { %4658 = vst [vmem:[#allocation47_spill] sm:$0xff] %v3542_v46  ;;  %4659 = vst [vmem:[#allocation48_spill] sm:$0xff] %v3544_v50 }
 0x537   :  { %2804 = vset.pattern.permute.xlu0 %v4649_v43 }
 0x538   :  { %2769 = vset.pattern.permute.xlu1 %v4653_v0  ;;  %1774 = vperm.xlu0 %2804, %v3520_v26  }
 0x539   :  { %1150 = vperm.xlu1 %2769, %v3342_v19  }
 0x53a   :  { %v3550_v32 = vpop.permute.xlu1 %1242  ;;  %v3552_v42 = vpop.permute.xlu0 %1206 }
 0x53b   :  { %4660 = vst [vmem:[#allocation49_spill] sm:$0xff] %v3550_v32  ;;  %4661 = vst [vmem:[#allocation50_spill] sm:$0xff] %v3552_v42 }
 0x53c   :  { %2806 = vset.pattern.permute.xlu0 %v4654_v3 }
 0x53d   :  { %2770 = vset.pattern.permute.xlu1 %v4645_v51  ;;  %906 = vperm.xlu0 %2806, %v3454_v38  }
 0x53e   :  { %1322 = vperm.xlu1 %2770, %v3342_v19  }
 0x53f   :  { %v3558_v50 = vpop.permute.xlu1 %1414  ;;  %v3560_v52 = vpop.permute.xlu0 %1550 }
 0x540   :  { %4662 = vst [vmem:[#allocation51_spill] sm:$0xff] %v3558_v50  ;;  %4663 = vst [vmem:[#allocation52_spill] sm:$0xff] %v3560_v52 }
 0x541   :  { %2807 = vset.pattern.permute.xlu0 %v4650_v47 }
 0x542   :  { %2772 = vset.pattern.permute.xlu1 %v4649_v43  ;;  %1078 = vperm.xlu0 %2807, %v3454_v38  }
 0x543   :  { %1666 = vperm.xlu1 %2772, %v3342_v19  }
 0x544   :  { %v3566_v42 = vpop.permute.xlu1 %1586  ;;  %v3569_v10 = vpop.permute.xlu0 %642 }
 0x545   :  { %4664 = vst [vmem:[#allocation53_spill] sm:$0xff] %v3566_v42 }
 0x546   :  { %2809 = vset.pattern.permute.xlu0 %v4645_v51 }
 0x547   :  { %2775 = vset.pattern.permute.xlu1 %v4646_v35  ;;  %1422 = vperm.xlu0 %2809, %v3454_v38  }
 0x548   :  { %589 = vperm.xlu1 %2775, %v3415_v6  }
 0x549   :  { %v3574_v52 = vpop.permute.xlu1 %1758  ;;  %v3579_v28 = vpop.permute.xlu0 %1030 }
 0x54a   :  { %4665 = vst [vmem:[#allocation54_spill] sm:$0xff] %v3574_v52 }
 0x54b   :  { %2811 = vset.pattern.permute.xlu0 %v4649_v43 }
 0x54c   :  { %2777 = vset.pattern.permute.xlu1 %v4653_v0  ;;  %1766 = vperm.xlu0 %2811, %v3454_v38  }
 0x54d   :  { %1142 = vperm.xlu1 %2777, %v3415_v6  }
 0x54e   :  { %v718_v42 = vpop.permute.xlu1 %717  ;;  %v3585_v50 = vpop.permute.xlu0 %1374 }
 0x54f   :  { %v764_v34 = vmul.f32 %v751_v37, %v718_v42 }
 0x550   :  { %2812 = vset.pattern.permute.xlu0 %v4646_v35 }
 0x551   :  { %2778 = vset.pattern.permute.xlu1 %v4645_v51  ;;  %v3598_v31 = vadd.f32 %v764_v34, %v708_v63 }
 0x552   :  { %1314 = vperm.xlu1 %2778, %v3415_v6  }
 0x553   :  { %v891_v52 = vpop.permute.xlu1 %890  ;;  %v3591_v46 = vpop.permute.xlu0 %1718  ;;  %v881_v42 = vmul.f32 %v3598_v31, %v3303_v62 }
 0x554   :  { %4666 = vst [vmem:[#allocation55_spill] sm:$0xff] %v3591_v46  ;;  %v937_v22 = vmul.f32 %v924_v15, %v891_v52 }
 0x556   :  { %2780 = vset.pattern.permute.xlu1 %v4649_v43  ;;  %v3613_v63 = vadd.f32 %v937_v22, %v881_v42 }
 0x557   :  { %1658 = vperm.xlu1 %2780, %v3415_v6  }
 0x558   :  { %v1063_v32 = vpop.permute.xlu1 %1062  ;;  %v3600_v61 = vpop.permute.xlu0 %805  ;;  %v1053_v52 = vmul.f32 %v3613_v63, %v3303_v62 }
 0x559   :  { %4667 = vst [vmem:[#allocation56_spill] sm:$0xff] %v3600_v61  ;;  %v1096_v61 = vrot.slane %v3152_v53, %v3083_v1  ;;  %v709_v1 = vmul.f32 0.0, %v3296_v60 }
 0x55b   :  { %2782 = vset.pattern.permute.xlu1 %v4654_v3  ;;  %v1109_v55 = vmul.f32 %v1096_v61, %v1063_v32  ;;  %v533_v32 = vmul.f32 %v525_v18, %v3520_v26  ;;  %v1281_v18 = vmul.f32 %v1268_v59, %v3462_v33 }
 0x55c   :  { %809 = vperm.xlu1 %2782, %v3378_v41  }
 0x55d   :  { %v3596_v4 = vpop.permute.xlu1 %1406  ;;  %v3610_v6 = vpop.permute.xlu0 %978 }
 0x55e   :  { %4668 = vst [vmem:[#allocation57_spill] sm:$0xff] %v3610_v6  ;;  %v526_v6 = vmul.f32 %v3286_v57, %v3378_v41  ;;  %v773_v57 = vadd.f32 %v765_v24, %v709_v1  ;;  %v938_v1 = vmul.f32 %v924_v15, %v3510_v44 }
 0x560   :  { %2784 = vset.pattern.permute.xlu1 %v4650_v47  ;;  %v882_v24 = vmul.f32 %v773_v57, %v3296_v60 }
 0x561   :  { %982 = vperm.xlu1 %2784, %v3378_v41  }
 0x562   :  { %v3608_v56 = vpop.permute.xlu1 %1750  ;;  %v3629_v42 = vpop.permute.xlu0 %1494 }
 0x563   :  { %4670 = vst [vmem:[#allocation59_spill] sm:$0xff] %v3629_v42  ;;  %v3664_v42 = vsub.s32 4, %v3016_v20 }
 0x565   :  { %2787 = vset.pattern.permute.xlu1 %v4643_v49  ;;  %4673 = vst [vmem:[#allocation62_spill] sm:$0xff] %v3664_v42 }
 0x566   :  { %v3615_v34 = vpop.permute.xlu1 %451  ;;  %1498 = vperm.xlu1 %2787, %v3378_v41  }
 0x567   :  { %745 = vperm.xlu0 %2812, %v3615_v34   ;;  %v534_v37 = vmul.f32 %v526_v6, %v3615_v34  ;;  %v3649_v19 = vpop.permute.xlu0 %1838 }
 0x568   :  { %4671 = vst [vmem:[#allocation60_spill] sm:$0xff] %v3649_v19  ;;  %v946_v19 = vadd.f32 %v938_v1, %v882_v24 }
 0x56a   :  { %v3626_v22 = vpop.permute.xlu1 %902  ;;  %2789 = vset.pattern.permute.xlu1 %v4656_v40  ;;  %v1054_v33 = vmul.f32 %v946_v19, %v3296_v60 }
 0x56b   :  { %4669 = vst [vmem:[#allocation58_spill] sm:$0xff] %v3626_v22  ;;  %1842 = vperm.xlu1 %2789, %v3378_v41   ;;  %2815 = vset.pattern.permute.xlu0 %v4653_v0  ;;  %v3639_v22 = vadd.f32 %v1109_v55, %v1053_v52  ;;  %v564_v41 = vsel %vm535_vm14, %v534_v37, 0.0  ;;  %v563_v55 = vsel %vm535_vm14, %v533_v32, 0.0 }
 0x56c   :  { %1262 = vperm.xlu0 %2815, %v3615_v34   ;;  %v565_v52 = vadd.f32 %v564_v41, %v563_v55  ;;  %v3668_v32 = vpop.permute.xlu0 %797  ;;  %v1110_v55 = vmul.f32 %v1096_v61, %v3518_v21 }
 0x56d   :  { %v1225_v6 = vmul.f32 %v3639_v22, %v3303_v62  ;;  %4674 = vst [vmem:[#allocation63_spill] sm:$0xff] %v3668_v32 }
 0x56e   :  { %v566_v44 = vrot.slane %v565_v52, 4  ;;  %v1118_v2 = vadd.f32 %v1110_v55, %v1054_v33 }
 0x56f   :  { %v3641_v46 = vpop.permute.xlu1 %1074  ;;  %2790 = vset.pattern.permute.xlu1 %v4654_v3  ;;  %v3666_v15 = vadd.f32 %v1281_v18, %v1225_v6  ;;  %v3682_v18 = vsub.s32 5, %v3016_v20 }
 0x570   :  { %801 = vperm.xlu1 %2790, %v3418_v7   ;;  %2817 = vset.pattern.permute.xlu0 %v4643_v49  ;;  %v567_v1 = vadd.f32 %v566_v44, %v565_v52  ;;  %v812_v44 = vmul.f32 %v3422_v29, %v3598_v31  ;;  %v3705_v31 = vsub.s32 6, %v3016_v20 }
 0x571   :  { %1606 = vperm.xlu0 %2817, %v3615_v34   ;;  %v1397_v24 = vmul.f32 %v3666_v15, %v3303_v62  ;;  %4676 = vst [vmem:[#allocation65_spill] sm:$0xff] %v3682_v18  ;;  %v3684_v32 = vpop.permute.xlu0 %970  ;;  %v1612_v52 = vrot.slane %v3152_v53, %v3682_v18  ;;  %v813_v18 = vmul.f32 %v3425_v8, %v773_v57 }
 0x572   :  { %4677 = vst [vmem:[#allocation66_spill] sm:$0xff] %v3684_v32  ;;  %v568_v61 = vrot.slane %v567_v1, 2 }
 0x574   :  { %v3658_v37 = vpop.permute.xlu1 %1418  ;;  %2792 = vset.pattern.permute.xlu1 %v4650_v47  ;;  %v569_v55 = vadd.f32 %v568_v61, %v567_v1  ;;  %v985_v61 = vmul.f32 %v3430_v13, %v3613_v63  ;;  %v1158_v13 = vmul.f32 %v3496_v14, %v1118_v2  ;;  %v1784_v63 = vrot.slane %v3152_v53, %v3705_v31 }
 0x575   :  { %4672 = vst [vmem:[#allocation61_spill] sm:$0xff] %v3658_v37  ;;  %974 = vperm.xlu1 %2792, %v3418_v7   ;;  %2819 = vset.pattern.permute.xlu0 %v4646_v35  ;;  %v1440_v37 = vrot.slane %v3152_v53, %v3664_v42  ;;  %v1226_v42 = vmul.f32 %v1118_v2, %v3296_v60 }
 0x577   :  { %v1453_v6 = vmul.f32 %v1440_v37, %v3596_v4  ;;  %v1454_v1 = vmul.f32 %v1440_v37, %v3528_v54  ;;  %v822_v54 = vsel %vm820_vm15, %v813_v18, 0.0 }
 0x579   :  { %v3670_v41 = vpop.permute.xlu1 %1762  ;;  %2795 = vset.pattern.permute.xlu1 %v4643_v49  ;;  %v1461_v21 = vadd.f32 %v1453_v6, %v1397_v24  ;;  %v3698_v24 = vpop.permute.xlu0 %1486  ;;  %v1625_v6 = vmul.f32 %v1612_v52, %v3470_v23  ;;  %v1157_v23 = vmul.f32 %v3352_v30, %v3639_v22 }
 0x57a   :  { %4675 = vst [vmem:[#allocation64_spill] sm:$0xff] %v3670_v41  ;;  %1490 = vperm.xlu1 %2795, %v3418_v7   ;;  %4678 = vst [vmem:[#allocation67_spill] sm:$0xff] %v3698_v24 }
 0x57b   :  { %v1569_v32 = vmul.f32 %v1461_v21, %v3303_v62  ;;  %v1165_v2 = vsel %vm820_vm15, %v1157_v23, 0.0 }
 0x57d   :  { %v3686_v41 = vpop.permute.xlu1 %443  ;;  %v1633_v8 = vadd.f32 %v1625_v6, %v1569_v32  ;;  %v1329_v6 = vmul.f32 %v3362_v36, %v3666_v15 }
 0x57e   :  { %2797 = vset.pattern.permute.xlu1 %v4656_v40  ;;  %737 = vperm.xlu0 %2819, %v3686_v41  }
 0x57f   :  { %1834 = vperm.xlu1 %2797, %v3418_v7   ;;  %v1741_v14 = vmul.f32 %v1633_v8, %v3303_v62 }
 0x581   :  { %v1239_v4 = vpop.permute.xlu1 %1238 }
 0x582   :  { %v1282_v33 = vmul.f32 %v1268_v59, %v1239_v4  ;;  %2822 = vset.pattern.permute.xlu0 %v4653_v0  ;;  %v605_v59 = vmul.f32 0.0, %v3488_v11  ;;  %v821_v4 = vsel %vm820_vm15, %v812_v44, 0.0  ;;  %v570_v11 = vrot.slane %v569_v55, 1 }
 0x583   :  { %2798 = vset.pattern.permute.xlu1 %v4646_v35  ;;  %1254 = vperm.xlu0 %2822, %v3686_v41   ;;  %v823_v22 = vadd.f32 %v822_v54, %v821_v4  ;;  %v1797_v4 = vmul.f32 %v1784_v63, %v3608_v56 }
 0x584   :  { %v1290_v29 = vadd.f32 %v1282_v33, %v1226_v42  ;;  %741 = vperm.xlu1 %2798, %v3520_v26   ;;  %v604_v42 = vmul.f32 0.0, %v3344_v25  ;;  %v986_v33 = vmul.f32 %v3433_v17, %v946_v19  ;;  %v993_v25 = vsel %vm820_vm15, %v985_v61, 0.0  ;;  %v3726_v17 = vpop.permute.xlu0 %1830 }
 0x585   :  { %4679 = vst [vmem:[#allocation68_spill] sm:$0xff] %v3726_v17  ;;  %v3739_v61 = vadd.f32 %v570_v11, %v569_v55  ;;  %v1805_v15 = vadd.f32 %v1797_v4, %v1741_v14  ;;  %v4714_v17 = vld [vmem:[#allocation62_spill] sm:$0xff] }
 0x586   :  { %v1398_v20 = vmul.f32 %v1290_v29, %v3296_v60  ;;  %v1583_v57 = vpop.permute.xlu1 %1582  ;;  %v612_v30 = vadd.f32 %v605_v59, %v604_v42  ;;  %v1330_v19 = vmul.f32 %v3504_v58, %v1290_v29  ;;  %v994_v44 = vsel %vm820_vm15, %v986_v33, 0.0 }
 0x587   :  { %2824 = vset.pattern.permute.xlu0 %v4643_v49  ;;  %v1626_v18 = vmul.f32 %v1612_v52, %v1583_v57  ;;  %v1166_v58 = vsel %vm820_vm15, %v1158_v13, 0.0  ;;  %v995_v29 = vadd.f32 %v994_v44, %v993_v25  ;;  %v824_v52 = vrot.slane %v823_v22, 4 }
 0x588   :  { %v1462_v37 = vadd.f32 %v1454_v1, %v1398_v20  ;;  %2801 = vset.pattern.permute.xlu1 %v4653_v0  ;;  %1598 = vperm.xlu0 %2824, %v3686_v41   ;;  %v1167_v23 = vadd.f32 %v1166_v58, %v1165_v2  ;;  %v1501_v20 = vmul.f32 %v3438_v27, %v1461_v21  ;;  %v1338_v36 = vsel %vm820_vm15, %v1330_v19, 0.0  ;;  %v3753_v33 = vpop.permute.xlu0 %601 }
 0x589   :  { %1258 = vperm.xlu1 %2801, %v3520_v26   ;;  %v613_v57 = vrot.slane %v612_v30, 4  ;;  %v1673_v42 = vmul.f32 %v3370_v39, %v1633_v8  ;;  %v1337_v27 = vsel %vm820_vm15, %v1329_v6, 0.0  ;;  %v996_v11 = vrot.slane %v995_v29, 4 }
 0x58a   :  { %v1570_v32 = vmul.f32 %v1462_v37, %v3296_v60  ;;  %v1502_v59 = vmul.f32 %v3441_v48, %v1462_v37  ;;  %v1798_v48 = vmul.f32 %v1784_v63, %v3536_v16  ;;  %v1339_v54 = vadd.f32 %v1338_v36, %v1337_v27 }
 0x58b   :  { %v3737_v1 = vpop.permute.xlu1 %647  ;;  %v1168_v63 = vrot.slane %v1167_v23, 4  ;;  %v1845_v39 = vmul.f32 %v3446_v9, %v1805_v15  ;;  %v614_v25 = vadd.f32 %v613_v57, %v612_v30  ;;  %v1681_v19 = vsel %vm820_vm15, %v1673_v42, 0.0 }
 0x58c   :  { %v1634_v62 = vadd.f32 %v1626_v18, %v1570_v32  ;;  %2826 = vset.pattern.permute.xlu0 %v4646_v35  ;;  %v1510_v21 = vsel %vm820_vm15, %v1502_v59, 0.0  ;;  %v997_v2 = vadd.f32 %v996_v11, %v995_v29  ;;  %v1340_v14 = vrot.slane %v1339_v54, 4 }
 0x58d   :  { %2803 = vset.pattern.permute.xlu1 %v4643_v49  ;;  %657 = vperm.xlu0 %2826, %v3739_v61   ;;  %v1169_v44 = vadd.f32 %v1168_v63, %v1167_v23  ;;  %v1853_v6 = vsel %vm820_vm15, %v1845_v39, 0.0  ;;  %v615_v59 = vrot.slane %v614_v25, 2 }
 0x58e   :  { %v1674_v55 = vmul.f32 %v3512_v5, %v1634_v62  ;;  %v1742_v56 = vmul.f32 %v1634_v62, %v3296_v60  ;;  %1602 = vperm.xlu1 %2803, %v3520_v26   ;;  %v1509_v5 = vsel %vm820_vm15, %v1501_v20, 0.0  ;;  %v825_v26 = vadd.f32 %v824_v52, %v823_v22  ;;  %v3769_v22 = vpop.permute.xlu0 %1154 }
 0x58f   :  { %v1511_v37 = vadd.f32 %v1510_v21, %v1509_v5  ;;  %4680 = vst [vmem:[#allocation69_spill] sm:$0xff] %v3769_v22  ;;  %v998_v29 = vrot.slane %v997_v2, 2  ;;  %v1341_v4 = vadd.f32 %v1340_v14, %v1339_v54  ;;  %v1170_v20 = vrot.slane %v1169_v44, 2  ;;  %v4729_v22 = vld [vmem:[#allocation27_spill] sm:$0xff] }
 0x590   :  { %v1806_v13 = vadd.f32 %v1798_v48, %v1742_v56  ;;  %v3757_v16 = vpop.permute.xlu1 %1034  ;;  %v1682_v60 = vsel %vm820_vm15, %v1674_v55, 0.0  ;;  %v616_v48 = vadd.f32 %v615_v59, %v614_v25 }
 0x591   :  { %2828 = vset.pattern.permute.xlu0 %v4650_v47  ;;  %v1683_v32 = vadd.f32 %v1682_v60, %v1681_v19  ;;  %v1512_v30 = vrot.slane %v1511_v37, 4  ;;  %v999_v56 = vadd.f32 %v998_v29, %v997_v2  ;;  %v1342_v57 = vrot.slane %v1341_v4, 2 }
 0x592   :  { %v1846_v8 = vmul.f32 %v3449_v45, %v1806_v13  ;;  %2805 = vset.pattern.permute.xlu1 %v4646_v35  ;;  %1042 = vperm.xlu0 %2828, %v3739_v61   ;;  %v826_v45 = vrot.slane %v825_v26, 2  ;;  %v3780_v15 = vpop.permute.xlu0 %1326  ;;  %v1171_v21 = vadd.f32 %v1170_v20, %v1169_v44  ;;  %v617_v54 = vrot.slane %v616_v48, 1 }
 0x593   :  { %733 = vperm.xlu1 %2805, %v3454_v38   ;;  %v1684_v62 = vrot.slane %v1683_v32, 4  ;;  %v1513_v23 = vadd.f32 %v1512_v30, %v1511_v37  ;;  %4681 = vst [vmem:[#allocation70_spill] sm:$0xff] %v3780_v15  ;;  %v1000_v5 = vrot.slane %v999_v56, 1  ;;  %v1343_v60 = vadd.f32 %v1342_v57, %v1341_v4 }
 0x594   :  { %v1854_v18 = vsel %vm820_vm15, %v1846_v8, 0.0  ;;  %v827_v52 = vadd.f32 %v826_v45, %v825_v26  ;;  %v660_v8 = vmul.f32 %v3569_v10, %v3152_v53  ;;  %v1172_v19 = vrot.slane %v1171_v21, 1 }
 0x595   :  { %v3771_v9 = vpop.permute.xlu1 %1378  ;;  %v1855_v58 = vadd.f32 %v1854_v18, %v1853_v6  ;;  %v1685_v42 = vadd.f32 %v1684_v62, %v1683_v32  ;;  %v1514_v11 = vrot.slane %v1513_v23, 2  ;;  %v618_v14 = vadd.f32 %v617_v54, %v616_v48 }
 0x596   :  { %2830 = vset.pattern.permute.xlu0 %v4645_v51  ;;  %v828_v27 = vrot.slane %v827_v52, 1  ;;  %v3790_v37 = vpop.permute.xlu0 %1670  ;;  %v1001_v45 = vadd.f32 %v1000_v5, %v999_v56  ;;  %v1344_v44 = vrot.slane %v1343_v60, 1  ;;  %v1173_v10 = vadd.f32 %v1172_v19, %v1171_v21 }
 0x597   :  { %2808 = vset.pattern.permute.xlu1 %v4653_v0  ;;  %1386 = vperm.xlu0 %2830, %v3739_v61   ;;  %v1856_v55 = vrot.slane %v1855_v58, 4  ;;  %v1686_v26 = vrot.slane %v1685_v42, 2  ;;  %4682 = vst [vmem:[#allocation71_spill] sm:$0xff] %v3790_v37  ;;  %v1515_v2 = vadd.f32 %v1514_v11, %v1513_v23  ;;  %v664_v59 = vadd.f32 %v660_v8, %v618_v14 }
 0x598   :  { %1250 = vperm.xlu1 %2808, %v3454_v38   ;;  %v829_v25 = vadd.f32 %v828_v27, %v827_v52  ;;  %v1045_v29 = vmul.f32 %v3579_v28, %v3152_v53  ;;  %v1345_v23 = vadd.f32 %v1344_v44, %v1343_v60  ;;  %v1389_v28 = vmul.f32 %v3585_v50, %v3152_v53  ;;  %v4685_v50 = vld [vmem:[#allocation55_spill] sm:$0xff] }
 0x599   :  { %v1857_v63 = vadd.f32 %v1856_v55, %v1855_v58  ;;  %v1687_v6 = vadd.f32 %v1686_v26, %v1685_v42  ;;  %v1733_v60 = vmul.f32 %v4685_v50, %v3152_v53 }
 0x59a   :  { %v3778_v36 = vpop.permute.xlu1 %1722  ;;  %v3799_v4 = vpop.permute.xlu0 %593  ;;  %v1049_v55 = vadd.f32 %v1045_v29, %v1001_v45 }
 0x59b   :  { %2832 = vset.pattern.permute.xlu0 %v4649_v43  ;;  %v1858_v18 = vrot.slane %v1857_v63, 2  ;;  %4683 = vst [vmem:[#allocation72_spill] sm:$0xff] %v3799_v4  ;;  %v1688_v48 = vrot.slane %v1687_v6, 1  ;;  %v4727_v4 = vld [vmem:[#allocation38_spill] sm:$0xff] }
 0x59c   :  { %2810 = vset.pattern.permute.xlu1 %v4643_v49  ;;  %1730 = vperm.xlu0 %2832, %v3739_v61  }
 0x59d   :  { %1594 = vperm.xlu1 %2810, %v3454_v38   ;;  %v1859_v20 = vadd.f32 %v1858_v18, %v1857_v63  ;;  %v1689_v54 = vadd.f32 %v1688_v48, %v1687_v6 }
 0x59e   :  { %v3810_v5 = vpop.permute.xlu0 %1146 }
 0x59f   :  { %v859_v13 = vpop.permute.xlu1 %858  ;;  %v1860_v11 = vrot.slane %v1859_v20, 1  ;;  %4684 = vst [vmem:[#allocation73_spill] sm:$0xff] %v3810_v5 }
 0x5a0   :  { %v873_v39 = vmul.f32 %v859_v13, %v3152_v53  ;;  %2833 = vset.pattern.permute.xlu0 %v4656_v40  ;;  %v1393_v13 = vadd.f32 %v1389_v28, %v1345_v23 }
 0x5a1   :  { %2813 = vset.pattern.permute.xlu1 %v4654_v3  ;;  %1894 = vperm.xlu0 %2833, %v3328_v12   ;;  %v1516_v12 = vrot.slane %v1515_v2, 1 }
 0x5a2   :  { %918 = vperm.xlu1 %2813, %v3615_v34   ;;  %v877_v32 = vadd.f32 %v873_v39, %v829_v25  ;;  %v1861_v25 = vadd.f32 %v1860_v11, %v1859_v20  ;;  %v3820_v18 = vpop.permute.xlu0 %1318 }
 0x5a3   :  { %v1517_v42 = vadd.f32 %v1516_v12, %v1515_v2  ;;  %v1737_v2 = vadd.f32 %v1733_v60, %v1689_v54  ;;  %4686 = vst [vmem:[#allocation55_spill] sm:$0xff] %v3820_v18  ;;  %v4697_v54 = vld [vmem:[#allocation5_spill] sm:$0xff] }
 0x5a4   :  { %v1203_v30 = vpop.permute.xlu1 %1202  ;;  %v1913_v62 = vsel %vm129_vm2, %v664_v59, %v877_v32  ;;  %v4718_v18 = vld [vmem:[#allocation61_spill] sm:$0xff] }
 0x5a5   :  { %v1217_v58 = vmul.f32 %v1203_v30, %v3152_v53  ;;  %v1918_v57 = vsel %vm1917_vm5, %v1913_v62, %v1049_v55 }
 0x5a6   :  { %2814 = vset.pattern.permute.xlu1 %v4650_v47 }
 0x5a7   :  { %v1221_v52 = vadd.f32 %v1217_v58, %v1173_v10  ;;  %1090 = vperm.xlu1 %2814, %v3615_v34   ;;  %v4688_v10 = vld [vmem:[#allocation37_spill] sm:$0xff] }
 0x5a8   :  { %v4689_v58 = vld [vmem:[#allocation17_spill] sm:$0xff] }
 0x5a9   :  { %v1547_v56 = vpop.permute.xlu1 %1546  ;;  %v1923_v21 = vsel %vm1922_vm6, %v1918_v57, %v1221_v52  ;;  %v3836_v52 = vpop.permute.xlu0 %1662  ;;  %v4695_v57 = vld [vmem:[#allocation24_spill] sm:$0xff] }
 0x5aa   :  { %v1561_v27 = vmul.f32 %v1547_v56, %v3152_v53  ;;  %v1928_v26 = vsel %vm1927_vm8, %v1923_v21, %v1393_v13  ;;  %4692 = vst [vmem:[#allocation17_spill] sm:$0xff] %v3836_v52 }
 0x5ab   :  { %2816 = vset.pattern.permute.xlu1 %v4645_v51 }
 0x5ac   :  { %v1565_v63 = vadd.f32 %v1561_v27, %v1517_v42  ;;  %1434 = vperm.xlu1 %2816, %v3615_v34   ;;  %v3855_v42 = vunpack.i.l.bf16 %v4695_v57 }
 0x5ad   :  { %v3847_v56 = vpop.permute.xlu0 %914 }
 0x5ae   :  { %v1891_v39 = vpop.permute.xlu1 %1890  ;;  %v1933_v8 = vsel %vm1932_vm9, %v1928_v26, %v1565_v63  ;;  %v755_v13 = vrot.slane %v3855_v42, %v4697_v54  ;;  %v4698_v63 = vld [vmem:[#allocation45_spill] sm:$0xff] }
 0x5af   :  { %v1905_v19 = vmul.f32 %v1891_v39, %v3152_v53  ;;  %v1938_v32 = vsel %vm1937_vm11, %v1933_v8, %v1737_v2  ;;  %v4687_v53 = vld [vmem:[#allocation16_spill] sm:$0xff]  ;;  %v4699_v39 = vld [vmem:[#allocation41_spill] sm:$0xff]  ;;  %v4702_v2 = vld [vmem:[#allocation18_spill] sm:$0xff] }
 0x5b0   :  { %2818 = vset.pattern.permute.xlu1 %v4649_v43  ;;  %v524_v30 = vmul.f32 %v4687_v53, %v3418_v7  ;;  %v766_v50 = vmul.f32 %v755_v13, %v4698_v63  ;;  %v767_v8 = vmul.f32 %v755_v13, %v4699_v39  ;;  %v4703_v53 = vld [vmem:[#allocation6_spill] sm:$0xff] }
 0x5b1   :  { %v1909_v14 = vadd.f32 %v1905_v19, %v1861_v25  ;;  %1778 = vperm.xlu1 %2818, %v3615_v34   ;;  %v523_v34 = vmul.f32 %v4689_v58, %v4688_v10  ;;  %v3857_v27 = vpop.permute.xlu0 %1086  ;;  %v4705_v58 = vld [vmem:[#allocation58_spill] sm:$0xff] }
 0x5b2   :  { %v532_v29 = vmul.f32 %v524_v30, %v3686_v41  ;;  %v928_v30 = vrot.slane %v3855_v42, %v4703_v53 }
 0x5b3   :  { %v1943_v45 = vsel %vm1942_vm10, %v1938_v32, %v1909_v14  ;;  %v3823_v44 = vpop.permute.xlu1 %597  ;;  %v531_v20 = vmul.f32 %v523_v34, %v3454_v38  ;;  %v711_v14 = vmul.f32 0.0, %v4702_v2 }
 0x5b4   :  { %v1947_v6 = vpack.c.bf16 %v1943_v45, %v1943_v45  ;;  %v555_v7 = vsel %vm535_vm14, %v532_v29, 0.0  ;;  %v940_v34 = vmul.f32 %v928_v30, %v4705_v58 }
 0x5b5   :  { %2820 = vset.pattern.permute.xlu1 %v4654_v3  ;;  %v554_v48 = vsel %vm535_vm14, %v531_v20, 0.0  ;;  %v3867_v26 = vpop.permute.xlu0 %1430  ;;  %v4706_v20 = vld [vmem:[#allocation46_spill] sm:$0xff] }
 0x5b6   :  { %910 = vperm.xlu1 %2820, %v3686_v41   ;;  %v1951_v59 = vunpack.c.l.bf16 %v1947_v6  ;;  %v556_v55 = vadd.f32 %v555_v7, %v554_v48  ;;  %v3878_v6 = vadd.f32 %v767_v8, %v711_v14  ;;  %v939_v7 = vmul.f32 %v928_v30, %v4706_v20  ;;  %v4709_v30 = vld [vmem:[#allocation47_spill] sm:$0xff] }
 0x5b8   :  { %v3832_v12 = vpop.permute.xlu1 %1150  ;;  %v3834_v62 = vmul.f32 0.125, %v1951_v59  ;;  %v557_v28 = vrot.slane %v556_v55, 4  ;;  %v815_v15 = vmul.f32 %v4727_v4, %v3878_v6  ;;  %v1788_v4 = vrot.slane %v3855_v42, %v3705_v31 }
 0x5b9   :  { %4690 = vst [vmem:[#allocation16_spill] sm:$0xff] %v3832_v12  ;;  %v3882_v59 = vpop.permute.xlu0 %1774 }
 0x5ba   :  { %4691 = vst [vmem:[#allocation37_spill] sm:$0xff] %v3834_v62  ;;  %2821 = vset.pattern.permute.xlu1 %v4650_v47  ;;  %1963 = vrot.lane.b32.xlu0 %v3834_v62, %s2929_s7  ;;  %v558_v21 = vadd.f32 %v557_v28, %v556_v55  ;;  %v884_v55 = vmul.f32 %v3878_v6, %v4702_v2 }
 0x5bb   :  { %1082 = vperm.xlu1 %2821, %v3686_v41  }
 0x5bc   :  { %v559_v60 = vrot.slane %v558_v21, 2  ;;  %v948_v28 = vadd.f32 %v940_v34, %v884_v55 }
 0x5bd   :  { %v3844_v23 = vpop.permute.xlu1 %1322  ;;  %v3896_v63 = vpop.permute.xlu0 %906 }
 0x5be   :  { %4693 = vst [vmem:[#allocation74_spill] sm:$0xff] %v3844_v23  ;;  %v560_v45 = vadd.f32 %v559_v60, %v558_v21  ;;  %v4708_v60 = vld [vmem:[#allocation9_spill] sm:$0xff]  ;;  %v1056_v8 = vmul.f32 %v948_v28, %v4702_v2 }
 0x5bf   :  { %2823 = vset.pattern.permute.xlu1 %v4645_v51  ;;  %v1100_v39 = vrot.slane %v3855_v42, %v4708_v60 }
 0x5c0   :  { %1426 = vperm.xlu1 %2823, %v3686_v41   ;;  %v561_v48 = vrot.slane %v560_v45, 1 }
 0x5c1   :  { %v1111_v58 = vmul.f32 %v1100_v39, %v4709_v30 }
 0x5c2   :  { %v3851_v38 = vpop.permute.xlu1 %1666 }
 0x5c3   :  { %4694 = vst [vmem:[#allocation75_spill] sm:$0xff] %v3851_v38 }
 0x5c4   :  { %2825 = vset.pattern.permute.xlu1 %v4649_v43 }
 0x5c5   :  { %1770 = vperm.xlu1 %2825, %v3686_v41   ;;  %v4701_v41 = vld [vmem:[#allocation19_spill] sm:$0xff] }
 0x5c6   :  { %v710_v19 = vmul.f32 0.0, %v4701_v41 }
 0x5c7   :  { %v3860_v11 = vpop.permute.xlu1 %589 }
 0x5c8   :  { %4696 = vst [vmem:[#allocation24_spill] sm:$0xff] %v3860_v11  ;;  %v3875_v32 = vadd.f32 %v766_v50, %v710_v19  ;;  %v3898_v50 = vadd.f32 %v561_v48, %v560_v45  ;;  %v1112_v19 = vmul.f32 %v1100_v39, %v3641_v46  ;;  %v4711_v39 = vld [vmem:[#allocation49_spill] sm:$0xff] }
 0x5c9   :  { %2827 = vset.pattern.permute.xlu1 %v4654_v3 }
 0x5ca   :  { %870 = vperm.xlu1 %2827, %v3739_v61   ;;  %v883_v29 = vmul.f32 %v3875_v32, %v4701_v41  ;;  %v1120_v45 = vadd.f32 %v1112_v19, %v1056_v8 }
 0x5cc   :  { %v3870_v25 = vpop.permute.xlu1 %1142  ;;  %v947_v13 = vadd.f32 %v939_v7, %v883_v29  ;;  %v3910_v29 = vpop.permute.xlu0 %1078  ;;  %v4710_v7 = vld [vmem:[#allocation10_spill] sm:$0xff]  ;;  %v1228_v46 = vmul.f32 %v1120_v45, %v4702_v2 }
 0x5cd   :  { %4700 = vst [vmem:[#allocation45_spill] sm:$0xff] %v3870_v25  ;;  %v1272_v48 = vrot.slane %v3855_v42, %v4710_v7  ;;  %v4723_v25 = vld [vmem:[#allocation44_spill] sm:$0xff] }
 0x5ce   :  { %2829 = vset.pattern.permute.xlu1 %v4653_v0  ;;  %v1055_v14 = vmul.f32 %v947_v13, %v4701_v41 }
 0x5cf   :  { %1214 = vperm.xlu1 %2829, %v3739_v61   ;;  %v1283_v30 = vmul.f32 %v1272_v48, %v4711_v39 }
 0x5d0   :  { %v3922_v62 = vpop.permute.xlu0 %1422 }
 0x5d1   :  { %v3884_v10 = vpop.permute.xlu1 %1314 }
 0x5d2   :  { %4704 = vst [vmem:[#allocation41_spill] sm:$0xff] %v3884_v10  ;;  %v4719_v10 = vld [vmem:[#allocation65_spill] sm:$0xff] }
 0x5d3   :  { %2831 = vset.pattern.permute.xlu1 %v4643_v49  ;;  %v1616_v5 = vrot.slane %v3855_v42, %v4719_v10 }
 0x5d4   :  { %1558 = vperm.xlu1 %2831, %v3739_v61   ;;  %v3932_v52 = vpop.permute.xlu0 %1766 }
 0x5d5   :  { %4715 = vst [vmem:[#allocation58_spill] sm:$0xff] %v3932_v52  ;;  %v1628_v37 = vmul.f32 %v1616_v5, %v4723_v25  ;;  %v4731_v25 = vld [vmem:[#allocation28_spill] sm:$0xff] }
 0x5d6   :  { %v3894_v21 = vpop.permute.xlu1 %1658 }
 0x5d7   :  { %4707 = vst [vmem:[#allocation19_spill] sm:$0xff] %v3894_v21 }
 0x5d8   :  { %2834 = vset.pattern.permute.xlu1 %v4646_v35  ;;  %v1119_v35 = vadd.f32 %v1111_v58, %v1055_v14 }
 0x5d9   :  { %652 = vperm.xlu1 %2834, %v3898_v50  }
 0x5da   :  { %v1227_v55 = vmul.f32 %v1119_v35, %v4701_v41 }
 0x5db   :  { %v3908_v34 = vpop.permute.xlu1 %809 }
 0x5dc   :  { %v1291_v58 = vadd.f32 %v1283_v30, %v1227_v55 }
 0x5dd   :  { %2835 = vset.pattern.permute.xlu1 %v4654_v3  ;;  %v4712_v3 = vld [vmem:[#allocation43_spill] sm:$0xff] }
 0x5de   :  { %866 = vperm.xlu1 %2835, %v3898_v50   ;;  %v1284_v8 = vmul.f32 %v1272_v48, %v4712_v3  ;;  %v1399_v24 = vmul.f32 %v1291_v58, %v4701_v41  ;;  %v4717_v48 = vld [vmem:[#allocation51_spill] sm:$0xff] }
 0x5e0   :  { %v3914_v20 = vpop.permute.xlu1 %982  ;;  %v1292_v14 = vadd.f32 %v1284_v8, %v1228_v46 }
 0x5e2   :  { %2836 = vset.pattern.permute.xlu1 %v4650_v47  ;;  %v1444_v47 = vrot.slane %v3855_v42, %v4714_v17  ;;  %v1400_v39 = vmul.f32 %v1292_v14, %v4702_v2 }
 0x5e3   :  { %1038 = vperm.xlu1 %2836, %v3898_v50  }
 0x5e4   :  { %v1455_v3 = vmul.f32 %v1444_v47, %v4717_v48  ;;  %v1456_v46 = vmul.f32 %v1444_v47, %v4718_v18 }
 0x5e5   :  { %v3926_v19 = vpop.permute.xlu1 %1498 }
 0x5e6   :  { %4713 = vst [vmem:[#allocation18_spill] sm:$0xff] %v3926_v19  ;;  %v1464_v55 = vadd.f32 %v1456_v46, %v1400_v39  ;;  %v1463_v30 = vadd.f32 %v1455_v3, %v1399_v24  ;;  %v4721_v39 = vld [vmem:[#allocation53_spill] sm:$0xff]  ;;  %v611_v3 = vmul.f32 0.0, %v3753_v33  ;;  %v4726_v19 = vld [vmem:[#allocation30_spill] sm:$0xff] }
 0x5e7   :  { %2837 = vset.pattern.permute.xlu1 %v4653_v0  ;;  %v3941_v0 = vpop.permute.xlu0 %745  ;;  %v1627_v24 = vmul.f32 %v1616_v5, %v4721_v39  ;;  %v607_v11 = vmul.f32 0.0, %v4726_v19  ;;  %v987_v39 = vmul.f32 %v4729_v22, %v947_v13  ;;  %v4730_v33 = vld [vmem:[#allocation26_spill] sm:$0xff] }
 0x5e8   :  { %1210 = vperm.xlu1 %2837, %v3898_v50   ;;  %v1572_v48 = vmul.f32 %v1464_v55, %v4702_v2  ;;  %v1571_v47 = vmul.f32 %v1463_v30, %v4701_v41 }
 0x5ea   :  { %v3935_v21 = vpop.permute.xlu1 %1842  ;;  %v1636_v52 = vadd.f32 %v1628_v37, %v1572_v48 }
 0x5eb   :  { %4716 = vst [vmem:[#allocation46_spill] sm:$0xff] %v3935_v21  ;;  %v610_v21 = vmul.f32 0.0, %v3823_v44  ;;  %v3957_v46 = vpop.permute.xlu0 %1262  ;;  %v4724_v44 = vld [vmem:[#allocation39_spill] sm:$0xff] }
 0x5ec   :  { %2838 = vset.pattern.permute.xlu1 %v4645_v51  ;;  %v4720_v51 = vld [vmem:[#allocation25_spill] sm:$0xff]  ;;  %4722 = vst [vmem:[#allocation9_spill] sm:$0xff] %v3957_v46  ;;  %v988_v38 = vmul.f32 %v4724_v44, %v948_v28  ;;  %v606_v46 = vmul.f32 0.0, %v4730_v33  ;;  %v1159_v28 = vmul.f32 %v4731_v25, %v1119_v35  ;;  %v1635_v44 = vadd.f32 %v1627_v24, %v1571_v47  ;;  %v4735_v47 = vld [vmem:[#allocation34_spill] sm:$0xff] }
 0x5ed   :  { %1382 = vperm.xlu1 %2838, %v3898_v50   ;;  %v814_v18 = vmul.f32 %v4720_v51, %v3875_v32  ;;  %v4728_v32 = vld [vmem:[#allocation32_spill] sm:$0xff]  ;;  %v633_v23 = vadd.f32 %v611_v3, %v610_v21  ;;  %v4732_v21 = vld [vmem:[#allocation15_spill] sm:$0xff]  ;;  %v1332_v24 = vmul.f32 %v4735_v47, %v1292_v14  ;;  %v4738_v33 = vld [vmem:[#allocation29_spill] sm:$0xff] }
 0x5ee   :  { %v1160_v51 = vmul.f32 %v4728_v32, %v1120_v45  ;;  %v1003_v6 = vsel %vm820_vm15, %v988_v38, 0.0  ;;  %v3978_v22 = vrot.slane %v4732_v21, %v4697_v54  ;;  %v619_v37 = vadd.f32 %v607_v11, %v606_v46  ;;  %v4736_v46 = vld [vmem:[#allocation54_spill] sm:$0xff]  ;;  %v4740_v14 = vld [vmem:[#allocation40_spill] sm:$0xff] }
 0x5ef   :  { %v3944_v8 = vpop.permute.xlu1 %801  ;;  %v830_v5 = vsel %vm820_vm15, %v814_v18, 0.0  ;;  %v634_v45 = vrot.slane %v633_v23, 4  ;;  %v1002_v18 = vsel %vm820_vm15, %v987_v39, 0.0  ;;  %v1744_v38 = vmul.f32 %v1636_v52, %v4702_v2  ;;  %v4739_v39 = vld [vmem:[#allocation64_spill] sm:$0xff] }
 0x5f0   :  { %v1175_v13 = vsel %vm820_vm15, %v1160_v51, 0.0  ;;  %v3982_v19 = vpop.permute.xlu0 %1606  ;;  %v1174_v3 = vsel %vm820_vm15, %v1159_v28, 0.0  ;;  %v1743_v11 = vmul.f32 %v1635_v44, %v4701_v41  ;;  %v1004_v32 = vadd.f32 %v1003_v6, %v1002_v18  ;;  %v4741_v41 = vld [vmem:[#allocation20_spill] sm:$0xff] }
 0x5f1   :  { %2839 = vset.pattern.permute.xlu1 %v4643_v49  ;;  %4733 = vst [vmem:[#allocation10_spill] sm:$0xff] %v3982_v19  ;;  %v3994_v51 = vunpack.i.h.bf16 %v4695_v57  ;;  %v1176_v25 = vadd.f32 %v1175_v13, %v1174_v3  ;;  %v620_v2 = vrot.slane %v619_v37, 4  ;;  %v1504_v28 = vmul.f32 %v4740_v14, %v1464_v55 }
 0x5f2   :  { %1554 = vperm.xlu1 %2839, %v3898_v50   ;;  %v635_v47 = vadd.f32 %v634_v45, %v633_v23  ;;  %v1005_v3 = vrot.slane %v1004_v32, 4 }
 0x5f3   :  { %4737 = vst [vmem:[#allocation43_spill] sm:$0xff] %v3994_v51  ;;  %v1177_v23 = vrot.slane %v1176_v25, 4  ;;  %v4010_v45 = vrot.slane %v3994_v51, %v4697_v54 }
 0x5f4   :  { %v3961_v49 = vpop.permute.xlu1 %974 }
 0x5f5   :  { %4725 = vst [vmem:[#allocation47_spill] sm:$0xff] %v3961_v49 }
 0x5f6   :  { %2840 = vset.pattern.permute.xlu1 %v4649_v43  ;;  %v831_v43 = vsel %vm820_vm15, %v815_v15, 0.0  ;;  %v1799_v15 = vmul.f32 %v1788_v4, %v4736_v46 }
 0x5f7   :  { %1726 = vperm.xlu1 %2840, %v3898_v50   ;;  %v832_v48 = vadd.f32 %v831_v43, %v830_v5  ;;  %v1331_v5 = vmul.f32 %v4738_v33, %v1291_v58  ;;  %v1800_v43 = vmul.f32 %v1788_v4, %v4739_v39  ;;  %v4743_v58 = vld [vmem:[#allocation31_spill] sm:$0xff] }
 0x5f8   :  { %v1503_v13 = vmul.f32 %v4743_v58, %v1463_v30  ;;  %v1807_v4 = vadd.f32 %v1799_v15, %v1743_v11  ;;  %v636_v11 = vrot.slane %v635_v47, 2  ;;  %v621_v15 = vadd.f32 %v620_v2, %v619_v37  ;;  %v4751_v37 = vld [vmem:[#allocation23_spill] sm:$0xff] }
 0x5f9   :  { %v3984_v35 = vpop.permute.xlu1 %1490  ;;  %v833_v6 = vrot.slane %v832_v48, 4  ;;  %v1808_v18 = vadd.f32 %v1800_v43, %v1744_v38  ;;  %v1346_v55 = vsel %vm820_vm15, %v1331_v5, 0.0  ;;  %v1519_v43 = vsel %vm820_vm15, %v1504_v28, 0.0 }
 0x5fa   :  { %4734 = vst [vmem:[#allocation49_spill] sm:$0xff] %v3984_v35  ;;  %v713_v35 = vmul.f32 0.0, %v4741_v41 }
 0x5fb   :  { %2841 = vset.pattern.permute.xlu1 %v4656_v40  ;;  %v1347_v40 = vsel %vm820_vm15, %v1332_v24, 0.0  ;;  %v4746_v24 = vld [vmem:[#allocation33_spill] sm:$0xff]  ;;  %v834_v14 = vadd.f32 %v833_v6, %v832_v48  ;;  %v714_v48 = vmul.f32 0.0, %v4751_v37 }
 0x5fc   :  { %1898 = vperm.xlu1 %2841, %v3898_v50   ;;  %v4744_v50 = vld [vmem:[#allocation36_spill] sm:$0xff]  ;;  %v1675_v38 = vmul.f32 %v4746_v24, %v1635_v44  ;;  %v1348_v30 = vadd.f32 %v1347_v40, %v1346_v55  ;;  %v1178_v40 = vadd.f32 %v1177_v23, %v1176_v25  ;;  %v622_v24 = vrot.slane %v621_v15, 2 }
 0x5fd   :  { %v738_v46 = vpop.permute.xlu0 %737  ;;  %v1676_v33 = vmul.f32 %v4744_v50, %v1636_v52  ;;  %v4747_v52 = vld [vmem:[#allocation42_spill] sm:$0xff]  ;;  %v1006_v50 = vadd.f32 %v1005_v3, %v1004_v32  ;;  %v835_v25 = vrot.slane %v834_v14, 2 }
 0x5fe   :  { %v769_v57 = vmul.f32 %v3978_v22, %v738_v46  ;;  %v4003_v49 = vpop.permute.xlu1 %1834  ;;  %v1848_v46 = vmul.f32 %v4747_v52, %v1808_v18  ;;  %v1690_v6 = vsel %vm820_vm15, %v1675_v38, 0.0  ;;  %v4032_v18 = vrot.slane %v3994_v51, %v4703_v53 }
 0x5ff   :  { %4742 = vst [vmem:[#allocation62_spill] sm:$0xff] %v4003_v49  ;;  %v1691_v44 = vsel %vm820_vm15, %v1676_v33, 0.0  ;;  %v1007_v23 = vrot.slane %v1006_v50, 2  ;;  %v1179_v52 = vrot.slane %v1178_v40, 2  ;;  %v4060_v49 = vrot.slane %v3994_v51, %v4714_v17 }
 0x600   :  { %v4012_v39 = vadd.f32 %v769_v57, %v713_v35  ;;  %1902 = vperm.xlu1 %2841, %v3739_v61   ;;  %v1518_v35 = vsel %vm820_vm15, %v1503_v13, 0.0  ;;  %v4750_v57 = vld [vmem:[#allocation35_spill] sm:$0xff]  ;;  %v637_v13 = vadd.f32 %v636_v11, %v635_v47  ;;  %v1692_v33 = vadd.f32 %v1691_v44, %v1690_v6 }
 0x601   :  { %v1847_v61 = vmul.f32 %v4750_v57, %v1807_v4  ;;  %v1520_v55 = vadd.f32 %v1519_v43, %v1518_v35  ;;  %v1863_v4 = vsel %vm820_vm15, %v1848_v46, 0.0  ;;  %v4040_v43 = vrot.slane %v4732_v21, %v4703_v53 }
 0x602   :  { %4745 = vst [vmem:[#allocation51_spill] sm:$0xff] %v4012_v39  ;;  %v4020_v5 = vmul.f32 %v3944_v8, %v4012_v39  ;;  %v4022_v58 = vpop.permute.xlu0 %1254  ;;  %v1349_v8 = vrot.slane %v1348_v30, 4  ;;  %v943_v47 = vmul.f32 %v4032_v18, %v3847_v56  ;;  %v4054_v6 = vrot.slane %v3994_v51, %v4708_v60 }
 0x603   :  { %4749 = vst [vmem:[#allocation65_spill] sm:$0xff] %v4022_v58  ;;  %v742_v28 = vpop.permute.xlu1 %741  ;;  %v1862_v3 = vsel %vm820_vm15, %v1847_v61, 0.0  ;;  %v1521_v35 = vrot.slane %v1520_v55, 4  ;;  %v4050_v61 = vrot.slane %v4732_v21, %v4708_v60  ;;  %v836_v56 = vadd.f32 %v835_v25, %v834_v14 }
 0x604   :  { %4748 = vst [vmem:[#allocation61_spill] sm:$0xff] %v4020_v5  ;;  %v770_v2 = vmul.f32 %v4010_v45, %v742_v28  ;;  %v1864_v57 = vadd.f32 %v1863_v4, %v1862_v3  ;;  %v1350_v44 = vadd.f32 %v1349_v8, %v1348_v30  ;;  %v638_v28 = vrot.slane %v637_v13, 1  ;;  %4753 = vst [vmem:[#allocation53_spill] sm:$0xff] %v4054_v6 }
 0x605   :  { %v1008_v54 = vadd.f32 %v1007_v23, %v1006_v50  ;;  %v4064_v30 = vrot.slane %v3994_v51, %v3705_v31  ;;  %v1180_v8 = vadd.f32 %v1179_v52, %v1178_v40  ;;  %v1522_v4 = vadd.f32 %v1521_v35, %v1520_v55 }
 0x606   :  { %v4035_v32 = vadd.f32 %v770_v2, %v714_v48  ;;  %v623_v48 = vadd.f32 %v622_v24, %v621_v15  ;;  %v1693_v2 = vrot.slane %v1692_v33, 4  ;;  %v1115_v15 = vmul.f32 %v4054_v6, %v3857_v27  ;;  %v4759_v6 = vld [vmem:[#allocation48_spill] sm:$0xff] }
 0x607   :  { %v4042_v38 = vpop.permute.xlu0 %1598  ;;  %v1351_v3 = vrot.slane %v1350_v44, 2  ;;  %v639_v14 = vadd.f32 %v638_v28, %v637_v13  ;;  %v1865_v23 = vrot.slane %v1864_v57, 4  ;;  %v837_v55 = vrot.slane %v836_v56, 1  ;;  %v4756_v13 = vld [vmem:[#allocation21_spill] sm:$0xff] }
 0x608   :  { %4752 = vst [vmem:[#allocation25_spill] sm:$0xff] %v4042_v38  ;;  %v887_v11 = vmul.f32 %v4035_v32, %v4751_v37  ;;  %v1259_v46 = vpop.permute.xlu1 %1258  ;;  %v4073_v38 = vrot.slane %v3994_v51, %v4710_v7  ;;  %v4079_v27 = vrot.slane %v3994_v51, %v4719_v10  ;;  %v712_v35 = vmul.f32 0.0, %v4756_v13 }
 0x609   :  { %v1523_v28 = vrot.slane %v1522_v4, 2  ;;  %v1181_v5 = vrot.slane %v1180_v8, 1  ;;  %v1352_v58 = vadd.f32 %v1351_v3, %v1350_v44  ;;  %v1866_v41 = vadd.f32 %v1865_v23, %v1864_v57 }
 0x60a   :  { %v4056_v53 = vadd.f32 %v943_v47, %v887_v11  ;;  %v624_v47 = vrot.slane %v623_v48, 1  ;;  %v1694_v11 = vadd.f32 %v1693_v2, %v1692_v33  ;;  %v1287_v2 = vmul.f32 %v4073_v38, %v1259_v46 }
 0x60b   :  { %v838_v12 = vadd.f32 %v837_v55, %v836_v56  ;;  %v1046_v46 = vmul.f32 %v3855_v42, %v3757_v16  ;;  %v1524_v3 = vadd.f32 %v1523_v28, %v1522_v4  ;;  %v1459_v57 = vmul.f32 %v4060_v49, %v3867_v26  ;;  %v4760_v55 = vld [vmem:[#allocation50_spill] sm:$0xff] }
 0x60c   :  { %v1059_v60 = vmul.f32 %v4056_v53, %v4751_v37  ;;  %v658_v24 = vpop.permute.xlu0 %657  ;;  %v1353_v23 = vrot.slane %v1352_v58, 1  ;;  %v1867_v56 = vrot.slane %v1866_v41, 2  ;;  %v1390_v26 = vmul.f32 %v3855_v42, %v3771_v9 }
 0x60d   :  { %v663_v50 = vmul.f32 %v3994_v51, %v658_v24  ;;  %v1603_v25 = vpop.permute.xlu1 %1602  ;;  %v1009_v24 = vrot.slane %v1008_v54, 1  ;;  %v625_v51 = vadd.f32 %v624_v47, %v623_v48  ;;  %v1182_v48 = vadd.f32 %v1181_v5, %v1180_v8 }
 0x60e   :  { %v4075_v40 = vadd.f32 %v1115_v15, %v1059_v60  ;;  %v4757_v15 = vld [vmem:[#allocation22_spill] sm:$0xff] }
 0x60f   :  { %v4081_v52 = vadd.f32 %v663_v50, %v639_v14  ;;  %v715_v60 = vmul.f32 0.0, %v4757_v15  ;;  %v661_v14 = vmul.f32 %v3855_v42, %v3737_v1  ;;  %v1695_v50 = vrot.slane %v1694_v11, 2 }
 0x610   :  { %4754 = vst [vmem:[#allocation44_spill] sm:$0xff] %v4075_v40  ;;  %v1231_v33 = vmul.f32 %v4075_v40, %v4751_v37  ;;  %v874_v40 = vmul.f32 %v3855_v42, %v4759_v6  ;;  %v1218_v6 = vmul.f32 %v3855_v42, %v4760_v55 }
 0x611   :  { %4755 = vst [vmem:[#allocation39_spill] sm:$0xff] %v4081_v52  ;;  %v4088_v39 = vpop.permute.xlu0 %1042  ;;  %v1696_v16 = vadd.f32 %v1695_v50, %v1694_v11  ;;  %v1631_v11 = vmul.f32 %v4079_v27, %v1603_v25 }
 0x612   :  { %4758 = vst [vmem:[#allocation30_spill] sm:$0xff] %v4088_v39  ;;  %v4092_v52 = vadd.f32 %v1287_v2, %v1231_v33  ;;  %v734_v19 = vpop.permute.xlu1 %733  ;;  %v1010_v39 = vadd.f32 %v1009_v24, %v1008_v54  ;;  %v665_v33 = vadd.f32 %v661_v14, %v625_v51  ;;  %v878_v4 = vadd.f32 %v874_v40, %v838_v12 }
 0x613   :  { %v768_v44 = vmul.f32 %v3978_v22, %v734_v19  ;;  %v941_v19 = vmul.f32 %v4040_v43, %v3896_v63  ;;  %v1222_v28 = vadd.f32 %v1218_v6, %v1182_v48  ;;  %v1354_v24 = vadd.f32 %v1353_v23, %v1352_v58  ;;  %v4761_v48 = vld [vmem:[#allocation52_spill] sm:$0xff] }
 0x614   :  { %v1403_v1 = vmul.f32 %v4092_v52, %v4751_v37  ;;  %v1050_v54 = vadd.f32 %v1046_v46, %v1010_v39  ;;  %v1868_v14 = vadd.f32 %v1867_v56, %v1866_v41  ;;  %v1914_v9 = vsel %vm129_vm2, %v665_v33, %v878_v4  ;;  %v4762_v4 = vld [vmem:[#allocation56_spill] sm:$0xff] }
 0x615   :  { %v4103_v47 = vadd.f32 %v768_v44, %v712_v35  ;;  %v1525_v35 = vrot.slane %v1524_v3, 1  ;;  %v1697_v50 = vrot.slane %v1696_v16, 1  ;;  %v771_v63 = vmul.f32 %v4010_v45, %v3941_v0 }
 0x616   :  { %v4107_v2 = vadd.f32 %v1459_v57, %v1403_v1  ;;  %v4109_v22 = vpop.permute.xlu0 %1386  ;;  %v1919_v12 = vsel %vm1917_vm5, %v1914_v9, %v1050_v54  ;;  %v1394_v40 = vadd.f32 %v1390_v26, %v1354_v24  ;;  %v1113_v44 = vmul.f32 %v4050_v61, %v3910_v29 }
 0x617   :  { %v885_v5 = vmul.f32 %v4103_v47, %v4756_v13  ;;  %v1251_v8 = vpop.permute.xlu1 %1250  ;;  %v1526_v41 = vadd.f32 %v1525_v35, %v1524_v3  ;;  %v1734_v57 = vmul.f32 %v3855_v42, %v3778_v36  ;;  %v1803_v0 = vmul.f32 %v4064_v30, %v3882_v59 }
 0x618   :  { %v1575_v51 = vmul.f32 %v4107_v2, %v4751_v37  ;;  %v1562_v23 = vmul.f32 %v3855_v42, %v4761_v48  ;;  %v4144_v29 = vrot.slane %v4732_v21, %v4710_v7  ;;  %v1869_v3 = vrot.slane %v1868_v14, 1 }
 0x619   :  { %v4120_v39 = vadd.f32 %v941_v19, %v885_v5  ;;  %v1924_v55 = vsel %vm1922_vm6, %v1919_v12, %v1222_v28  ;;  %v1698_v36 = vadd.f32 %v1697_v50, %v1696_v16  ;;  %v779_v6 = vadd.f32 %v771_v63, %v715_v60 }
 0x61a   :  { %v4125_v46 = vadd.f32 %v1631_v11, %v1575_v51  ;;  %v1929_v59 = vsel %vm1927_vm8, %v1924_v55, %v1394_v40  ;;  %v1285_v54 = vmul.f32 %v4144_v29, %v1251_v8  ;;  %v1566_v26 = vadd.f32 %v1562_v23, %v1526_v41 }
 0x61b   :  { %v1057_v58 = vmul.f32 %v4120_v39, %v4756_v13  ;;  %v4132_v25 = vpop.permute.xlu0 %1730  ;;  %v1738_v19 = vadd.f32 %v1734_v57, %v1698_v36  ;;  %v4157_v7 = vrot.slane %v4732_v21, %v4714_v17  ;;  %v818_v16 = vmul.f32 %v4762_v4, %v4035_v32 }
 0x61c   :  { %v1747_v45 = vmul.f32 %v4125_v46, %v4751_v37  ;;  %v1595_v1 = vpop.permute.xlu1 %1594  ;;  %v1870_v35 = vadd.f32 %v1869_v3, %v1868_v14  ;;  %v1934_v28 = vsel %vm1932_vm9, %v1929_v59, %v1566_v26  ;;  %v888_v8 = vmul.f32 %v779_v6, %v4757_v15  ;;  %v4764_v3 = vld [vmem:[#allocation53_spill] sm:$0xff] }
 0x61d   :  { %v4146_v56 = vadd.f32 %v1113_v44, %v1057_v58  ;;  %v1457_v9 = vmul.f32 %v4157_v7, %v3922_v62  ;;  %v819_v50 = vmul.f32 %v3908_v34, %v779_v6  ;;  %v1939_v14 = vsel %vm1937_vm11, %v1934_v28, %v1738_v19 }
 0x61e   :  { %v4149_v33 = vadd.f32 %v1803_v0, %v1747_v45  ;;  %v848_v44 = vsel %vm820_vm15, %v818_v16, 0.0  ;;  %v4185_v34 = vrot.slane %v4732_v21, %v3705_v31  ;;  %v4767_v16 = vld [vmem:[#allocation58_spill] sm:$0xff] }
 0x61f   :  { %v1229_v37 = vmul.f32 %v4146_v56, %v4756_v13  ;;  %v849_v45 = vsel %vm820_vm15, %v819_v50, 0.0 }
 0x620   :  { %v1895_v5 = vpop.permute.xlu0 %1894  ;;  %v850_v36 = vadd.f32 %v849_v45, %v848_v44 }
 0x621   :  { %v4161_v60 = vadd.f32 %v1285_v54, %v1229_v37  ;;  %v1906_v51 = vmul.f32 %v3855_v42, %v1895_v5  ;;  %v919_v11 = vpop.permute.xlu1 %918  ;;  %v4763_v42 = vld [vmem:[#allocation57_spill] sm:$0xff]  ;;  %v4765_v37 = vld [vmem:[#allocation44_spill] sm:$0xff] }
 0x622   :  { %v944_v24 = vmul.f32 %v4032_v18, %v919_v11  ;;  %v991_v12 = vmul.f32 %v4763_v42, %v4056_v53  ;;  %v4178_v18 = vrot.slane %v4732_v21, %v4719_v10  ;;  %v4768_v11 = vld [vmem:[#allocation69_spill] sm:$0xff]  ;;  %v851_v50 = vrot.slane %v850_v36, 4 }
 0x623   :  { %v1401_v32 = vmul.f32 %v4161_v60, %v4756_v13  ;;  %v1910_v63 = vadd.f32 %v1906_v51, %v1870_v35 }
 0x624   :  { %v952_v40 = vadd.f32 %v944_v24, %v888_v8  ;;  %v1629_v23 = vmul.f32 %v4178_v18, %v1595_v1  ;;  %v1020_v31 = vsel %vm820_vm15, %v991_v12, 0.0  ;;  %v1801_v1 = vmul.f32 %v4185_v34, %v4767_v16  ;;  %v4769_v24 = vld [vmem:[#allocation9_spill] sm:$0xff]  ;;  %v4770_v12 = vld [vmem:[#allocation74_spill] sm:$0xff] }
 0x625   :  { %v4180_v58 = vadd.f32 %v1457_v9, %v1401_v32  ;;  %v1944_v62 = vsel %vm1942_vm10, %v1939_v14, %v1910_v63  ;;  %v1288_v9 = vmul.f32 %v4073_v38, %v4769_v24  ;;  %v4776_v16 = vld [vmem:[#allocation18_spill] sm:$0xff] }
 0x626   :  { %v1948_v41 = vpack.c.bf16 %v1944_v62, %v1944_v62  ;;  %v992_v57 = vmul.f32 %v3914_v20, %v952_v40  ;;  %v1091_v0 = vpop.permute.xlu1 %1090  ;;  %v1060_v53 = vmul.f32 %v952_v40, %v4757_v15  ;;  %v4766_v20 = vld [vmem:[#allocation16_spill] sm:$0xff]  ;;  %v1335_v40 = vmul.f32 %v4770_v12, %v4092_v52  ;;  %v4773_v52 = vld [vmem:[#allocation59_spill] sm:$0xff] }
 0x627   :  { %v1573_v48 = vmul.f32 %v4180_v58, %v4756_v13  ;;  %v1116_v55 = vmul.f32 %v4764_v3, %v1091_v0  ;;  %v1163_v54 = vmul.f32 %v4766_v20, %v4765_v37  ;;  %v4774_v20 = vld [vmem:[#allocation24_spill] sm:$0xff] }
 0x628   :  { %v1952_v6 = vunpack.c.l.bf16 %v1948_v41  ;;  %v1021_v59 = vsel %vm820_vm15, %v992_v57, 0.0  ;;  %v4771_v41 = vld [vmem:[#allocation70_spill] sm:$0xff] }
 0x629   :  { %v4198_v26 = vadd.f32 %v1629_v23, %v1573_v48  ;;  %v1022_v19 = vadd.f32 %v1021_v59, %v1020_v31  ;;  %v1124_v5 = vadd.f32 %v1116_v55, %v1060_v53  ;;  %v1192_v42 = vsel %vm820_vm15, %v1163_v54, 0.0  ;;  %v4772_v23 = vld [vmem:[#allocation72_spill] sm:$0xff] }
 0x62a   :  { %v4200_v4 = vmul.f32 0.125, %v1952_v6  ;;  %v4223_v48 = vadd.f32 %v851_v50, %v850_v36  ;;  %v4226_v3 = vmul.f32 0.0, %v4772_v23  ;;  %v1364_v6 = vsel %vm820_vm15, %v1335_v40, 0.0  ;;  %v4781_v50 = vld [vmem:[#allocation43_spill] sm:$0xff] }
 0x62b   :  { %v1745_v35 = vmul.f32 %v4198_v26, %v4756_v13  ;;  %v1023_v51 = vrot.slane %v1022_v19, 4  ;;  %v1164_v28 = vmul.f32 %v4768_v11, %v1124_v5  ;;  %v1435_v8 = vpop.permute.xlu1 %1434  ;;  %v1232_v32 = vmul.f32 %v1124_v5, %v4757_v15  ;;  %v4778_v11 = vld [vmem:[#allocation51_spill] sm:$0xff] }
 0x62c   :  { %1965 = vrot.lane.b32.xlu1 %v4200_v4, %s2929_s7  ;;  %v1460_v53 = vmul.f32 %v4060_v49, %v1435_v8  ;;  %v1507_v31 = vmul.f32 %v4773_v52, %v4107_v2  ;;  %v4233_v54 = vmul.f32 0.0, %v4774_v20  ;;  %v853_v2 = vrot.slane %v4223_v48, 2  ;;  %v4779_v8 = vld [vmem:[#allocation75_spill] sm:$0xff] }
 0x62d   :  { %v4212_v63 = vadd.f32 %v1801_v1, %v1745_v35  ;;  %v1024_v14 = vadd.f32 %v1023_v51, %v1022_v19  ;;  %v1193_v13 = vsel %vm820_vm15, %v1164_v28, 0.0  ;;  %v1296_v62 = vadd.f32 %v1288_v9, %v1232_v32  ;;  %v4775_v19 = vld [vmem:[#allocation10_spill] sm:$0xff]  ;;  %v4777_v51 = vld [vmem:[#allocation20_spill] sm:$0xff] }
 0x62e   :  { %v4218_v44 = vadd.f32 %v1193_v13, %v1192_v42  ;;  %v1632_v49 = vmul.f32 %v4079_v27, %v4775_v19  ;;  %v886_v28 = vmul.f32 %v4778_v11, %v4777_v51  ;;  %v1679_v24 = vmul.f32 %v4779_v8, %v4125_v46  ;;  %v4780_v9 = vld [vmem:[#allocation30_spill] sm:$0xff]  ;;  %v4783_v46 = vld [vmem:[#allocation71_spill] sm:$0xff] }
 0x62f   :  { %v1025_v38 = vrot.slane %v1024_v14, 2  ;;  %v1336_v57 = vmul.f32 %v4771_v41, %v1296_v62  ;;  %v1404_v0 = vmul.f32 %v1296_v62, %v4757_v15  ;;  %v1048_v32 = vmul.f32 %v4781_v50, %v4780_v9 }
 0x630   :  { %v1779_v45 = vpop.permute.xlu1 %1778  ;;  %v1536_v13 = vsel %vm820_vm15, %v1507_v31, 0.0  ;;  %v1708_v31 = vsel %vm820_vm15, %v1679_v24, 0.0 }
 0x631   :  { %v1026_v55 = vadd.f32 %v1025_v38, %v1024_v14  ;;  %v1365_v59 = vsel %vm820_vm15, %v1336_v57, 0.0  ;;  %v1468_v37 = vadd.f32 %v1460_v53, %v1404_v0  ;;  %v4782_v38 = vld [vmem:[#allocation66_spill] sm:$0xff] }
 0x632   :  { %v1366_v5 = vadd.f32 %v1365_v59, %v1364_v6  ;;  %v989_v41 = vmul.f32 %v4782_v38, %v4120_v39  ;;  %v1804_v6 = vmul.f32 %v4064_v30, %v1779_v45  ;;  %v4784_v59 = vld [vmem:[#allocation60_spill] sm:$0xff] }
 0x633   :  { %v1027_v36 = vrot.slane %v1026_v55, 1  ;;  %v1508_v1 = vmul.f32 %v4776_v16, %v1468_v37  ;;  %v1576_v35 = vmul.f32 %v1468_v37, %v4757_v15  ;;  %v1851_v37 = vmul.f32 %v4784_v59, %v4149_v33  ;;  %v4787_v33 = vld [vmem:[#allocation45_spill] sm:$0xff] }
 0x634   :  { %v1367_v42 = vrot.slane %v1366_v5, 4  ;;  %v1161_v11 = vmul.f32 %v4787_v33, %v4146_v56  ;;  %v1011_v24 = vsel %vm820_vm15, %v989_v41, 0.0  ;;  %v4790_v41 = vld [vmem:[#allocation73_spill] sm:$0xff] }
 0x635   :  { %v1028_v14 = vadd.f32 %v1027_v36, %v1026_v55  ;;  %v911_v27 = vpop.permute.xlu1 %910  ;;  %v1537_v12 = vsel %vm820_vm15, %v1508_v1, 0.0  ;;  %v1640_v40 = vadd.f32 %v1632_v49, %v1576_v35  ;;  %v4785_v49 = vld [vmem:[#allocation47_spill] sm:$0xff] }
 0x636   :  { %v942_v62 = vmul.f32 %v4040_v43, %v911_v27  ;;  %v1368_v57 = vadd.f32 %v1367_v42, %v1366_v5  ;;  %v1538_v0 = vadd.f32 %v1537_v12, %v1536_v13  ;;  %v1195_v43 = vrot.slane %v4218_v44, 4  ;;  %v4789_v13 = vld [vmem:[#allocation65_spill] sm:$0xff] }
 0x637   :  { %v4251_v53 = vadd.f32 %v1048_v32, %v1028_v14  ;;  %v1680_v23 = vmul.f32 %v4783_v46, %v1640_v40  ;;  %v1748_v55 = vmul.f32 %v1640_v40, %v4757_v15  ;;  %v4786_v15 = vld [vmem:[#allocation63_spill] sm:$0xff]  ;;  %v1880_v12 = vsel %vm820_vm15, %v1851_v37, 0.0  ;;  %v4791_v37 = vld [vmem:[#allocation41_spill] sm:$0xff] }
 0x638   :  { %v950_v52 = vadd.f32 %v942_v62, %v886_v28  ;;  %v1369_v20 = vrot.slane %v1368_v57, 2  ;;  %v816_v30 = vmul.f32 %v4786_v15, %v4103_v47  ;;  %v4788_v28 = vld [vmem:[#allocation46_spill] sm:$0xff]  ;;  %v1286_v47 = vmul.f32 %v4144_v29, %v4789_v13 }
 0x639   :  { %v1709_v39 = vsel %vm820_vm15, %v1680_v23, 0.0  ;;  %v1812_v19 = vadd.f32 %v1804_v6, %v1748_v55  ;;  %v1196_v56 = vadd.f32 %v1195_v43, %v4218_v44  ;;  %v1539_v40 = vrot.slane %v1538_v0, 4 }
 0x63a   :  { %v990_v36 = vmul.f32 %v4785_v49, %v950_v52  ;;  %v1083_v5 = vpop.permute.xlu1 %1082  ;;  %v1058_v16 = vmul.f32 %v950_v52, %v4777_v51  ;;  %v1370_v45 = vadd.f32 %v1369_v20, %v1368_v57  ;;  %v1710_v1 = vadd.f32 %v1709_v39, %v1708_v31 }
 0x63b   :  { %v1114_v35 = vmul.f32 %v4050_v61, %v1083_v5  ;;  %v1852_v8 = vmul.f32 %v4788_v28, %v1812_v19  ;;  %v1392_v23 = vmul.f32 %v4781_v50, %v4109_v22  ;;  %v854_v29 = vadd.f32 %v853_v2, %v4223_v48 }
 0x63c   :  { %v1012_v9 = vsel %vm820_vm15, %v990_v36, 0.0  ;;  %v1371_v32 = vrot.slane %v1370_v45, 1  ;;  %v1711_v14 = vrot.slane %v1710_v1, 4  ;;  %v839_v52 = vsel %vm820_vm15, %v816_v30, 0.0  ;;  %v4792_v36 = vld [vmem:[#allocation61_spill] sm:$0xff] }
 0x63d   :  { %v4271_v42 = vadd.f32 %v1012_v9, %v1011_v24  ;;  %v1122_v27 = vadd.f32 %v1114_v35, %v1058_v16  ;;  %v1881_v61 = vsel %vm820_vm15, %v1852_v8, 0.0  ;;  %v1183_v44 = vsel %vm820_vm15, %v1161_v11, 0.0  ;;  %v4793_v16 = vld [vmem:[#allocation55_spill] sm:$0xff] }
 0x63e   :  { %v1712_v62 = vadd.f32 %v1711_v14, %v1710_v1  ;;  %v4278_v38 = vadd.f32 %v1881_v61, %v1880_v12  ;;  %v1372_v6 = vadd.f32 %v1371_v32, %v1370_v45  ;;  %v1333_v43 = vmul.f32 %v4791_v37, %v4161_v60 }
 0x63f   :  { %v1162_v57 = vmul.f32 %v4790_v41, %v1122_v27  ;;  %v1427_v46 = vpop.permute.xlu1 %1426  ;;  %v1230_v55 = vmul.f32 %v1122_v27, %v4777_v51  ;;  %v626_v22 = vadd.f32 %v4226_v3, %v4233_v54  ;;  %v1197_v2 = vrot.slane %v1196_v56, 2  ;;  %v4794_v54 = vld [vmem:[#allocation67_spill] sm:$0xff]  ;;  %v4795_v27 = vld [vmem:[#allocation25_spill] sm:$0xff] }
 0x640   :  { %v1713_v31 = vrot.slane %v1712_v62, 2  ;;  %v4292_v19 = vadd.f32 %v1392_v23, %v1372_v6  ;;  %v1540_v49 = vadd.f32 %v1539_v40, %v1538_v0  ;;  %v840_v5 = vsel %vm820_vm15, %v4792_v36, 0.0  ;;  %v4797_v40 = vld [vmem:[#allocation19_spill] sm:$0xff] }
 0x641   :  { %v1184_v59 = vsel %vm820_vm15, %v1162_v57, 0.0  ;;  %v1294_v39 = vadd.f32 %v1286_v47, %v1230_v55  ;;  %v1458_v60 = vmul.f32 %v4157_v7, %v1427_v46  ;;  %v841_v1 = vadd.f32 %v840_v5, %v839_v52 }
 0x642   :  { %v4290_v20 = vadd.f32 %v1184_v59, %v1183_v44  ;;  %v1714_v48 = vadd.f32 %v1713_v31, %v1712_v62  ;;  %v1736_v35 = vmul.f32 %v4781_v50, %v4132_v25  ;;  %v855_v11 = vrot.slane %v854_v29, 1  ;;  %v4796_v25 = vld [vmem:[#allocation49_spill] sm:$0xff] }
 0x643   :  { %v1334_v15 = vmul.f32 %v4793_v16, %v1294_v39  ;;  %v1402_v30 = vmul.f32 %v1294_v39, %v4777_v51  ;;  %v1355_v3 = vsel %vm820_vm15, %v1333_v43, 0.0  ;;  %v1505_v0 = vmul.f32 %v4794_v54, %v4180_v58  ;;  %v4798_v31 = vld [vmem:[#allocation17_spill] sm:$0xff]  ;;  %v4800_v16 = vld [vmem:[#allocation39_spill] sm:$0xff] }
 0x644   :  { %v1771_v45 = vpop.permute.xlu1 %1770  ;;  %v1715_v33 = vrot.slane %v1714_v48, 1  ;;  %v1198_v24 = vadd.f32 %v1197_v2, %v1196_v56  ;;  %v1541_v9 = vrot.slane %v1540_v49, 2  ;;  %v627_v14 = vrot.slane %v626_v22, 4 }
 0x645   :  { %v1356_v28 = vsel %vm820_vm15, %v1334_v15, 0.0  ;;  %v1466_v8 = vadd.f32 %v1458_v60, %v1402_v30  ;;  %v1630_v13 = vmul.f32 %v4178_v18, %v4795_v27  ;;  %v842_v61 = vrot.slane %v841_v1, 4  ;;  %v4801_v60 = vld [vmem:[#allocation62_spill] sm:$0xff] }
 0x646   :  { %v4307_v32 = vadd.f32 %v1356_v28, %v1355_v3  ;;  %v1716_v7 = vadd.f32 %v1715_v33, %v1714_v48  ;;  %v1677_v58 = vmul.f32 %v4797_v40, %v4198_v26  ;;  %v856_v41 = vadd.f32 %v855_v11, %v854_v29  ;;  %v4799_v48 = vld [vmem:[#allocation68_spill] sm:$0xff] }
 0x647   :  { %v1506_v47 = vmul.f32 %v4796_v25, %v1466_v8  ;;  %v1574_v12 = vmul.f32 %v1466_v8, %v4777_v51  ;;  %v1527_v56 = vsel %vm820_vm15, %v1505_v0, 0.0  ;;  %v1199_v18 = vrot.slane %v1198_v24, 1 }
 0x648   :  { %v1740_v57 = vadd.f32 %v1736_v35, %v1716_v7  ;;  %v1542_v52 = vadd.f32 %v1541_v9, %v1540_v49  ;;  %v1802_v37 = vmul.f32 %v4185_v34, %v1771_v45  ;;  %v628_v43 = vadd.f32 %v627_v14, %v626_v22 }
 0x649   :  { %v871_v62 = vpop.permute.xlu1 %870  ;;  %v1528_v46 = vsel %vm820_vm15, %v1506_v47, 0.0  ;;  %v1638_v23 = vadd.f32 %v1630_v13, %v1574_v12  ;;  %v1699_v29 = vsel %vm820_vm15, %v1677_v58, 0.0  ;;  %v843_v39 = vadd.f32 %v842_v61, %v841_v1 }
 0x64a   :  { %v876_v55 = vmul.f32 %v4781_v50, %v871_v62  ;;  %v1529_v6 = vadd.f32 %v1528_v46, %v1527_v56  ;;  %v1849_v2 = vmul.f32 %v4799_v48, %v4212_v63  ;;  %v1014_v30 = vrot.slane %v4271_v42, 4 }
 0x64b   :  { %v1678_v44 = vmul.f32 %v4798_v31, %v1638_v23  ;;  %v1746_v59 = vmul.f32 %v1638_v23, %v4777_v51  ;;  %v1200_v51 = vadd.f32 %v1199_v18, %v1198_v24  ;;  %v1543_v1 = vrot.slane %v1542_v52, 1 }
 0x64c   :  { %v880_v26 = vadd.f32 %v876_v55, %v856_v41  ;;  %v629_v33 = vrot.slane %v628_v43, 2  ;;  %v1871_v11 = vsel %vm820_vm15, %v1849_v2, 0.0  ;;  %v844_v54 = vrot.slane %v843_v39, 2 }
 0x64d   :  { %v1700_v36 = vsel %vm820_vm15, %v1678_v44, 0.0  ;;  %v1810_v5 = vadd.f32 %v1802_v37, %v1746_v59  ;;  %v1015_v24 = vadd.f32 %v1014_v30, %v4271_v42  ;;  %v1186_v9 = vrot.slane %v4290_v20, 4 }
 0x64e   :  { %v1916_v49 = vsel %vm129_vm2, %v4800_v16, %v880_v26  ;;  %v1215_v15 = vpop.permute.xlu1 %1214  ;;  %v1701_v35 = vadd.f32 %v1700_v36, %v1699_v29  ;;  %v630_v13 = vadd.f32 %v629_v33, %v628_v43  ;;  %v845_v25 = vadd.f32 %v844_v54, %v843_v39 }
 0x64f   :  { %v1220_v34 = vmul.f32 %v4781_v50, %v1215_v15  ;;  %v1921_v22 = vsel %vm1917_vm5, %v1916_v49, %v4251_v53  ;;  %v1850_v45 = vmul.f32 %v4801_v60, %v1810_v5  ;;  %v1544_v53 = vadd.f32 %v1543_v1, %v1542_v52 }
 0x650   :  { %v1016_v47 = vrot.slane %v1015_v24, 2  ;;  %v1187_v40 = vadd.f32 %v1186_v9, %v4290_v20  ;;  %v1358_v58 = vrot.slane %v4307_v32, 4  ;;  %v631_v62 = vrot.slane %v630_v13, 1 }
 0x651   :  { %v1224_v63 = vadd.f32 %v1220_v34, %v1200_v51  ;;  %v1872_v3 = vsel %vm820_vm15, %v1850_v45, 0.0  ;;  %v846_v41 = vrot.slane %v845_v25, 1  ;;  %v1530_v18 = vrot.slane %v1529_v6, 4 }
 0x652   :  { %v1873_v0 = vadd.f32 %v1872_v3, %v1871_v11  ;;  %v1017_v56 = vadd.f32 %v1016_v47, %v1015_v24  ;;  %v1359_v55 = vadd.f32 %v1358_v58, %v4307_v32  ;;  %v632_v52 = vadd.f32 %v631_v62, %v630_v13 }
 0x653   :  { %v1926_v28 = vsel %vm1922_vm6, %v1921_v22, %v1224_v63  ;;  %v1559_v8 = vpop.permute.xlu1 %1558  ;;  %v847_v31 = vadd.f32 %v846_v41, %v845_v25  ;;  %v1531_v39 = vadd.f32 %v1530_v18, %v1529_v6  ;;  %v1702_v36 = vrot.slane %v1701_v35, 4 }
 0x654   :  { %v1564_v7 = vmul.f32 %v4781_v50, %v1559_v8  ;;  %v1931_v14 = vsel %vm1927_vm8, %v1926_v28, %v4292_v19  ;;  %v1188_v19 = vrot.slane %v1187_v40, 2  ;;  %v1018_v20 = vrot.slane %v1017_v56, 1 }
 0x655   :  { %v1532_v49 = vrot.slane %v1531_v39, 2  ;;  %v1703_v51 = vadd.f32 %v1702_v36, %v1701_v35  ;;  %v1874_v34 = vrot.slane %v1873_v0, 4  ;;  %v1883_v33 = vrot.slane %v4278_v38, 4  ;;  %v1964_v36 = vpop.permute.xlu0 %1963 }
 0x656   :  { %v1568_v27 = vadd.f32 %v1564_v7, %v1544_v53  ;;  %v1189_v26 = vadd.f32 %v1188_v19, %v1187_v40  ;;  %v1019_v48 = vadd.f32 %v1018_v20, %v1017_v56 }
 0x657   :  { %v1533_v63 = vadd.f32 %v1532_v49, %v1531_v39  ;;  %v1704_v6 = vrot.slane %v1703_v51, 2  ;;  %v1875_v54 = vadd.f32 %v1874_v34, %v1873_v0  ;;  %v1884_v7 = vadd.f32 %v1883_v33, %v4278_v38  ;;  %v4802_v34 = vld [vmem:[#allocation37_spill] sm:$0xff] }
 0x658   :  { %v1936_v12 = vsel %vm1932_vm9, %v1931_v14, %v1568_v27  ;;  %v653_v61 = vpop.permute.xlu1 %652  ;;  %v1190_v5 = vrot.slane %v1189_v26, 1 }
 0x659   :  { %v4344_v42 = vsel %vm1937_vm11, %v1936_v12, %v1740_v57  ;;  %v662_v46 = vmul.f32 %v653_v61, %v4732_v21  ;;  %v1360_v57 = vrot.slane %v1359_v55, 2  ;;  %v1534_v24 = vrot.slane %v1533_v63, 1 }
 0x65a   :  { %v1191_v22 = vadd.f32 %v1190_v5, %v1189_v26  ;;  %v1705_v35 = vadd.f32 %v1704_v6, %v1703_v51  ;;  %v1876_v53 = vrot.slane %v1875_v54, 2  ;;  %v1885_v40 = vrot.slane %v1884_v7, 2 }
 0x65b   :  { %v666_v59 = vadd.f32 %v662_v46, %v632_v52  ;;  %v1361_v16 = vadd.f32 %v1360_v57, %v1359_v55  ;;  %v1535_v13 = vadd.f32 %v1534_v24, %v1533_v63  ;;  %v1976_v5 = vsel %vm1975_vm12, %v1964_v36, 0.0 }
 0x65c   :  { %v1706_v47 = vrot.slane %v1705_v35, 1  ;;  %v1877_v61 = vadd.f32 %v1876_v53, %v1875_v54  ;;  %v1886_v46 = vadd.f32 %v1885_v40, %v1884_v7  ;;  %v2553_v53 = vld [vmem:[%s4536_s2 + $0x2] ss:$0 sm:$0xff]  ;;  %v2554_v7 = vld [vmem:[%s4536_s2 + $0x3] ss:$0 sm:$0xff] }
 0x65d   :  { %v867_v23 = vpop.permute.xlu1 %866  ;;  %v1362_v45 = vrot.slane %v1361_v16, 1 }
 0x65e   :  { %v875_v44 = vmul.f32 %v867_v23, %v4732_v21  ;;  %v1707_v62 = vadd.f32 %v1706_v47, %v1705_v35  ;;  %v1878_v56 = vrot.slane %v1877_v61, 1  ;;  %v1887_v52 = vrot.slane %v1886_v46, 1  ;;  %v2556_v47 = vld [vmem:[%s4537_s3 + $0x1] ss:$0 sm:$0xff] }
 0x65f   :  { %v1363_v28 = vadd.f32 %v1362_v45, %v1361_v16  ;;  %v2551_v45 = vld [vmem:[%s4536_s2] ss:$0 sm:$0xff] }
 0x660   :  { %v879_v37 = vadd.f32 %v875_v44, %v847_v31  ;;  %v1879_v55 = vadd.f32 %v1878_v56, %v1877_v61 }
 0x662   :  { %v1915_v43 = vsel %vm129_vm2, %v666_v59, %v879_v37  ;;  %v1039_v29 = vpop.permute.xlu1 %1038  ;;  %v1888_v59 = vadd.f32 %v1887_v52, %v1886_v46 }
 0x663   :  { %v1047_v2 = vmul.f32 %v1039_v29, %v4732_v21 }
 0x665   :  { %v1051_v32 = vadd.f32 %v1047_v2, %v1019_v48 }
 0x667   :  { %v1920_v15 = vsel %vm1917_vm5, %v1915_v43, %v1051_v32  ;;  %v1211_v30 = vpop.permute.xlu1 %1210 }
 0x668   :  { %v1219_v60 = vmul.f32 %v1211_v30, %v4732_v21 }
 0x66a   :  { %v1223_v1 = vadd.f32 %v1219_v60, %v1191_v22 }
 0x66c   :  { %v1925_v11 = vsel %vm1922_vm6, %v1920_v15, %v1223_v1  ;;  %v1383_v3 = vpop.permute.xlu1 %1382 }
 0x66d   :  { %v1391_v8 = vmul.f32 %v1383_v3, %v4732_v21 }
 0x66f   :  { %v1395_v9 = vadd.f32 %v1391_v8, %v1363_v28 }
 0x671   :  { %v1930_v14 = vsel %vm1927_vm8, %v1925_v11, %v1395_v9  ;;  %v1555_v27 = vpop.permute.xlu1 %1554 }
 0x672   :  { %v1563_v25 = vmul.f32 %v1555_v27, %v4732_v21 }
 0x674   :  { %v1567_v12 = vadd.f32 %v1563_v25, %v1535_v13 }
 0x676   :  { %v1935_v0 = vsel %vm1932_vm9, %v1930_v14, %v1567_v12  ;;  %v1727_v58 = vpop.permute.xlu1 %1726  ;;  %v2558_v12 = vld [vmem:[%s4537_s3 + $0x3] ss:$0 sm:$0xff] }
 0x677   :  { %v1735_v41 = vmul.f32 %v1727_v58, %v4732_v21 }
 0x679   :  { %v1739_v19 = vadd.f32 %v1735_v41, %v1707_v62  ;;  %v2555_v62 = vld [vmem:[%s4537_s3] ss:$0 sm:$0xff]  ;;  %v2557_v41 = vld [vmem:[%s4537_s3 + $0x2] ss:$0 sm:$0xff] }
 0x67b   :  { %v1940_v38 = vsel %vm1937_vm11, %v1935_v0, %v1739_v19  ;;  %v1899_v23 = vpop.permute.xlu1 %1898 }
 0x67c   :  { %v1907_v18 = vmul.f32 %v1899_v23, %v4732_v21 }
 0x67e   :  { %v1911_v31 = vadd.f32 %v1907_v18, %v1879_v55 }
 0x67f   :  { %v1903_v44 = vpop.permute.xlu1 %1902 }
 0x680   :  { %v1945_v20 = vsel %vm1942_vm10, %v1940_v38, %v1911_v31  ;;  %v1908_v37 = vmul.f32 %v4781_v50, %v1903_v44 }
 0x681   :  { %v1949_v26 = vpack.c.bf16 %v1945_v20, %v1945_v20 }
 0x682   :  { %v1912_v57 = vadd.f32 %v1908_v37, %v1888_v59 }
 0x683   :  { %v1953_v43 = vunpack.c.l.bf16 %v1949_v26 }
 0x684   :  { %v1946_v29 = vsel %vm1942_vm10, %v4344_v42, %v1912_v57 }
 0x685   :  { %v1950_v39 = vpack.c.bf16 %v1946_v29, %v1946_v29  ;;  %v1957_v48 = vmul.f32 0.125, %v1953_v43  ;;  %v4803_v43 = vld [vmem:[#allocation14_spill] sm:$0xff] }
 0x686   :  { %v2538_v29 = vmul.f32 -1.442695, %v4803_v43 }
 0x687   :  { %v1954_v2 = vunpack.c.l.bf16 %v1950_v39  ;;  %1967 = vrot.lane.b32.xlu0 %v1957_v48, %s2929_s7  ;;  %v4804_v39 = vld [vmem:[#allocation13_spill] sm:$0xff] }
 0x689   :  { %v1958_v21 = vmul.f32 0.125, %v1954_v2 }
 0x68b   :  { %1969 = vrot.lane.b32.xlu1 %v1958_v21, %s2929_s7 }
 0x69e   :  { %v1966_v50 = vpop.permute.xlu1 %1965 }
 0x69f   :  { %v1979_v32 = vsel %vm1975_vm12, %v1966_v50, 0.0 }
 0x6a6   :  { %1977 = vadd.xlane.f32.xlu0 %v1976_v5 }
 0x6af   :  { %1980 = vadd.xlane.f32.xlu1 %v1979_v32 }
 0x6f9   :  { %v1968_v16 = vpop.permute.xlu0 %1967 }
 0x6fa   :  { %v1982_v42 = vsel %vm1975_vm12, %v1968_v16, 0.0 }
 0x6fb   :  { %1983 = vadd.xlane.f32.xlu0 %v1982_v42 }
 0x6fd   :  { %v1970_v49 = vpop.permute.xlu1 %1969 }
 0x6fe   :  { %v1985_v15 = vsel %vm1975_vm12, %v1970_v49, 0.0 }
 0x6ff   :  { %1986 = vadd.xlane.f32.xlu0 %v1985_v15 }
 0x733   :  { %v1978_v30 = vpop.xlane.xlu0 %1977 }
 0x734   :  { %v1989_v51 = vmul.f32 0.0625, %v1978_v30 }
 0x736   :  { %v4374_v22 = vsub.f32 %v4802_v34, %v1989_v51 }
 0x738   :  { %v1997_v60 = vmul.f32 %v4374_v22, %v4374_v22 }
 0x73a   :  { %2005 = vrot.lane.b32.xlu0 %v1997_v60, %s2929_s7 }
 0x73c   :  { %v1981_v1 = vpop.xlane.xlu1 %1980 }
 0x73d   :  { %v1990_v63 = vmul.f32 0.0625, %v1981_v1  ;;  %v2846_v1 = vld [vmem:[%s4540_s6] sm:$0xff]  }
 0x73e   :  { %2069 = vrot.lane.b32.xlu0 %v2551_v45, %s2929_s7  ;;  %2627 = vmatpush3.bf16.msra.mxu0 %v2846_v1 }
 0x73f   :  { %v1994_v6 = vsub.f32 %v4200_v4, %v1990_v63  ;;  %v2552_v4 = vld [vmem:[%s4536_s2 + $0x1] ss:$0 sm:$0xff] }
 0x741   :  { %v1998_v33 = vmul.f32 %v1994_v6, %v1994_v6 }
 0x743   :  { %2007 = vrot.lane.b32.xlu1 %v1998_v33, %s2929_s7  ;;  %v4805_v33 = vmov 0.0  }
 0x744   :  { %2628 = vmatprep.subr.bf16.mxu0 %v4805_v33 }
 0x788   :  { %v1984_v11 = vpop.xlane.xlu0 %1983 }
 0x789   :  { %v1991_v3 = vmul.f32 0.0625, %v1984_v11 }
 0x78b   :  { %v4385_v54 = vsub.f32 %v1957_v48, %v1991_v3  ;;  %v2537_v48 = vmul.f32 -1.442695, %v4804_v39 }
 0x78c   :  { %v1987_v28 = vpop.xlane.xlu0 %1986 }
 0x78d   :  { %v1999_v8 = vmul.f32 %v4385_v54, %v4385_v54  ;;  %v1992_v24 = vmul.f32 0.0625, %v1987_v28  ;;  %v2847_v28 = vld [vmem:[%s4540_s6 + $0x8] sm:$0xff]  }
 0x78e   :  { %2629 = vmatpush3.bf16.msra.mxu0 %v2847_v28 }
 0x78f   :  { %v4389_v9 = vsub.f32 %v1958_v21, %v1992_v24  ;;  %2009 = vrot.lane.b32.xlu1 %v1999_v8, %s2929_s7  ;;  %2642 = vmatprep.subr.bf16.mxu0 %v4805_v33 }
 0x791   :  { %v2000_v35 = vmul.f32 %v4389_v9, %v4389_v9 }
 0x793   :  { %2011 = vrot.lane.b32.xlu1 %v2000_v35, %s2929_s7 }
 0x797   :  { %2071 = vrot.lane.b32.xlu1 %v2552_v4, %s2929_s7 }
 0x79b   :  { %2073 = vrot.lane.b32.xlu1 %v2553_v53, %s2929_s7 }
 0x79f   :  { %2075 = vrot.lane.b32.xlu1 %v2554_v7, %s2929_s7 }
 0x7ac   :  { %v2006_v14 = vpop.permute.xlu0 %2005 }
 0x7ad   :  { %v2017_v27 = vsel %vm1975_vm12, %v2006_v14, 0.0 }
 0x7ae   :  { %2018 = vadd.xlane.f32.xlu0 %v2017_v27 }
 0x7b0   :  { %v2070_v59 = vpop.permute.xlu0 %2069 }
 0x7b5   :  { %v2008_v13 = vpop.permute.xlu1 %2007 }
 0x7b6   :  { %v2020_v25 = vsel %vm1975_vm12, %v2008_v13, 0.0 }
 0x7c3   :  { %2021 = vadd.xlane.f32.xlu1 %v2020_v25 }
 0x7d4   :  { %2111 = vrot.lane.b32.xlu1 %v2556_v47, %s2929_s7 }
 0x7d8   :  { %2115 = vrot.lane.b32.xlu1 %v2558_v12, %s2929_s7 }
 0x801   :  { %v2010_v61 = vpop.permute.xlu1 %2009 }
 0x802   :  { %v2023_v58 = vsel %vm1975_vm12, %v2010_v61, 0.0 }
 0x805   :  { %v2012_v40 = vpop.permute.xlu1 %2011 }
 0x806   :  { %v2026_v0 = vsel %vm1975_vm12, %v2012_v40, 0.0 }
 0x807   :  { %2027 = vadd.xlane.f32.xlu0 %v2026_v0 }
 0x809   :  { %v2072_v56 = vpop.permute.xlu1 %2071 }
 0x80b   :  { %2024 = vadd.xlane.f32.xlu0 %v2023_v58 }
 0x80d   :  { %v2074_v46 = vpop.permute.xlu1 %2073 }
 0x811   :  { %v2076_v19 = vpop.permute.xlu1 %2075 }
 0x821   :  { %2109 = vrot.lane.b32.xlu0 %v2555_v62, %s2929_s7 }
 0x825   :  { %2113 = vrot.lane.b32.xlu0 %v2557_v41, %s2929_s7 }
 0x83b   :  { %v2019_v37 = vpop.xlane.xlu0 %2018 }
 0x83c   :  { %v2029_v26 = vmul.f32 0.0625, %v2019_v37 }
 0x83e   :  { %v2033_v57 = vadd.f32 1e-05, %v2029_v26 }
 0x850   :  { %v2022_v38 = vpop.xlane.xlu1 %2021 }
 0x851   :  { %v2030_v23 = vmul.f32 0.0625, %v2022_v38 }
 0x853   :  { %v2034_v55 = vadd.f32 1e-05, %v2030_v23 }
 0x854   :  { %v2112_v31 = vpop.permute.xlu1 %2111 }
 0x855   :  { %2864 = vrsqrt.f32 %v2034_v55  ;;  %v4807_v55 = vld [vmem:[#allocation8_spill] sm:$0xff] }
 0x856   :  { %2866 = vrsqrt.f32 %v2033_v57 }
 0x857   :  { %2868 = vpow2.f32 %v2538_v29 }
 0x858   :  { %2870 = vpow2.f32 %v2537_v48 }
 0x85f   :  { %v2865_v18 = vpop.eup %2864 }
 0x860   :  { %v2042_v52 = vmul.f32 %v2865_v18, %v1994_v6  ;;  %v2867_v2 = vpop.eup %2866  ;;  %v2116_v6 = vpop.permute.xlu1 %2115 }
 0x861   :  { %v2041_v50 = vmul.f32 %v2867_v2, %v4374_v22  ;;  %v2869_v32 = vpop.eup %2868 }
 0x862   :  { %v2082_v44 = vmul.f32 %v2072_v56, %v2042_v52  ;;  %v296_v49 = vadd.f32 1.0, %v2869_v32  ;;  %v2871_v51 = vpop.eup %2870 }
 0x863   :  { %v2081_v30 = vmul.f32 %v2070_v59, %v2041_v50  ;;  %v295_v45 = vadd.f32 1.0, %v2871_v51  ;;  %v2853_v50 = vld [vmem:[%s4546_s12 + $0x8] sm:$0xff]   ;;  %v2892_v51 = vld [vmem:[%s4535_s1] sm:$0x3f] }
 0x864   :  { %v2122_v20 = vadd.f32 %v2112_v31, %v2082_v44 }
 0x866   :  { %2130 = vrot.lane.b32.xlu1 %v2122_v20, %s2930_s27 }
 0x894   :  { %v2028_v21 = vpop.xlane.xlu0 %2027 }
 0x895   :  { %v2032_v36 = vmul.f32 0.0625, %v2028_v21  ;;  %v2848_v21 = vld [vmem:[%s4544_s10] sm:$0xff]  }
 0x896   :  { %2635 = vmatpush3.bf16.msra.mxu1 %v2848_v21 }
 0x897   :  { %v2036_v5 = vadd.f32 1e-05, %v2032_v36  ;;  %v2849_v36 = vld [vmem:[%s4544_s10 + $0x8] sm:$0xff]   ;;  %2636 = vmatprep.subr.bf16.mxu1 %v4805_v33 }
 0x898   :  { %v2025_v16 = vpop.xlane.xlu0 %2024 }
 0x899   :  { %2872 = vrsqrt.f32 %v2036_v5  ;;  %v2031_v42 = vmul.f32 0.0625, %v2025_v16  ;;  %v2852_v5 = vld [vmem:[%s4546_s12] sm:$0xff]  }
 0x89a   :  { %2637 = vmatpush3.bf16.msra.mxu1 %v2849_v36 }
 0x89b   :  { %v2035_v15 = vadd.f32 1e-05, %v2031_v42  ;;  %2654 = vmatprep.subr.bf16.mxu1 %v4805_v33 }
 0x89c   :  { %v2110_v34 = vpop.permute.xlu0 %2109 }
 0x89d   :  { %2874 = vrsqrt.f32 %v2035_v15  ;;  %v2121_v60 = vadd.f32 %v2110_v34, %v2081_v30  ;;  %v2245_v34 = vrot.slane %v2892_v51, %v4714_v17 }
 0x89e   :  { %2876 = vrcp.f32 %v296_v49 }
 0x89f   :  { %2126 = vrot.lane.b32.xlu0 %v2121_v60, %s2929_s7  ;;  %2878 = vrcp.f32 %v295_v45  ;;  %v2251_v45 = vrot.slane %v2892_v51, %v4719_v10 }
 0x8a0   :  { %v2114_v4 = vpop.permute.xlu0 %2113 }
 0x8a3   :  { %v2873_v22 = vpop.eup %2872 }
 0x8a4   :  { %v2044_v63 = vmul.f32 %v2873_v22, %v4389_v9 }
 0x8a6   :  { %v2084_v11 = vmul.f32 %v2076_v19, %v2044_v63 }
 0x8a7   :  { %v2875_v3 = vpop.eup %2874 }
 0x8a8   :  { %v2124_v8 = vadd.f32 %v2116_v6, %v2084_v11  ;;  %v2043_v24 = vmul.f32 %v2875_v3, %v4385_v54  ;;  %v2877_v35 = vpop.eup %2876  ;;  %v2264_v6 = vld [vmem:[%s4543_s9] sm:$0x3] }
 0x8a9   :  { %v302_v9 = vmul.f32 %v2877_v35, %v4803_v43  ;;  %v2879_v14 = vpop.eup %2878  ;;  %v2271_v28 = vsub.f32 1.0, %v2264_v6 }
 0x8aa   :  { %2139 = vrot.lane.b32.xlu1 %v2124_v8, %s2930_s27  ;;  %v2083_v53 = vmul.f32 %v2074_v46, %v2043_v24  ;;  %v301_v27 = vmul.f32 %v2879_v14, %v4804_v39  ;;  %v4806_v46 = vld [vmem:[#allocation7_spill] sm:$0xff] }
 0x8ac   :  { %v2123_v7 = vadd.f32 %v2114_v4, %v2083_v53  ;;  %v4808_v53 = vld [vmem:[#allocation5_spill] sm:$0xff] }
 0x8ad   :  { %v2275_v17 = vrot.slane %v2271_v28, %v4808_v53 }
 0x8ae   :  { %2135 = vrot.lane.b32.xlu0 %v2123_v7, %s2929_s7  ;;  %2147 = vrot.lane.b32.xlu1 %v302_v9, %s2931_s30  ;;  %v2268_v7 = vrot.slane %v2264_v6, %v4808_v53 }
 0x8b2   :  { %2145 = vrot.lane.b32.xlu0 %v301_v27, %s2931_s30 }
 0x8d8   :  { %v2131_v54 = vpop.permute.xlu1 %2130 }
 0x911   :  { %v2127_v13 = vpop.permute.xlu0 %2126 }
 0x912   :  { %v2133_v0 = vsel %vm1975_vm12, %v2127_v13, %v2131_v54 }
 0x91c   :  { %v2140_v25 = vpop.permute.xlu1 %2139 }
 0x920   :  { %v2136_v47 = vpop.permute.xlu0 %2135  ;;  %v2148_v61 = vpop.permute.xlu1 %2147 }
 0x921   :  { %v2142_v12 = vsel %vm1975_vm12, %v2136_v47, %v2140_v25 }
 0x922   :  { %v2152_v58 = vmul.f32 %v2148_v61, %v2142_v12 }
 0x924   :  { %v2146_v40 = vpop.permute.xlu0 %2145 }
 0x925   :  { %v2151_v62 = vmul.f32 %v2146_v40, %v2133_v0 }
 0x927   :  { %v2153_v41 = vpack.c.bf16 %v2152_v58, %v2151_v62  ;;  %v4811_v58 = vld [vmem:[#allocation6_spill] sm:$0xff] }
 0x928   :  { %v2289_v62 = vrot.slane %v2271_v28, %v4811_v58 }
 0x929   :  { %2631 = vmatmul.mubr.msk.bf16.vlgmr.msra.gmra.mrb[4].mxu0 %vm49_vm0, %v2153_v41  ;;  %v2850_v41 = vld [vmem:[%s4545_s11] sm:$0xff]  }
 0x92a   :  { %2650 = vmatprep.mubr.msk.bf16.mxu0 %vm2918_vm1, %v4805_v33  ;;  %2643 = vmatpush3.bf16.msra.mxu0 %v2852_v5 }
 0x92b   :  { %2644 = vmatprep.subr.bf16.mxu0 %v4805_v33 }
 0x92e   :  { %2645 = vmatpush3.bf16.msra.mxu0 %v2853_v50 }
 0x92f   :  { %2646 = vmatprep.subr.bf16.mxu0 %v4805_v33 }
 0x9fc   :  { %v2207_v56 = vpop.f32.mrb[4].mxu0 }
 0x9fd   :  { %v4452_v19 = vadd.f32 %v2207_v56, %v4806_v46  ;;  %v2632_v38 = vpop.f32.mrb[5].mxu0  ;;  %v2283_v46 = vrot.slane %v2264_v6, %v4811_v58 }
 0x9fe   :  { %v2210_v23 = vpop.f32.mrb[6].mxu0 }
 0x9ff   :  { %v4455_v18 = vadd.f32 %v2210_v23, %v4807_v55  ;;  %v2633_v52 = vpop.f32.mrb[7].mxu0  ;;  %v2216_v31 = vsel %vm49_vm0, %v4452_v19, 0.0 }
 0xa00   :  { %2217 = vadd.xlane.f32.xlu0 %v2216_v31  ;;  %v2851_v52 = vld [vmem:[%s4545_s11 + $0x8] sm:$0xff]  }
 0xa01   :  { %v2219_v44 = vsel %vm49_vm0, %v4455_v18, 0.0 }
 0xa02   :  { %2220 = vadd.xlane.f32.xlu1 %v2219_v44 }
 0xa8d   :  { %v2218_v20 = vpop.xlane.xlu0 %2217 }
 0xa8e   :  { %v2222_v59 = vmul.f32 0.03125, %v2218_v20 }
 0xa8f   :  { %v2221_v37 = vpop.xlane.xlu1 %2220 }
 0xa90   :  { %v2224_v26 = vsub.f32 %v4452_v19, %v2222_v59  ;;  %v2223_v57 = vmul.f32 0.03125, %v2221_v37  ;;  %v2854_v37 = vld [vmem:[%s4546_s12 + $0x10] sm:$0xff]  }
 0xa91   :  { %2647 = vmatpush3.bf16.msra.mxu0 %v2854_v37 }
 0xa92   :  { %v2225_v43 = vsub.f32 %v4455_v18, %v2223_v57  ;;  %v2226_v29 = vmul.f32 %v2224_v26, %v2224_v26  ;;  %2648 = vmatprep.subr.bf16.mxu0 %v4805_v33 }
 0xa94   :  { %v2228_v39 = vsel %vm49_vm0, %v2226_v29, 0.0  ;;  %v2227_v48 = vmul.f32 %v2225_v43, %v2225_v43 }
 0xa95   :  { %2229 = vadd.xlane.f32.xlu0 %v2228_v39 }
 0xa96   :  { %v2231_v2 = vsel %vm49_vm0, %v2227_v48, 0.0 }
 0xa99   :  { %2232 = vadd.xlane.f32.xlu0 %v2231_v2 }
 0xb22   :  { %v2230_v32 = vpop.xlane.xlu0 %2229 }
 0xb23   :  { %v2234_v16 = vmul.f32 0.03125, %v2230_v32 }
 0xb25   :  { %v2236_v42 = vadd.f32 1e-05, %v2234_v16 }
 0xb26   :  { %v2233_v49 = vpop.xlane.xlu0 %2232 }
 0xb27   :  { %2880 = vrsqrt.f32 %v2236_v42  ;;  %v2235_v15 = vmul.f32 0.03125, %v2233_v49 }
 0xb29   :  { %v2237_v30 = vadd.f32 1e-05, %v2235_v15 }
 0xb2b   :  { %2882 = vrsqrt.f32 %v2237_v30 }
 0xb31   :  { %v2881_v60 = vpop.eup %2880 }
 0xb32   :  { %v2240_v1 = vmul.f32 %v2881_v60, %v2224_v26  ;;  %v2855_v26 = vld [vmem:[%s4546_s12 + $0x18] sm:$0xff]   ;;  %s2932_s12 = smov [#allocation2]  }
 0xb33   :  { %2649 = vmatpush3.bf16.msra.mxu0 %v2855_v26  ;;  %s2520_s25 = sshll.u32 %s2932_s12, 4  ;;  %s2521_s25 = int_to_ptr.vmem [resolvable:$true] %s2520_s25 }
 0xb34   :  { %v2246_v22 = vmul.f32 %v2245_v34, %v2240_v1  ;;  %s2893_s8 = scalar_lea.vmem %s2521_s25, 256  ;;  %p2898_p1 = scmp.lt.s32.totalorder %s2521_s25, %s2521_s25 }
 0xb35   :  { %v2883_v63 = vpop.eup %2882  ;;  %p2894_p0 = scmp.ne.s32.totalorder %s2521_s25, %s2893_s8  ;;  %p2899_p2 = scmp.lt.s32.totalorder %s2893_s8, %s2893_s8 }
 0xb36   :  { %v2252_v11 = vadd.f32 %v2251_v45, %v2246_v22  ;;  %v2241_v3 = vmul.f32 %v2883_v63, %v2225_v43 }
 0xb37   :  { %p2900_p3 = por %p2899_p2, %p2898_p1 }
 0xb38   :  { %v2256_v8 = vrot.slane %v2252_v11, 7  ;;  %v2247_v24 = vmul.f32 %v2245_v34, %v2241_v3  ;;  %v2269_v47 = vmul.f32 %v2268_v7, %v2252_v11  ;;  %v2284_v31 = vmul.f32 %v2283_v46, %v2252_v11 }
 0xb39   :  { %p2901_p4 = pnand %p2900_p3, %p2894_p0 }
 0xb3a   :  { %v2261_v35 = vsel %vm129_vm2, 0.0, %v2256_v8  ;;  %v2253_v4 = vadd.f32 %v2251_v45, %v2247_v24 }
 0xb3b   :  { %v2262_v10 = vsel %vm3095_vm3, 0.0, %v2261_v35 }
 0xb3c   :  { %v2257_v14 = vrot.slane %v2253_v4, 7  ;;  %v2276_v54 = vmul.f32 %v2275_v17, %v2262_v10  ;;  %v2270_v12 = vmul.f32 %v2268_v7, %v2253_v4  ;;  %v2285_v23 = vmul.f32 %v2283_v46, %v2253_v4 }
 0xb3d   :  { %v2290_v55 = vmul.f32 %v2289_v62, %v2262_v10 }
 0xb3e   :  { %v2258_v27 = vsel %vm129_vm2, %v2256_v8, %v2257_v14  ;;  %v2278_v40 = vadd.f32 %v2276_v54, %v2269_v47 }
 0xb3f   :  { %v2263_v25 = vsel %vm3099_vm4, 0.0, %v2258_v27  ;;  %v2292_v20 = vadd.f32 %v2290_v55, %v2284_v31 }
 0xb40   :  { %v2277_v61 = vmul.f32 %v2275_v17, %v2263_v25  ;;  %v2291_v38 = vmul.f32 %v2289_v62, %v2263_v25 }
 0xb42   :  { %v2279_v0 = vadd.f32 %v2277_v61, %v2270_v12  ;;  %v2293_v44 = vadd.f32 %v2291_v38, %v2285_v23 }
 0xb44   :  { %v2294_v56 = vpack.c.bf16 %v2279_v0, %v2278_v40  ;;  %v2436_v59 = vpack.c.bf16 %v2293_v44, %v2292_v20 }
 0xb46   :  { %2639 = vmatmul.mubr.msk.bf16.vlgmr.msra.gmra.mrb[8].mxu1 %vm49_vm0, %v2294_v56 }
 0xb47   :  { %2655 = vmatpush3.bf16.msra.mxu1 %v2850_v41  ;;  %2658 = vmatprep.mubr.msk.bf16.mxu1 %vm2918_vm1, %v4805_v33 }
 0xb48   :  { %2656 = vmatprep.subr.bf16.mxu1 %v4805_v33 }
 0xb4b   :  { %2657 = vmatpush3.bf16.msra.mxu1 %v2851_v52 }
 0xb4e   :  { %2659 = vmatmul.mubr.msk.bf16.vlgmr.msra.gmra.mrb[12].mxu1 %vm49_vm0, %v2436_v59 }
 0xc19   :  { %v2348_v57 = vpop.f32.mrb[8].mxu1 }
 0xc1a   :  { %v2355_v43 = vmax.f32 %v2348_v57, 0.0  ;;  %v2640_v29 = vpop.f32.mrb[9].mxu1 }
 0xc1b   :  { %v2351_v39 = vpop.f32.mrb[10].mxu1 }
 0xc1c   :  { %v2356_v48 = vmax.f32 %v2351_v39, 0.0  ;;  %v2641_v2 = vpop.f32.mrb[11].mxu1  ;;  %v2357_v21 = vmul.f32 %v2355_v43, %v2355_v43 }
 0xc1e   :  { %v2358_v36 = vmul.f32 %v2356_v48, %v2356_v48 }
 0xc20   :  { %v2359_v5 = vpack.c.bf16 %v2358_v36, %v2357_v21 }
 0xc21   :  { %v2490_v50 = vpop.f32.mrb[12].mxu1 }
 0xc22   :  { %2651 = vmatmul.mubr.msk.bf16.vlgmr.msra.gmra.mrb[8].mxu0 %vm342_vm7, %v2359_v5  ;;  %v2660_v32 = vpop.f32.mrb[13].mxu1  ;;  %v2573_v42 = vmul.f32 -1.442695, %v2490_v50 }
 0xc23   :  { %v2493_v16 = vpop.f32.mrb[14].mxu1 }
 0xc24   :  { %v2661_v33 = vpop.f32.mrb[15].mxu1  ;;  %v2574_v49 = vmul.f32 -1.442695, %v2493_v16  ;;  %2884 = vpow2.f32 %v2573_v42 }
 0xc26   :  { %2886 = vpow2.f32 %v2574_v49 }
 0xc2e   :  { %v2885_v15 = vpop.eup %2884 }
 0xc2f   :  { %v2503_v51 = vadd.f32 1.0, %v2885_v15 }
 0xc30   :  { %v2887_v30 = vpop.eup %2886 }
 0xc31   :  { %v2504_v34 = vadd.f32 1.0, %v2887_v30  ;;  %2888 = vrcp.f32 %v2503_v51 }
 0xc33   :  { %2890 = vrcp.f32 %v2504_v34 }
 0xc3b   :  { %v2889_v60 = vpop.eup %2888 }
 0xc3d   :  { %v2891_v63 = vpop.eup %2890 }
 0xcf5   :  { %v2429_v45 = vpop.f32.mrb[8].mxu0 }
 0xcf6   :  { %v2509_v1 = vmul.f32 %v2889_v60, %v2429_v45  ;;  %v2652_v22 = vpop.f32.mrb[9].mxu0 }
 0xcf7   :  { %v2432_v6 = vpop.f32.mrb[10].mxu0 }
 0xcf8   :  { %v2511_v11 = vadd.f32 %v2509_v1, %v4452_v19  ;;  %v2510_v3 = vmul.f32 %v2891_v63, %v2432_v6  ;;  %v2653_v28 = vpop.f32.mrb[11].mxu0 }
 0xcfa   :  { %2513 = vst.msk [vmem:[#allocation2] sm:$0xff] %vm49_vm0, %v2511_v11  ;;  %v2512_v8 = vadd.f32 %v2510_v3, %v4455_v18 }
 0xcfc   :  { %2514 = vst.msk [vmem:[#allocation2 + $0x8] sm:$0xff] %vm49_vm0, %v2512_v8 }
 0xcfd   :  { %2904 = shalt.err (!%p2901_p4)
}
 0xcfe   :  { %s2905_s3 = scalar_lea.hbm %s4547_s13, 256 }
 0xcff   :  { %p2906_p5 = scmp.ne.s32.totalorder %s4547_s13, %s2905_s3  ;;  %p2909_p6 = scmp.lt.u32.totalorder %s2905_s3, %s4547_s13 }
 0xd01   :  { %p2911_p7 = pnand %p2909_p6, %p2906_p5 }
 0xd03   :  { %2914 = shalt.err (!%p2911_p7)
}
 0xd04   :  { %s2933_s6 = smov 128   ;;  %s2934_s14 = smov 8  }
 0xd05   :  { %2526 = dma.vmem_to_hbm [thread:$0]  %s2521_s25, 256, %s4547_s13, [#allocation3], %s2933_s6, %s2933_s6, %s2934_s14  }
 0xd06   :  { %2915 = dma.done.wait [#allocation3], 256  }
 0xd07   :  { %2916 = vsyncadd [#allocation3], 4294967040 }
 0xd08   :  { %2530 = vsyncpa [#allocation3], 1 }

</bundles_post_ra>
